<compile_context>
chip_gen: v7x
topology: tpu7x:2x2x1
jax: 0.10.0
libtpu: 0.0.40
codegen_flags: <defaults>
</compile_context>

<pallas_src>
import functools
import math
import numpy as np

import jax
import jax.numpy as jnp
from jax import lax
from jax.experimental import pallas as pl
from jax.experimental.pallas import tpu as pltpu


# ------------------------------------------------------------------ kernels ---

def encoder_layer_kernel(x_ref, g1_ref, wqkva_ref, wkb_ref, wvb_ref, wo_ref,
                         g2_ref, w12_ref, b12_ref, w3_ref, b3_ref, out_ref,
                         *, num_heads):
    """One EncoderLayer: RMSNorm -> MLA attention -> residual -> RMSNorm -> SwiGLU -> residual.

    Prepared weight layout (bf16):
      wqkva : (D, H*hd + 2L) == [ Wq (rotary + 1/sqrt(hd) folded) | Wk_a | Wv_a ]
      wkb   : (L, H*hd)  rotary folded into per-head blocks
      wvb   : (L, H*hd)
      wo    : (H*hd, D)
      w12   : (D, 2*hidden) == [ W1 | W2 ]
      w3    : (hidden, D)
    Norm gains / biases stay f32; elementwise math stays f32; matmuls are
    bf16 x bf16 -> f32 accumulate on the MXU.
    """
    x = x_ref[0]                                    # (S, D) f32
    S, D = x.shape
    H = num_heads
    L = wkb_ref.shape[0]
    Hhd = wkb_ref.shape[1]
    hd = Hhd // H
    hidden = w3_ref.shape[0]

    # --- RMSNorm 1 (no eps, matches reference); rsqrt goes to EUP (no VALU divide) ---
    xn = x * lax.rsqrt(jnp.mean(x * x, axis=-1, keepdims=True)) * g1_ref[...]
    xn_b = xn.astype(jnp.bfloat16)

    # --- fused Q / K-latent / V-latent projection: one (S,D)@(D,H*hd+2L) matmul ---
    qkva = jnp.dot(xn_b, wqkva_ref[...], preferred_element_type=jnp.float32)
    q = qkva[:, :Hhd]                               # rotary + score scale already applied
    klat = qkva[:, Hhd:Hhd + L].astype(jnp.bfloat16)
    vlat = qkva[:, Hhd + L:].astype(jnp.bfloat16)

    # --- head-fused up-projections from the latents ---
    k = jnp.dot(klat, wkb_ref[...], preferred_element_type=jnp.float32)   # (S, H*hd)
    v = jnp.dot(vlat, wvb_ref[...], preferred_element_type=jnp.float32)   # (S, H*hd)

    q_b = q.astype(jnp.bfloat16)
    k_b = k.astype(jnp.bfloat16)
    v_b = v.astype(jnp.bfloat16)

    # --- causal attention (mask True above diagonal); scores/softmax kept in f32 ---
    row = lax.broadcasted_iota(jnp.int32, (S, S), 0)
    col = lax.broadcasted_iota(jnp.int32, (S, S), 1)
    causal = col > row

    head_outs = []
    for h in range(H):                              # static unroll over the (small) head count
        sl = slice(h * hd, (h + 1) * hd)
        s = jnp.einsum('qd,kd->qk', q_b[:, sl], k_b[:, sl],
                       preferred_element_type=jnp.float32)                # (S, S)
        s = jnp.where(causal, -1e30, s)
        p = jax.nn.softmax(s, axis=-1)
        head_outs.append(jnp.dot(p.astype(jnp.bfloat16), v_b[:, sl],
                                 preferred_element_type=jnp.float32))     # (S, hd)
    o_flat = jnp.concatenate(head_outs, axis=-1).astype(jnp.bfloat16)     # (S, H*hd)
    attn = jnp.dot(o_flat, wo_ref[...], preferred_element_type=jnp.float32)

    x1 = x + attn

    # --- RMSNorm 2 + SwiGLU MLP (gate/up fused into one matmul) ---
    xn2 = x1 * lax.rsqrt(jnp.mean(x1 * x1, axis=-1, keepdims=True)) * g2_ref[...]
    h12 = jnp.dot(xn2.astype(jnp.bfloat16), w12_ref[...],
                  preferred_element_type=jnp.float32) + b12_ref[...]
    hh = jax.nn.silu(h12[:, :hidden]) * h12[:, hidden:]
    mlp = jnp.dot(hh.astype(jnp.bfloat16), w3_ref[...],
                  preferred_element_type=jnp.float32) + b3_ref[...]

    out_ref[0] = (x1 + mlp).astype(out_ref.dtype)


def final_head_kernel(x_ref, g_ref, wout_ref, out_ref):
    """Final RMSNorm + tied output projection; vocab dimension streamed in tiles."""
    x = x_ref[0]                                    # (S, D) f32
    xn = x * lax.rsqrt(jnp.mean(x * x, axis=-1, keepdims=True)) * g_ref[...]
    out_ref[0] = jnp.dot(xn.astype(jnp.bfloat16), wout_ref[...],
                         preferred_element_type=jnp.float32).astype(out_ref.dtype)


# ------------------------------------------------------------- pallas glue ---

_VMEM_LIMIT = 32 * 1024 * 1024   # explicit; safe on v5e/v6e/v7x


def encoder_layer_pallas(x, p, num_heads):
    B, S, D = x.shape
    args = (x, p['g1'], p['w_qkva'], p['w_kb'], p['w_vb'], p['w_o'],
            p['g2'], p['w12'], p['b12'], p['w3'], p['b3'])

    def wspec(a):
        nd = a.ndim
        return pl.BlockSpec(a.shape, lambda b, nd=nd: (0,) * nd)

    in_specs = [pl.BlockSpec((1, S, D), lambda b: (b, 0, 0))] + \
               [wspec(a) for a in args[1:]]
    return pl.pallas_call(
        functools.partial(encoder_layer_kernel, num_heads=num_heads),
        out_shape=jax.ShapeDtypeStruct((B, S, D), jnp.float32),
        grid=(B,),
        in_specs=in_specs,
        out_specs=pl.BlockSpec((1, S, D), lambda b: (b, 0, 0)),
        compiler_params=pltpu.CompilerParams(
            dimension_semantics=("parallel",),
            vmem_limit_bytes=_VMEM_LIMIT),
    )(*args)


def final_head_pallas(x, gamma, wout):
    B, S, D = x.shape
    V = wout.shape[1]
    # Stream the output projection over vocab tiles: largest divisor of V up to 512
    # keeps per-step overhead low and stores lane-dense.
    v_tile = V
    for cand in (512, 256, 128):
        if V % cand == 0:
            v_tile = cand
            break
    nv = V // v_tile
    return pl.pallas_call(
        final_head_kernel,
        out_shape=jax.ShapeDtypeStruct((B, S, V), jnp.float32),
        grid=(B, nv),
        in_specs=[pl.BlockSpec((1, S, D), lambda b, v: (b, 0, 0)),
                  pl.BlockSpec(gamma.shape, lambda b, v: (0, 0)),
                  pl.BlockSpec((D, v_tile), lambda b, v: (0, v))],
        out_specs=pl.BlockSpec((1, S, v_tile), lambda b, v: (b, 0, v)),
        compiler_params=pltpu.CompilerParams(
            dimension_semantics=("parallel", "parallel"),
            vmem_limit_bytes=_VMEM_LIMIT),
    )(x, gamma, wout)


def model_forward_pallas(input_ids, prep):
    x = prep['emb'][input_ids]                      # glue: embedding gather (f32)
    for lp in prep['layers']:
        x = encoder_layer_pallas(x, lp, prep['num_heads'])
    return final_head_pallas(x, prep['g_final'], prep['wout'])


# ------------------------------------------------------------------- params ---

def rotary_matrices(num_heads, head_dim, d_rope, theta=10000.0):
    """Per-head rotation matrices reproducing apply_decoupled_rotary_embed, where the
    frequency row index is the head index (since x is (B, H, S, hd) at the call site)."""
    R = np.tile(np.eye(head_dim, dtype=np.float32), (num_heads, 1, 1))
    theta_num = np.arange(0, head_dim, 2).astype(np.float32)
    theta_values = 1.0 / theta ** (theta_num / head_dim)
    for h in range(num_heads):
        for j in range(d_rope // 2):
            ang = h * theta_values[j]
            c, s = np.cos(ang), np.sin(ang)
            R[h, 2 * j, 2 * j] = c
            R[h, 2 * j, 2 * j + 1] = s
            R[h, 2 * j + 1, 2 * j] = -s
            R[h, 2 * j + 1, 2 * j + 1] = c
    return jnp.asarray(R)


def init_raw_params(key, dim, num_heads, hidden_dim, num_layers, vocab_size):
    head_dim = dim // num_heads
    latent_dim = dim // num_heads                 # MiniDeepseek: latent_dim = dim // num_heads
    d_rope = dim // (4 * num_heads)
    assert d_rope % 2 == 0 and d_rope <= head_dim
    std = 0.02
    keys = jax.random.split(key, num_layers + 1)
    layers = []
    for l in range(num_layers):
        lk = jax.random.split(keys[l], 12)
        layers.append(dict(
            g1=jnp.ones((1, dim), jnp.float32),
            wq=std * jax.random.normal(lk[0], (num_heads, dim, head_dim), jnp.float32),
            wka=std * jax.random.normal(lk[1], (dim, latent_dim), jnp.float32),
            wkb=std * jax.random.normal(lk[2], (num_heads, latent_dim, head_dim), jnp.float32),
            wva=std * jax.random.normal(lk[3], (dim, latent_dim), jnp.float32),
            wvb=std * jax.random.normal(lk[4], (num_heads, latent_dim, head_dim), jnp.float32),
            wo=std * jax.random.normal(lk[5], (num_heads, head_dim, dim), jnp.float32),
            g2=jnp.ones((1, dim), jnp.float32),
            w1=std * jax.random.normal(lk[6], (dim, hidden_dim), jnp.float32),
            b1=std * jax.random.normal(lk[7], (1, hidden_dim), jnp.float32),
            w2=std * jax.random.normal(lk[8], (dim, hidden_dim), jnp.float32),
            b2=std * jax.random.normal(lk[9], (1, hidden_dim), jnp.float32),
            w3=std * jax.random.normal(lk[10], (hidden_dim, dim), jnp.float32),
            b3=std * jax.random.normal(lk[11], (1, dim), jnp.float32),
        ))
    emb = std * jax.random.normal(keys[-1], (vocab_size, dim), jnp.float32)
    return dict(layers=layers, emb=emb,
                g_final=jnp.ones((1, dim), jnp.float32),
                rot=rotary_matrices(num_heads, head_dim, d_rope))


def prepare_params(raw):
    """Fold rotary + attention scale into Wq/Wk_b, fuse per-head / paired projections,
    and cast matmul weights to bf16 (norm gains / biases stay f32)."""
    rot = raw['rot']                                  # (H, hd, hd)
    H, hd, _ = rot.shape
    inv_scale = 1.0 / math.sqrt(hd)
    layers = []
    for p in raw['layers']:
        D = p['wq'].shape[1]
        L = p['wka'].shape[1]
        wq_r = jnp.einsum('hde,hef->hdf', p['wq'], rot) * inv_scale   # rotary + score scale
        wkb_r = jnp.einsum('hle,hef->hlf', p['wkb'], rot)             # rotary folded
        wq_all = jnp.transpose(wq_r, (1, 0, 2)).reshape(D, H * hd)
        wkb_all = jnp.transpose(wkb_r, (1, 0, 2)).reshape(L, H * hd)
        wvb_all = jnp.transpose(p['wvb'], (1, 0, 2)).reshape(L, H * hd)
        wo_all = p['wo'].reshape(H * hd, D)
        layers.append(dict(
            g1=p['g1'],
            w_qkva=jnp.concatenate([wq_all, p['wka'], p['wva']], axis=1).astype(jnp.bfloat16),
            w_kb=wkb_all.astype(jnp.bfloat16),
            w_vb=wvb_all.astype(jnp.bfloat16),
            w_o=wo_all.astype(jnp.bfloat16),
            g2=p['g2'],
            w12=jnp.concatenate([p['w1'], p['w2']], axis=1).astype(jnp.bfloat16),
            b12=jnp.concatenate([p['b1'], p['b2']], axis=1),
            w3=p['w3'].astype(jnp.bfloat16),
            b3=p['b3'],
        ))
    return dict(layers=layers, emb=raw['emb'], g_final=raw['g_final'],
                wout=raw['emb'].T.astype(jnp.bfloat16), num_heads=H)


# --------------------------------------------- references (plain JAX, no Pallas) ---

def _mirror_layer(x, p, H):
    """Same fused/bf16 math as the kernel, written with plain jnp ops."""
    B, S, D = x.shape
    L = p['w_kb'].shape[0]
    Hhd = p['w_kb'].shape[1]
    hd = Hhd // H
    hidden = p['w3'].shape[0]
    xn = (x * lax.rsqrt(jnp.mean(x * x, -1, keepdims=True)) * p['g1'][0]).astype(jnp.bfloat16)
    qkva = jnp.einsum('bsd,de->bse', xn, p['w_qkva'], preferred_element_type=jnp.float32)
    q = qkva[..., :Hhd]
    klat = qkva[..., Hhd:Hhd + L].astype(jnp.bfloat16)
    vlat = qkva[..., Hhd + L:].astype(jnp.bfloat16)
    k = jnp.einsum('bsl,le->bse', klat, p['w_kb'], preferred_element_type=jnp.float32)
    v = jnp.einsum('bsl,le->bse', vlat, p['w_vb'], preferred_element_type=jnp.float32)
    q3 = q.reshape(B, S, H, hd).astype(jnp.bfloat16)
    k3 = k.reshape(B, S, H, hd).astype(jnp.bfloat16)
    v3 = v.reshape(B, S, H, hd).astype(jnp.bfloat16)
    s = jnp.einsum('bqhd,bkhd->bhqk', q3, k3, preferred_element_type=jnp.float32)
    mask = jnp.triu(jnp.ones((S, S), bool), 1)
    s = jnp.where(mask[None, None], -1e30, s)
    pa = jax.nn.softmax(s, -1).astype(jnp.bfloat16)
    o = jnp.einsum('bhqk,bkhd->bqhd', pa, v3, preferred_element_type=jnp.float32)
    o_flat = o.reshape(B, S, Hhd).astype(jnp.bfloat16)
    attn = jnp.einsum('bse,ed->bsd', o_flat, p['w_o'], preferred_element_type=jnp.float32)
    x1 = x + attn
    xn2 = (x1 * lax.rsqrt(jnp.mean(x1 * x1, -1, keepdims=True)) * p['g2'][0]).astype(jnp.bfloat16)
    h12 = jnp.einsum('bsd,dh->bsh', xn2, p['w12'],
                     preferred_element_type=jnp.float32) + p['b12'][0]
    hh = (jax.nn.silu(h12[..., :hidden]) * h12[..., hidden:]).astype(jnp.bfloat16)
    mlp = jnp.einsum('bsh,hd->bsd', hh, p['w3'], preferred_element_type=jnp.float32) + p['b3'][0]
    return x1 + mlp


def model_forward_mirror(input_ids, prep):
    x = prep['emb'][input_ids]
    for lp in prep['layers']:
        x = _mirror_layer(x, lp, prep['num_heads'])
    xn = (x * lax.rsqrt(jnp.mean(x * x, -1, keepdims=True)) * prep['g_final'][0]).astype(jnp.bfloat16)
    return jnp.einsum('bsd,dv->bsv', xn, prep['wout'], preferred_element_type=jnp.float32)


def _gold_layer(x, p, rot):
    """Unfused f32 reference matching the PyTorch module structure exactly."""
    rms = jnp.sqrt(jnp.mean(x * x, -1, keepdims=True))
    xn = x / rms * p['g1'][0]
    q = jnp.einsum('bsd,hde->bhse', xn, p['wq'])
    klat = xn @ p['wka']
    vlat = xn @ p['wva']
    k = jnp.einsum('bsl,hle->bhse', klat, p['wkb'])
    v = jnp.einsum('bsl,hle->bhse', vlat, p['wvb'])
    q = jnp.einsum('bhse,hef->bhsf', q, rot)
    k = jnp.einsum('bhse,hef->bhsf', k, rot)
    hd = q.shape[-1]
    S = x.shape[1]
    s = jnp.einsum('bhqd,bhkd->bhqk', q, k) / math.sqrt(hd)
    mask = jnp.triu(jnp.ones((S, S), bool), 1)
    s = jnp.where(mask[None, None], -1e30, s)
    pa = jax.nn.softmax(s, -1)
    o = jnp.einsum('bhqk,bhkd->bhqd', pa, v)
    attn = jnp.einsum('bhsd,hdo->bso', o, p['wo'])
    x1 = x + attn
    rms2 = jnp.sqrt(jnp.mean(x1 * x1, -1, keepdims=True))
    xn2 = x1 / rms2 * p['g2'][0]
    h1 = xn2 @ p['w1'] + p['b1'][0]
    h2 = xn2 @ p['w2'] + p['b2'][0]
    mlp = (jax.nn.silu(h1) * h2) @ p['w3'] + p['b3'][0]
    return x1 + mlp


def model_forward_gold(input_ids, raw):
    x = raw['emb'][input_ids]
    for lp in raw['layers']:
        x = _gold_layer(x, lp, raw['rot'])
    rms = jnp.sqrt(jnp.mean(x * x, -1, keepdims=True))
    xn = x / rms * raw['g_final'][0]
    return xn @ raw['emb'].T


# --------------------------------------------------------------------- main ---

if __name__ == "__main__":
    # Small but lane-dense config: D, H*hd, hidden, S, V are multiples of 128 so
    # all output blocks get full-width (unmasked) vector stores.
    dim, num_heads, hidden_dim = 128, 4, 256
    num_layers, vocab_size = 2, 256
    B, S = 2, 128

    key = jax.random.PRNGKey(0)
    raw = init_raw_params(key, dim, num_heads, hidden_dim, num_layers, vocab_size)
    prep = prepare_params(raw)
    input_ids = jax.random.randint(jax.random.fold_in(key, 123), (B, S), 0, vocab_size)

    logits = jax.block_until_ready(model_forward_pallas(input_ids, prep))

    mirror = model_forward_mirror(input_ids, prep)   # same bf16/fused math, plain JAX
    gold = model_forward_gold(input_ids, raw)        # unfused f32, module-faithful

    assert logits.shape == (B, S, vocab_size)
    l = np.asarray(logits)
    assert np.all(np.isfinite(l))
    assert np.allclose(l, np.asarray(mirror), atol=5e-3, rtol=5e-3), \
        float(np.max(np.abs(l - np.asarray(mirror))))
    assert np.allclose(l, np.asarray(gold), atol=2e-2, rtol=2e-2), \
        float(np.max(np.abs(l - np.asarray(gold))))

    print("KERNEL_OK")
</pallas_src>

<mosaic_0001>
module attributes {stable_mosaic.version = 11 : i64} {
  func.func @encoder_layer_kernel(%arg0: i32, %arg1: memref<1x128x128xf32, #tpu.memory_space<vmem>>, %arg2: memref<1x128xf32, #tpu.memory_space<vmem>>, %arg3: memref<128x192xbf16, #tpu.memory_space<vmem>>, %arg4: memref<32x128xbf16, #tpu.memory_space<vmem>>, %arg5: memref<32x128xbf16, #tpu.memory_space<vmem>>, %arg6: memref<128x128xbf16, #tpu.memory_space<vmem>>, %arg7: memref<1x128xf32, #tpu.memory_space<vmem>>, %arg8: memref<128x512xbf16, #tpu.memory_space<vmem>>, %arg9: memref<1x512xf32, #tpu.memory_space<vmem>>, %arg10: memref<256x128xbf16, #tpu.memory_space<vmem>>, %arg11: memref<1x128xf32, #tpu.memory_space<vmem>>, %arg12: memref<1x128x128xf32, #tpu.memory_space<vmem>>) attributes {dimension_semantics = [#tpu.dimension_semantics<parallel>], iteration_bounds = array<i64: 2>, scalar_prefetch = 0 : i64, scratch_operands = 0 : i64, tpu.core_type = #tpu.core_type<tc>, window_params = [{transform_indices = @transform_0, window_bounds = array<i64: 1, 128, 128>}, {pipeline_mode = #tpu.pipeline_mode<synchronous>, transform_indices = @transform_1, window_bounds = array<i64: 1, 128>}, {pipeline_mode = #tpu.pipeline_mode<synchronous>, transform_indices = @transform_2, window_bounds = array<i64: 128, 192>}, {pipeline_mode = #tpu.pipeline_mode<synchronous>, transform_indices = @transform_3, window_bounds = array<i64: 32, 128>}, {pipeline_mode = #tpu.pipeline_mode<synchronous>, transform_indices = @transform_4, window_bounds = array<i64: 32, 128>}, {pipeline_mode = #tpu.pipeline_mode<synchronous>, transform_indices = @transform_5, window_bounds = array<i64: 128, 128>}, {pipeline_mode = #tpu.pipeline_mode<synchronous>, transform_indices = @transform_6, window_bounds = array<i64: 1, 128>}, {pipeline_mode = #tpu.pipeline_mode<synchronous>, transform_indices = @transform_7, window_bounds = array<i64: 128, 512>}, {pipeline_mode = #tpu.pipeline_mode<synchronous>, transform_indices = @transform_8, window_bounds = array<i64: 1, 512>}, {pipeline_mode = #tpu.pipeline_mode<synchronous>, transform_indices = @transform_9, window_bounds = array<i64: 256, 128>}, {pipeline_mode = #tpu.pipeline_mode<synchronous>, transform_indices = @transform_10, window_bounds = array<i64: 1, 128>}, {transform_indices = @transform_11, window_bounds = array<i64: 1, 128, 128>}]} {
    %c0 = arith.constant 0 : index
    %c0_0 = arith.constant 0 : index
    %c0_1 = arith.constant 0 : index
    %0 = vector.load %arg1[%c0, %c0_0, %c0_1] : memref<1x128x128xf32, #tpu.memory_space<vmem>>, vector<1x128x128xf32>
    %1 = vector.shape_cast %0 : vector<1x128x128xf32> to vector<128x128xf32>
    %2 = arith.mulf %1, %1 : vector<128x128xf32>
    %cst = arith.constant dense<0.000000e+00> : vector<128xf32>
    %3 = vector.multi_reduction <add>, %2, %cst [1] : vector<128x128xf32> to vector<128xf32>
    %4 = vector.shape_cast %3 : vector<128xf32> to vector<128x1xf32>
    %cst_2 = arith.constant 1.280000e+02 : f32
    %5 = vector.broadcast %cst_2 : f32 to vector<128x1xf32>
    %6 = arith.divf %4, %5 : vector<128x1xf32>
    %7 = math.rsqrt %6 : vector<128x1xf32>
    %8 = vector.broadcast %7 : vector<128x1xf32> to vector<128x128xf32>
    %9 = arith.mulf %1, %8 : vector<128x128xf32>
    %c0_3 = arith.constant 0 : index
    %c0_4 = arith.constant 0 : index
    %10 = vector.load %arg2[%c0_3, %c0_4] : memref<1x128xf32, #tpu.memory_space<vmem>>, vector<1x128xf32>
    %11 = vector.broadcast %10 : vector<1x128xf32> to vector<128x128xf32>
    %12 = arith.mulf %9, %11 : vector<128x128xf32>
    %13 = arith.truncf %12 : vector<128x128xf32> to vector<128x128xbf16>
    %c0_5 = arith.constant 0 : index
    %c0_6 = arith.constant 0 : index
    %14 = vector.load %arg3[%c0_5, %c0_6] : memref<128x192xbf16, #tpu.memory_space<vmem>>, vector<128x192xbf16>
    %cst_7 = arith.constant dense<0.000000e+00> : vector<128x192xf32>
    %15 = tpu.matmul %13, %14, %cst_7 {dimension_numbers = #tpu.dot_dimension_numbers<[1], [0], [0], [1], [0, 0, 1, 1], [], []>} : vector<128x128xbf16>, vector<128x192xbf16>, vector<128x192xf32> -> vector<128x192xf32>
    %16 = vector.extract_strided_slice %15 {offsets = [0, 0], sizes = [128, 128], strides = [1, 1]} : vector<128x192xf32> to vector<128x128xf32>
    %17 = vector.extract_strided_slice %15 {offsets = [0, 128], sizes = [128, 32], strides = [1, 1]} : vector<128x192xf32> to vector<128x32xf32>
    %18 = arith.truncf %17 : vector<128x32xf32> to vector<128x32xbf16>
    %19 = vector.extract_strided_slice %15 {offsets = [0, 160], sizes = [128, 32], strides = [1, 1]} : vector<128x192xf32> to vector<128x32xf32>
    %20 = arith.truncf %19 : vector<128x32xf32> to vector<128x32xbf16>
    %c0_8 = arith.constant 0 : index
    %c0_9 = arith.constant 0 : index
    %21 = vector.load %arg4[%c0_8, %c0_9] : memref<32x128xbf16, #tpu.memory_space<vmem>>, vector<32x128xbf16>
    %cst_10 = arith.constant dense<0.000000e+00> : vector<128x128xf32>
    %22 = tpu.matmul %18, %21, %cst_10 {dimension_numbers = #tpu.dot_dimension_numbers<[1], [0], [0], [1], [0, 0, 1, 1], [], []>} : vector<128x32xbf16>, vector<32x128xbf16>, vector<128x128xf32> -> vector<128x128xf32>
    %c0_11 = arith.constant 0 : index
    %c0_12 = arith.constant 0 : index
    %23 = vector.load %arg5[%c0_11, %c0_12] : memref<32x128xbf16, #tpu.memory_space<vmem>>, vector<32x128xbf16>
    %cst_13 = arith.constant dense<0.000000e+00> : vector<128x128xf32>
    %24 = tpu.matmul %20, %23, %cst_13 {dimension_numbers = #tpu.dot_dimension_numbers<[1], [0], [0], [1], [0, 0, 1, 1], [], []>} : vector<128x32xbf16>, vector<32x128xbf16>, vector<128x128xf32> -> vector<128x128xf32>
    %25 = arith.truncf %16 : vector<128x128xf32> to vector<128x128xbf16>
    %26 = arith.truncf %22 : vector<128x128xf32> to vector<128x128xbf16>
    %27 = arith.truncf %24 : vector<128x128xf32> to vector<128x128xbf16>
    %28 = tpu.iota {dimensions = array<i32: 0>} : vector<128x128xi32>
    %29 = tpu.iota {dimensions = array<i32: 1>} : vector<128x128xi32>
    %30 = arith.cmpi sgt, %29, %28 : vector<128x128xi32>
    %31 = vector.extract_strided_slice %25 {offsets = [0, 0], sizes = [128, 32], strides = [1, 1]} : vector<128x128xbf16> to vector<128x32xbf16>
    %32 = vector.extract_strided_slice %26 {offsets = [0, 0], sizes = [128, 32], strides = [1, 1]} : vector<128x128xbf16> to vector<128x32xbf16>
    "tpu.trace_start"() <{level = 10 : i32, message = "qd,kd->qk"}> : () -> ()
    %cst_14 = arith.constant dense<0.000000e+00> : vector<128x128xf32>
    %33 = tpu.matmul %31, %32, %cst_14 {dimension_numbers = #tpu.dot_dimension_numbers<[1], [1], [0], [0], [0, 0, 1, 0], [], []>} : vector<128x32xbf16>, vector<128x32xbf16>, vector<128x128xf32> -> vector<128x128xf32>
    %cst_15 = arith.constant -1.000000e+30 : f32
    "tpu.trace_stop"() : () -> ()
    %34 = vector.broadcast %cst_15 : f32 to vector<128x128xf32>
    %35 = arith.select %30, %34, %33 : vector<128x128xi1>, vector<128x128xf32>
    %cst_16 = arith.constant dense<0xFF800000> : vector<128xf32>
    %36 = vector.multi_reduction <maximumf>, %35, %cst_16 [1] : vector<128x128xf32> to vector<128xf32>
    %cst_17 = arith.constant 0xFF800000 : f32
    %37 = vector.broadcast %cst_17 : f32 to vector<128xf32>
    %38 = arith.maximumf %37, %36 : vector<128xf32>
    %39 = vector.shape_cast %38 : vector<128xf32> to vector<128x1xf32>
    %40 = vector.broadcast %39 : vector<128x1xf32> to vector<128x128xf32>
    %41 = arith.subf %35, %40 : vector<128x128xf32>
    %42 = math.exp %41 : vector<128x128xf32>
    %cst_18 = arith.constant dense<0.000000e+00> : vector<128xf32>
    %43 = vector.multi_reduction <add>, %42, %cst_18 [1] : vector<128x128xf32> to vector<128xf32>
    %44 = vector.shape_cast %43 : vector<128xf32> to vector<128x1xf32>
    %45 = vector.broadcast %44 : vector<128x1xf32> to vector<128x128xf32>
    %46 = arith.divf %42, %45 : vector<128x128xf32>
    %47 = arith.truncf %46 : vector<128x128xf32> to vector<128x128xbf16>
    %48 = vector.extract_strided_slice %27 {offsets = [0, 0], sizes = [128, 32], strides = [1, 1]} : vector<128x128xbf16> to vector<128x32xbf16>
    %cst_19 = arith.constant dense<0.000000e+00> : vector<128x32xf32>
    %49 = tpu.matmul %47, %48, %cst_19 {dimension_numbers = #tpu.dot_dimension_numbers<[1], [0], [0], [1], [0, 0, 1, 1], [], []>} : vector<128x128xbf16>, vector<128x32xbf16>, vector<128x32xf32> -> vector<128x32xf32>
    %50 = vector.extract_strided_slice %25 {offsets = [0, 32], sizes = [128, 32], strides = [1, 1]} : vector<128x128xbf16> to vector<128x32xbf16>
    %51 = vector.extract_strided_slice %26 {offsets = [0, 32], sizes = [128, 32], strides = [1, 1]} : vector<128x128xbf16> to vector<128x32xbf16>
    "tpu.trace_start"() <{level = 10 : i32, message = "qd,kd->qk"}> : () -> ()
    %cst_20 = arith.constant dense<0.000000e+00> : vector<128x128xf32>
    %52 = tpu.matmul %50, %51, %cst_20 {dimension_numbers = #tpu.dot_dimension_numbers<[1], [1], [0], [0], [0, 0, 1, 0], [], []>} : vector<128x32xbf16>, vector<128x32xbf16>, vector<128x128xf32> -> vector<128x128xf32>
    %cst_21 = arith.constant -1.000000e+30 : f32
    "tpu.trace_stop"() : () -> ()
    %53 = vector.broadcast %cst_21 : f32 to vector<128x128xf32>
    %54 = arith.select %30, %53, %52 : vector<128x128xi1>, vector<128x128xf32>
    %cst_22 = arith.constant dense<0xFF800000> : vector<128xf32>
    %55 = vector.multi_reduction <maximumf>, %54, %cst_22 [1] : vector<128x128xf32> to vector<128xf32>
    %cst_23 = arith.constant 0xFF800000 : f32
    %56 = vector.broadcast %cst_23 : f32 to vector<128xf32>
    %57 = arith.maximumf %56, %55 : vector<128xf32>
    %58 = vector.shape_cast %57 : vector<128xf32> to vector<128x1xf32>
    %59 = vector.broadcast %58 : vector<128x1xf32> to vector<128x128xf32>
    %60 = arith.subf %54, %59 : vector<128x128xf32>
    %61 = math.exp %60 : vector<128x128xf32>
    %cst_24 = arith.constant dense<0.000000e+00> : vector<128xf32>
    %62 = vector.multi_reduction <add>, %61, %cst_24 [1] : vector<128x128xf32> to vector<128xf32>
    %63 = vector.shape_cast %62 : vector<128xf32> to vector<128x1xf32>
    %64 = vector.broadcast %63 : vector<128x1xf32> to vector<128x128xf32>
    %65 = arith.divf %61, %64 : vector<128x128xf32>
    %66 = arith.truncf %65 : vector<128x128xf32> to vector<128x128xbf16>
    %67 = vector.extract_strided_slice %27 {offsets = [0, 32], sizes = [128, 32], strides = [1, 1]} : vector<128x128xbf16> to vector<128x32xbf16>
    %cst_25 = arith.constant dense<0.000000e+00> : vector<128x32xf32>
    %68 = tpu.matmul %66, %67, %cst_25 {dimension_numbers = #tpu.dot_dimension_numbers<[1], [0], [0], [1], [0, 0, 1, 1], [], []>} : vector<128x128xbf16>, vector<128x32xbf16>, vector<128x32xf32> -> vector<128x32xf32>
    %69 = vector.extract_strided_slice %25 {offsets = [0, 64], sizes = [128, 32], strides = [1, 1]} : vector<128x128xbf16> to vector<128x32xbf16>
    %70 = vector.extract_strided_slice %26 {offsets = [0, 64], sizes = [128, 32], strides = [1, 1]} : vector<128x128xbf16> to vector<128x32xbf16>
    "tpu.trace_start"() <{level = 10 : i32, message = "qd,kd->qk"}> : () -> ()
    %cst_26 = arith.constant dense<0.000000e+00> : vector<128x128xf32>
    %71 = tpu.matmul %69, %70, %cst_26 {dimension_numbers = #tpu.dot_dimension_numbers<[1], [1], [0], [0], [0, 0, 1, 0], [], []>} : vector<128x32xbf16>, vector<128x32xbf16>, vector<128x128xf32> -> vector<128x128xf32>
    %cst_27 = arith.constant -1.000000e+30 : f32
    "tpu.trace_stop"() : () -> ()
    %72 = vector.broadcast %cst_27 : f32 to vector<128x128xf32>
    %73 = arith.select %30, %72, %71 : vector<128x128xi1>, vector<128x128xf32>
    %cst_28 = arith.constant dense<0xFF800000> : vector<128xf32>
    %74 = vector.multi_reduction <maximumf>, %73, %cst_28 [1] : vector<128x128xf32> to vector<128xf32>
    %cst_29 = arith.constant 0xFF800000 : f32
    %75 = vector.broadcast %cst_29 : f32 to vector<128xf32>
    %76 = arith.maximumf %75, %74 : vector<128xf32>
    %77 = vector.shape_cast %76 : vector<128xf32> to vector<128x1xf32>
    %78 = vector.broadcast %77 : vector<128x1xf32> to vector<128x128xf32>
    %79 = arith.subf %73, %78 : vector<128x128xf32>
    %80 = math.exp %79 : vector<128x128xf32>
    %cst_30 = arith.constant dense<0.000000e+00> : vector<128xf32>
    %81 = vector.multi_reduction <add>, %80, %cst_30 [1] : vector<128x128xf32> to vector<128xf32>
    %82 = vector.shape_cast %81 : vector<128xf32> to vector<128x1xf32>
    %83 = vector.broadcast %82 : vector<128x1xf32> to vector<128x128xf32>
    %84 = arith.divf %80, %83 : vector<128x128xf32>
    %85 = arith.truncf %84 : vector<128x128xf32> to vector<128x128xbf16>
    %86 = vector.extract_strided_slice %27 {offsets = [0, 64], sizes = [128, 32], strides = [1, 1]} : vector<128x128xbf16> to vector<128x32xbf16>
    %cst_31 = arith.constant dense<0.000000e+00> : vector<128x32xf32>
    %87 = tpu.matmul %85, %86, %cst_31 {dimension_numbers = #tpu.dot_dimension_numbers<[1], [0], [0], [1], [0, 0, 1, 1], [], []>} : vector<128x128xbf16>, vector<128x32xbf16>, vector<128x32xf32> -> vector<128x32xf32>
    %88 = vector.extract_strided_slice %25 {offsets = [0, 96], sizes = [128, 32], strides = [1, 1]} : vector<128x128xbf16> to vector<128x32xbf16>
    %89 = vector.extract_strided_slice %26 {offsets = [0, 96], sizes = [128, 32], strides = [1, 1]} : vector<128x128xbf16> to vector<128x32xbf16>
    "tpu.trace_start"() <{level = 10 : i32, message = "qd,kd->qk"}> : () -> ()
    %cst_32 = arith.constant dense<0.000000e+00> : vector<128x128xf32>
    %90 = tpu.matmul %88, %89, %cst_32 {dimension_numbers = #tpu.dot_dimension_numbers<[1], [1], [0], [0], [0, 0, 1, 0], [], []>} : vector<128x32xbf16>, vector<128x32xbf16>, vector<128x128xf32> -> vector<128x128xf32>
    %cst_33 = arith.constant -1.000000e+30 : f32
    "tpu.trace_stop"() : () -> ()
    %91 = vector.broadcast %cst_33 : f32 to vector<128x128xf32>
    %92 = arith.select %30, %91, %90 : vector<128x128xi1>, vector<128x128xf32>
    %cst_34 = arith.constant dense<0xFF800000> : vector<128xf32>
    %93 = vector.multi_reduction <maximumf>, %92, %cst_34 [1] : vector<128x128xf32> to vector<128xf32>
    %cst_35 = arith.constant 0xFF800000 : f32
    %94 = vector.broadcast %cst_35 : f32 to vector<128xf32>
    %95 = arith.maximumf %94, %93 : vector<128xf32>
    %96 = vector.shape_cast %95 : vector<128xf32> to vector<128x1xf32>
    %97 = vector.broadcast %96 : vector<128x1xf32> to vector<128x128xf32>
    %98 = arith.subf %92, %97 : vector<128x128xf32>
    %99 = math.exp %98 : vector<128x128xf32>
    %cst_36 = arith.constant dense<0.000000e+00> : vector<128xf32>
    %100 = vector.multi_reduction <add>, %99, %cst_36 [1] : vector<128x128xf32> to vector<128xf32>
    %101 = vector.shape_cast %100 : vector<128xf32> to vector<128x1xf32>
    %102 = vector.broadcast %101 : vector<128x1xf32> to vector<128x128xf32>
    %103 = arith.divf %99, %102 : vector<128x128xf32>
    %104 = arith.truncf %103 : vector<128x128xf32> to vector<128x128xbf16>
    %105 = vector.extract_strided_slice %27 {offsets = [0, 96], sizes = [128, 32], strides = [1, 1]} : vector<128x128xbf16> to vector<128x32xbf16>
    %cst_37 = arith.constant dense<0.000000e+00> : vector<128x32xf32>
    %106 = tpu.matmul %104, %105, %cst_37 {dimension_numbers = #tpu.dot_dimension_numbers<[1], [0], [0], [1], [0, 0, 1, 1], [], []>} : vector<128x128xbf16>, vector<128x32xbf16>, vector<128x32xf32> -> vector<128x32xf32>
    %107 = tpu.concatenate %49, %68, %87, %106 in 1 : vector<128x32xf32>, vector<128x32xf32>, vector<128x32xf32>, vector<128x32xf32> -> vector<128x128xf32>
    %108 = arith.truncf %107 : vector<128x128xf32> to vector<128x128xbf16>
    %c0_38 = arith.constant 0 : index
    %c0_39 = arith.constant 0 : index
    %109 = vector.load %arg6[%c0_38, %c0_39] : memref<128x128xbf16, #tpu.memory_space<vmem>>, vector<128x128xbf16>
    %cst_40 = arith.constant dense<0.000000e+00> : vector<128x128xf32>
    %110 = tpu.matmul %108, %109, %cst_40 {dimension_numbers = #tpu.dot_dimension_numbers<[1], [0], [0], [1], [0, 0, 1, 1], [], []>} : vector<128x128xbf16>, vector<128x128xbf16>, vector<128x128xf32> -> vector<128x128xf32>
    %111 = arith.addf %1, %110 : vector<128x128xf32>
    %112 = arith.mulf %111, %111 : vector<128x128xf32>
    %cst_41 = arith.constant dense<0.000000e+00> : vector<128xf32>
    %113 = vector.multi_reduction <add>, %112, %cst_41 [1] : vector<128x128xf32> to vector<128xf32>
    %114 = vector.shape_cast %113 : vector<128xf32> to vector<128x1xf32>
    %cst_42 = arith.constant 1.280000e+02 : f32
    %115 = vector.broadcast %cst_42 : f32 to vector<128x1xf32>
    %116 = arith.divf %114, %115 : vector<128x1xf32>
    %117 = math.rsqrt %116 : vector<128x1xf32>
    %118 = vector.broadcast %117 : vector<128x1xf32> to vector<128x128xf32>
    %119 = arith.mulf %111, %118 : vector<128x128xf32>
    %c0_43 = arith.constant 0 : index
    %c0_44 = arith.constant 0 : index
    %120 = vector.load %arg7[%c0_43, %c0_44] : memref<1x128xf32, #tpu.memory_space<vmem>>, vector<1x128xf32>
    %121 = vector.broadcast %120 : vector<1x128xf32> to vector<128x128xf32>
    %122 = arith.mulf %119, %121 : vector<128x128xf32>
    %123 = arith.truncf %122 : vector<128x128xf32> to vector<128x128xbf16>
    %c0_45 = arith.constant 0 : index
    %c0_46 = arith.constant 0 : index
    %124 = vector.load %arg8[%c0_45, %c0_46] : memref<128x512xbf16, #tpu.memory_space<vmem>>, vector<128x512xbf16>
    %cst_47 = arith.constant dense<0.000000e+00> : vector<128x512xf32>
    %125 = tpu.matmul %123, %124, %cst_47 {dimension_numbers = #tpu.dot_dimension_numbers<[1], [0], [0], [1], [0, 0, 1, 1], [], []>} : vector<128x128xbf16>, vector<128x512xbf16>, vector<128x512xf32> -> vector<128x512xf32>
    %c0_48 = arith.constant 0 : index
    %c0_49 = arith.constant 0 : index
    %126 = vector.load %arg9[%c0_48, %c0_49] : memref<1x512xf32, #tpu.memory_space<vmem>>, vector<1x512xf32>
    %127 = vector.broadcast %126 : vector<1x512xf32> to vector<128x512xf32>
    %128 = arith.addf %125, %127 : vector<128x512xf32>
    %129 = vector.extract_strided_slice %128 {offsets = [0, 0], sizes = [128, 256], strides = [1, 1]} : vector<128x512xf32> to vector<128x256xf32>
    %130 = arith.negf %129 : vector<128x256xf32>
    %131 = math.exp %130 : vector<128x256xf32>
    %cst_50 = arith.constant 1.000000e+00 : f32
    %132 = vector.broadcast %cst_50 : f32 to vector<128x256xf32>
    %133 = arith.addf %132, %131 : vector<128x256xf32>
    %134 = arith.divf %132, %133 : vector<128x256xf32>
    %135 = arith.mulf %129, %134 : vector<128x256xf32>
    %136 = vector.extract_strided_slice %128 {offsets = [0, 256], sizes = [128, 256], strides = [1, 1]} : vector<128x512xf32> to vector<128x256xf32>
    %137 = arith.mulf %135, %136 : vector<128x256xf32>
    %138 = arith.truncf %137 : vector<128x256xf32> to vector<128x256xbf16>
    %c0_51 = arith.constant 0 : index
    %c0_52 = arith.constant 0 : index
    %139 = vector.load %arg10[%c0_51, %c0_52] : memref<256x128xbf16, #tpu.memory_space<vmem>>, vector<256x128xbf16>
    %cst_53 = arith.constant dense<0.000000e+00> : vector<128x128xf32>
    %140 = tpu.matmul %138, %139, %cst_53 {dimension_numbers = #tpu.dot_dimension_numbers<[1], [0], [0], [1], [0, 0, 1, 1], [], []>} : vector<128x256xbf16>, vector<256x128xbf16>, vector<128x128xf32> -> vector<128x128xf32>
    %c0_54 = arith.constant 0 : index
    %c0_55 = arith.constant 0 : index
    %141 = vector.load %arg11[%c0_54, %c0_55] : memref<1x128xf32, #tpu.memory_space<vmem>>, vector<1x128xf32>
    %142 = vector.broadcast %141 : vector<1x128xf32> to vector<128x128xf32>
    %143 = arith.addf %140, %142 : vector<128x128xf32>
    %144 = arith.addf %111, %143 : vector<128x128xf32>
    %c0_56 = arith.constant 0 : index
    %c0_57 = arith.constant 0 : index
    %c0_58 = arith.constant 0 : index
    %145 = vector.load %arg12[%c0_56, %c0_57, %c0_58] : memref<1x128x128xf32, #tpu.memory_space<vmem>>, vector<1x128x128xf32>
    %146 = vector.shape_cast %145 : vector<1x128x128xf32> to vector<128x128xf32>
    %147 = vector.shape_cast %144 : vector<128x128xf32> to vector<1x128x128xf32>
    tpu.vector_store %arg12[%c0_56, %c0_57, %c0_58], %147 {strides = array<i32>} : memref<1x128x128xf32, #tpu.memory_space<vmem>>, vector<1x128x128xf32>,
    return
  }
  func.func @transform_0(%arg0: i32) -> (i32, i32, i32) {
    %c0_i32 = arith.constant 0 : i32
    %c0_i32_0 = arith.constant 0 : i32
    %c0_i32_1 = arith.constant 0 : i32
    return %arg0, %c0_i32, %c0_i32_0 : i32, i32, i32
  }
  func.func @transform_1(%arg0: i32) -> (i32, i32) {
    %c0_i32 = arith.constant 0 : i32
    %c0_i32_0 = arith.constant 0 : i32
    %c0_i32_1 = arith.constant 0 : i32
    return %c0_i32, %c0_i32_0 : i32, i32
  }
  func.func @transform_2(%arg0: i32) -> (i32, i32) {
    %c0_i32 = arith.constant 0 : i32
    %c0_i32_0 = arith.constant 0 : i32
    %c0_i32_1 = arith.constant 0 : i32
    return %c0_i32, %c0_i32_0 : i32, i32
  }
  func.func @transform_3(%arg0: i32) -> (i32, i32) {
    %c0_i32 = arith.constant 0 : i32
    %c0_i32_0 = arith.constant 0 : i32
    %c0_i32_1 = arith.constant 0 : i32
    return %c0_i32, %c0_i32_0 : i32, i32
  }
  func.func @transform_4(%arg0: i32) -> (i32, i32) {
    %c0_i32 = arith.constant 0 : i32
    %c0_i32_0 = arith.constant 0 : i32
    %c0_i32_1 = arith.constant 0 : i32
    return %c0_i32, %c0_i32_0 : i32, i32
  }
  func.func @transform_5(%arg0: i32) -> (i32, i32) {
    %c0_i32 = arith.constant 0 : i32
    %c0_i32_0 = arith.constant 0 : i32
    %c0_i32_1 = arith.constant 0 : i32
    return %c0_i32, %c0_i32_0 : i32, i32
  }
  func.func @transform_6(%arg0: i32) -> (i32, i32) {
    %c0_i32 = arith.constant 0 : i32
    %c0_i32_0 = arith.constant 0 : i32
    %c0_i32_1 = arith.constant 0 : i32
    return %c0_i32, %c0_i32_0 : i32, i32
  }
  func.func @transform_7(%arg0: i32) -> (i32, i32) {
    %c0_i32 = arith.constant 0 : i32
    %c0_i32_0 = arith.constant 0 : i32
    %c0_i32_1 = arith.constant 0 : i32
    return %c0_i32, %c0_i32_0 : i32, i32
  }
  func.func @transform_8(%arg0: i32) -> (i32, i32) {
    %c0_i32 = arith.constant 0 : i32
    %c0_i32_0 = arith.constant 0 : i32
    %c0_i32_1 = arith.constant 0 : i32
    return %c0_i32, %c0_i32_0 : i32, i32
  }
  func.func @transform_9(%arg0: i32) -> (i32, i32) {
    %c0_i32 = arith.constant 0 : i32
    %c0_i32_0 = arith.constant 0 : i32
    %c0_i32_1 = arith.constant 0 : i32
    return %c0_i32, %c0_i32_0 : i32, i32
  }
  func.func @transform_10(%arg0: i32) -> (i32, i32) {
    %c0_i32 = arith.constant 0 : i32
    %c0_i32_0 = arith.constant 0 : i32
    %c0_i32_1 = arith.constant 0 : i32
    return %c0_i32, %c0_i32_0 : i32, i32
  }
  func.func @transform_11(%arg0: i32) -> (i32, i32, i32) {
    %c0_i32 = arith.constant 0 : i32
    %c0_i32_0 = arith.constant 0 : i32
    %c0_i32_1 = arith.constant 0 : i32
    return %arg0, %c0_i32, %c0_i32_0 : i32, i32, i32
  }
}

</mosaic_0001>

<bundles_post_ra>
// kernel: tpu_custom_call.1
= control target key start
LH: loop header
LB: loop body
LE: loop exit
PB: predicated region body
PF: predicated region fallthrough
CT: control target
= control target key end

     0   :  { %s8669_s0 = inlined_call_operand.hbm [shape: f32[2,128,128], index: 0, kind: input, shape index: {}]   ;;  %s8670_s1 = inlined_call_operand.vmem [shape: f32[1,128], index: 1, kind: input, shape index: {}]   ;;  %s8671_s2 = inlined_call_operand.vmem [shape: bf16[128,192], index: 2, kind: input, shape index: {}]   ;;  %s8672_s3 = inlined_call_operand.vmem [shape: bf16[32,128], index: 3, kind: input, shape index: {}]   ;;  %s8673_s4 = inlined_call_operand.vmem [shape: bf16[32,128], index: 4, kind: input, shape index: {}]   ;;  %s8674_s5 = inlined_call_operand.vmem [shape: bf16[128,128], index: 5, kind: input, shape index: {}]   ;;  %s8675_s6 = inlined_call_operand.vmem [shape: f32[1,128], index: 6, kind: input, shape index: {}]   ;;  %s8676_s7 = inlined_call_operand.hbm [shape: bf16[128,512], index: 7, kind: input, shape index: {}]   ;;  %s8677_s8 = inlined_call_operand.vmem [shape: f32[1,512], index: 8, kind: input, shape index: {}]   ;;  %s8678_s9 = inlined_call_operand.vmem [shape: bf16[256,128], index: 9, kind: input, shape index: {}]   ;;  %s8679_s10 = inlined_call_operand.vmem [shape: f32[1,128], index: 10, kind: input, shape index: {}]   ;;  %s8680_s11 = inlined_call_operand.hbm [shape: f32[2,128,128], index: 11, kind: output, shape index: {}]  }
   0x1   :  { %8747 = sst [smem:[#allocation63_spill]] %s8680_s11 }
   0x2   :  { %16 = vsyncpa [#allocation3], 0 }
   0x3   :  { %18 = vsyncpa [#allocation3 + $0x1], 0 }
   0x4   :  { %19 = vsyncpa [#allocation6], 0 }
   0x5   :  { %20 = vsyncpa [#allocation4], 0 }
   0x6   :  { %22 = vsyncpa [#allocation4 + $0x1], 0  ;;  %s6334_s17 = smov 0   ;;  %s6336_s18 = smov 0  }
   0x7   :  { %s6338_s19 = smov 0   ;;  %s6340_s20 = smov 0  }
   0x8 LB: > { %8748 = sst [smem:[#allocation11_spill]] %s6247_s17  ;;  %s6355_s21 = sadd.s32 4294967295, %s6259_s20   ;;  %s6259_s20 = sphi %s6340_s20, %s8907_s20   ;;  %s6255_s19 = sphi %s6338_s19, %s8910_s19   ;;  %s6251_s18 = sphi %s6336_s18, %s8909_s18   ;;  %s6247_s17 = sphi %s6334_s17, %s8908_s17  }
   0x9   : > { %s4599_s22 = sadd.s32 4294967294, %s6259_s20   ;;  %p48_p0 = scmp.ne.s32.totalorder %s6251_s18, %s6247_s17 }
   0xa   : > { %p8684_p1 = scmp.eq.s32.totalorder %s6355_s21, 0  ;;  %p288_p3 = scmp.eq.s32.totalorder %s4599_s22, 1 }
   0xb   : > { %p4600_p5 = scmp.ge.s32.totalorder %s6259_s20, 1  ;;  %p295_p7 = scmp.lt.s32.totalorder %s6259_s20, 3 }
   0xc   : > { %p6364_p4 = por %p8684_p1, %p48_p0  ;;  %p6369_p6 = por %p288_p3, %p48_p0 }
   0xd   : > { %p6374_p8 = pnand %p4600_p5, %p295_p7  ;;  %s6261_s26 = smov [#allocation5]  }
   0xe   : > { %s8749_s23 = scalar_select %p6364_p4, 1, 0 }
   0xf   : > { %s8750_s24 = scalar_select %p6369_p6, 1, 0 }
  0x10   : > { %s8752_s25 = scalar_select %p6374_p8, 1, 0 }
  0x11   : > { %8751 = sst [smem:[#allocation12_spill]] %s8750_s24  ;;  %s325_s27 = sshll.u32 %s6261_s26, 4  ;;  %s6378_s27 = int_to_ptr.vmem [resolvable:$true] %s325_s27 }
  0x12   : > { %p5388_p9 = pneg %p6374_p8  ;;  %s6390_s29 = sadd.s32 1, %s6259_s20  }
  0x13   : > { %8754 = sst [smem:[#allocation13_spill]] %s6390_s29  ;;  %s35_s30 = sadd.s32 1, %s6255_s19 }
  0x14   : > { %p6385_p11 = pnand %p5388_p9, %p8684_p1  ;;  %s32_s12 = ssub.s32 %s6259_s20, %s6390_s29 }
  0x15   : > { %s6131_s15 = scalar_lea.hbm %s8676_s7, 4096 }
  0x16   : > { %p6132_p12 = scmp.ne.s32.totalorder %s8676_s7, %s6131_s15  ;;  %p6133_p13 = pneg %p6385_p11 }
  0x17   : > { %p6138_p5 = scmp.lt.u32.totalorder %s6131_s15, %s8676_s7 }
  0x18   : > { %p6134_p0 = pnand %p6133_p13, %p6132_p12 }
  0x1a   : > { %p6135_p3 = pneg %p6134_p0 }
  0x1c   : > { %p6140_p7 = pnand %p6138_p5, %p6135_p3 }
  0x1e   : > { %6143 = shalt.err (!%p6140_p7)
}
  0x1f   : > { %s6144_s29 = scalar_lea.vmem %s6378_s27, 4096  ;;  %p6152_p2 = scmp.lt.s32.totalorder %s6378_s27, %s6378_s27 }
  0x20   : > { %p6145_p9 = scmp.ne.s32.totalorder %s6378_s27, %s6144_s29  ;;  %p6153_p6 = scmp.lt.s32.totalorder %s6144_s29, %s6144_s29 }
  0x22   : > { %p6147_p10 = pnand %p6145_p9, %p6133_p13  ;;  %p6154_p4 = por %p6153_p6, %p6152_p2 }
  0x24   : > { %p6148_p1 = pneg %p6147_p10 }
  0x26   : > { %p6155_p8 = pnand %p6154_p4, %p6148_p1 }
  0x28   : > { %6158 = shalt.err (!%p6155_p8)
}
  0x29   : > { %s6262_s13 = smov 256   ;;  %s6263_s24 = smov 16  }
  0x2a   : > { %5391 = dma.hbm_to_vmem [thread:$0]  (!%p6385_p11), %s8676_s7, 4096, %s6378_s27, [#allocation6], %s6262_s13, %s6262_s13, %s6263_s24  }
  0x2b   : > { %p33_p2 = scmp.eq.s32.totalorder %s32_s12, 0  ;;  %p42_p1 = scmp.ne.s32.totalorder %s6255_s19, %s6251_s18 }
  0x2c   : > { %p43_p4 = scmp.eq.s32.totalorder %s6259_s20, 0  ;;  %p5401_p6 = scmp.lt.s32.totalorder %s6259_s20, 2 }
  0x2d   : > { %s6421_s29 = scalar_select %p33_p2, %s6255_s19, %s35_s30  }
  0x2e   : > { %p44_p8 = por %p43_p4, %p42_p1  ;;  %p8755_p10 = scmp.eq.s32.totalorder %s6355_s21, 1 }
  0x2f   : > { %s348_s22 = sand.u32 1, %s6255_s19   ;;  %s4774_s26 = sshll.u32 %s6259_s20, 11 }
  0x30   : > { %p6425_p12 = por %p8755_p10, %p42_p1  ;;  %s4603_s17 = sshll.u32 %s348_s22, 7 }
  0x31   : > { %s6434_s14 = scalar_lea.hbm %s8669_s0, %s4774_s26  ;;  %s352_s27 = scalar_lea.vmem [#allocation2], %s4603_s17 }
  0x32   : > { %s359_s30 = sshll.u32 %s352_s27, 4  ;;  %p6436_p11 = pnand %p5401_p6, %p44_p8  ;;  %s6440_s30 = int_to_ptr.vmem [resolvable:$true] %s359_s30 }
  0x33   : > { %s6442_s13 = scalar_lea.sflag [#allocation3], %s348_s22  ;;  %s6159_s24 = scalar_lea.hbm %s6434_s14, 2048 }
  0x34   : > { %p6160_p13 = scmp.ne.s32.totalorder %s6434_s14, %s6159_s24  ;;  %p6161_p0 = pneg %p6436_p11 }
  0x35   : > { %s6164_s15 = scalar_lea.hbm %s8669_s0, 4096  ;;  %p6165_p7 = scmp.lt.u32.totalorder %s6434_s14, %s8669_s0 }
  0x36   : > { %p6162_p3 = pnand %p6161_p0, %p6160_p13  ;;  %p6166_p9 = scmp.lt.u32.totalorder %s6164_s15, %s6159_s24 }
  0x37   : > { %p6168_p1 = scmp.lt.u32.totalorder %s6159_s24, %s6434_s14 }
  0x38   : > { %p6163_p5 = pneg %p6162_p3  ;;  %p6167_p2 = por %p6166_p9, %p6165_p7 }
  0x3a   : > { %p6169_p4 = por %p6168_p1, %p6167_p2 }
  0x3c   : > { %p6170_p6 = pnand %p6169_p4, %p6163_p5 }
  0x3e   : > { %6173 = shalt.err (!%p6170_p6)
}
  0x3f   : > { %s6174_s22 = scalar_lea.vmem %s6440_s30, 2048  ;;  %s6264_s27 = smov [#allocation2]  }
  0x40   : > { %p6175_p8 = scmp.ne.s32.totalorder %s6440_s30, %s6174_s22  ;;  %s6179_s11 = sshll.u32 %s6264_s27, 4  ;;  %s6180_s11 = int_to_ptr.vmem [resolvable:$false] %s6179_s11 }
  0x41   : > { %s6181_s17 = scalar_lea.vmem %s6180_s11, 4096  ;;  %p6182_p3 = scmp.lt.s32.totalorder %s6440_s30, %s6180_s11 }
  0x42   : > { %p6177_p10 = pnand %p6175_p8, %p6161_p0  ;;  %p6183_p7 = scmp.lt.s32.totalorder %s6181_s17, %s6174_s22 }
  0x44   : > { %p6178_p13 = pneg %p6177_p10  ;;  %p6184_p9 = por %p6183_p7, %p6182_p3 }
  0x46   : > { %p6185_p2 = pnand %p6184_p9, %p6178_p13 }
  0x48   : > { %6188 = shalt.err (!%p6185_p2)
}
  0x49   : > { %s6265_s24 = smov 128   ;;  %s6266_s15 = smov 8  }
  0x4a   : > { %5395 = dma.hbm_to_vmem [thread:$0]  (!%p6436_p11), %s6434_s14, 2048, %s6440_s30, %s6442_s13, %s6265_s24, %s6265_s24, %s6266_s15  }
  0x4b   : > { %p8758_p0 = scmp.ne.s32.totalorder %s8752_s25, 0 }
  0x4d   : > { %371 = sbr.rel (%p8758_p0) target bundleno = 4470 (0x1176), region = 64 }
  0x54   : > { %s6473_s26 = sand.u32 1, %s6251_s18   ;;  %p8759_p5 = scmp.ne.s32.totalorder %s8749_s23, 0 }
  0x55   : > { %s4607_s28 = sshll.u32 %s6473_s26, 7  ;;  %s374_s22 = scalar_lea.sflag [#allocation3], %s6473_s26 }
  0x56   : > { %s6479_s27 = scalar_lea.vmem [#allocation2], %s4607_s28 }
  0x57   : > { %6234 = dma.done.wait (%p8759_p5), %s374_s22, 2048  }
  0x58   : > { %6236 = vsyncadd (%p8759_p5), %s374_s22, 4294965248  ;;  %p8760_p11 = scmp.eq.s32.totalorder %s6355_s21, 0 }
  0x5a   : > { %6238 = dma.done.wait (%p8760_p11), [#allocation6], 4096   ;;  %p8761_p1 = pmov %p8760_p11 }
  0x5b   : > { %v6490_v0 = vld [vmem:[%s6479_s27] sm:$0xff]  ;;  %v6493_v1 = vld [vmem:[%s6479_s27 + $0x10] sm:$0xff]  ;;  %v6496_v2 = vld [vmem:[%s6479_s27 + $0x8] sm:$0xff]  ;;  %v8690_v47 = vmov 0   ;;  %vm798_vm0 = vcmask 261120   ;;  %s6268_s17 = smov 96  }
  0x5c   : > { %6240 = vsyncadd (%p8761_p1), [#allocation6], 4294963200  ;;  %v437_v3 = vmul.f32 %v6490_v0, %v6490_v0  ;;  %v439_v4 = vmul.f32 %v6493_v1, %v6493_v1  ;;  %v6503_v5 = vld [vmem:[%s6479_s27 + $0x18] sm:$0xff]  ;;  %v438_v6 = vmul.f32 %v6496_v2, %v6496_v2  ;;  %v6510_v8 = vld [vmem:[%s6479_s27 + $0x28] sm:$0xff]  ;;  %693 = vmatprep.mubr.bf16.mxu0 %v8690_v47  ;;  %s6269_s22 = smov 64   ;;  %s6270_s23 = smov 32  }
  0x5d   : > { %v440_v7 = vmul.f32 %v6503_v5, %v6503_v5  ;;  %v6513_v9 = vld [vmem:[%s6479_s27 + $0x20] sm:$0xff]  ;;  %v6516_v10 = vld [vmem:[%s6479_s27 + $0x38] sm:$0xff]  ;;  %v6519_v11 = vld [vmem:[%s6479_s27 + $0x30] sm:$0xff]  ;;  %v442_v14 = vmul.f32 %v6510_v8, %v6510_v8  ;;  %s8901_s30 = sld [smem:[#allocation63_spill]]  ;;  %s6271_s11 = smov [#allocation7]  }
  0x5e   : > { %453 = vadd.xlane.f32.xlu0 %v437_v3  ;;  %457 = vadd.xlane.f32.xlu1 %v439_v4  ;;  %v5567_v12 = vld [vmem:[%s8671_s2 + $0x4] ss:$8 sps:$4 sm:$0xff]   ;;  %v5569_v13 = vld [vmem:[%s8671_s2] ss:$8 sps:$4 sm:$0xff]   ;;  %v441_v15 = vmul.f32 %v6513_v9, %v6513_v9  ;;  %v5570_v16 = vld [vmem:[%s8671_s2 + $0x14] ss:$8 sps:$4 sm:$0xff]   ;;  %v444_v21 = vmul.f32 %v6516_v10, %v6516_v10  ;;  %v443_v22 = vmul.f32 %v6519_v11, %v6519_v11 }
  0x5f   : > { %v5572_v17 = vld [vmem:[%s8671_s2 + $0x10] ss:$8 sps:$4 sm:$0xff]   ;;  %661 = vmatprep.subr.bf16.mxu0 %v5567_v12  ;;  %v5573_v18 = vld [vmem:[%s8671_s2 + $0x24] ss:$8 sps:$4 sm:$0xff]   ;;  %v5575_v27 = vld [vmem:[%s8671_s2 + $0x20] ss:$8 sps:$4 sm:$0xff]  }
  0x60   : > { %662 = vmatpush1.bf16.msra.mxu0 %v5569_v13  ;;  %v6541_v19 = vld [vmem:[%s6479_s27 + $0x48] sm:$0xff]  ;;  %v6544_v20 = vld [vmem:[%s6479_s27 + $0x40] sm:$0xff]  ;;  %v6551_v23 = vld [vmem:[%s6479_s27 + $0x58] sm:$0xff]  ;;  %s6193_s24 = sshll.u32 %s6271_s11, 4  ;;  %s6194_s24 = int_to_ptr.vmem [resolvable:$false] %s6193_s24 }
  0x61   : > { %663 = vmatprep.subr.bf16.mxu0 %v5570_v16  ;;  %v6554_v24 = vld [vmem:[%s6479_s27 + $0x50] sm:$0xff]  ;;  %v446_v25 = vmul.f32 %v6541_v19, %v6541_v19  ;;  %v445_v26 = vmul.f32 %v6544_v20, %v6544_v20  ;;  %v6564_v28 = vld [vmem:[%s6479_s27 + $0x68] sm:$0xff]  ;;  %v6567_v29 = vld [vmem:[%s6479_s27 + $0x60] sm:$0xff]  ;;  %v448_v31 = vmul.f32 %v6551_v23, %v6551_v23  ;;  %s6195_s15 = scalar_lea.vmem %s6194_s24, 4096 }
  0x62   : > { %455 = vadd.xlane.f32.xlu0 %v438_v6  ;;  %459 = vadd.xlane.f32.xlu1 %v440_v7  ;;  %v5576_v30 = vld [vmem:[%s8671_s2 + $0x34] ss:$8 sps:$4 sm:$0xff]   ;;  %v447_v32 = vmul.f32 %v6554_v24, %v6554_v24  ;;  %v5578_v33 = vld [vmem:[%s8671_s2 + $0x30] ss:$8 sps:$4 sm:$0xff]   ;;  %v5579_v34 = vld [vmem:[%s8671_s2 + $0x44] ss:$8 sps:$4 sm:$0xff]   ;;  %v450_v35 = vmul.f32 %v6564_v28, %v6564_v28  ;;  %v449_v36 = vmul.f32 %v6567_v29, %v6567_v29 }
  0x63   : > { %v5581_v37 = vld [vmem:[%s8671_s2 + $0x40] ss:$8 sps:$4 sm:$0xff]   ;;  %v6590_v38 = vld [vmem:[%s6479_s27 + $0x78] sm:$0xff]  ;;  %v6593_v39 = vld [vmem:[%s6479_s27 + $0x70] sm:$0xff] }
  0x64   : > { %664 = vmatpush1.bf16.msra.mxu0 %v5572_v17  ;;  %v5582_v40 = vld [vmem:[%s8671_s2 + $0x54] ss:$8 sps:$4 sm:$0xff]   ;;  %v5584_v41 = vld [vmem:[%s8671_s2 + $0x50] ss:$8 sps:$4 sm:$0xff]   ;;  %v5585_v42 = vld [vmem:[%s8671_s2 + $0x64] ss:$8 sps:$4 sm:$0xff]   ;;  %v452_v43 = vmul.f32 %v6590_v38, %v6590_v38  ;;  %v451_v44 = vmul.f32 %v6593_v39, %v6593_v39 }
  0x65   : > { %665 = vmatprep.subr.bf16.mxu0 %v5573_v18  ;;  %v5587_v45 = vld [vmem:[%s8671_s2 + $0x60] ss:$8 sps:$4 sm:$0xff]   ;;  %v5588_v46 = vld [vmem:[%s8671_s2 + $0x74] ss:$8 sps:$4 sm:$0xff]   ;;  %v5590_v48 = vld [vmem:[%s8671_s2 + $0x70] ss:$8 sps:$4 sm:$0xff]  }
  0x66   : > { %463 = vadd.xlane.f32.xlu1 %v442_v14  ;;  %461 = vadd.xlane.f32.xlu0 %v441_v15  ;;  %v6622_v6 = vld [vmem:[%s8670_s1] ss:$0 sm:$0xff] }
  0x68   : > { %666 = vmatpush1.bf16.msra.mxu0 %v5575_v27 }
  0x69   : > { %667 = vmatprep.subr.bf16.mxu0 %v5576_v30 }
  0x6a   : > { %467 = vadd.xlane.f32.xlu1 %v444_v21  ;;  %465 = vadd.xlane.f32.xlu0 %v443_v22 }
  0x6c   : > { %668 = vmatpush1.bf16.msra.mxu0 %v5578_v33 }
  0x6d   : > { %669 = vmatprep.subr.bf16.mxu0 %v5579_v34 }
  0x6e   : > { %471 = vadd.xlane.f32.xlu1 %v446_v25  ;;  %469 = vadd.xlane.f32.xlu0 %v445_v26 }
  0x70   : > { %670 = vmatpush1.bf16.msra.mxu0 %v5581_v37 }
  0x71   : > { %671 = vmatprep.subr.bf16.mxu0 %v5582_v40 }
  0x72   : > { %475 = vadd.xlane.f32.xlu1 %v448_v31  ;;  %473 = vadd.xlane.f32.xlu0 %v447_v32 }
  0x74   : > { %672 = vmatpush1.bf16.msra.mxu0 %v5584_v41 }
  0x75   : > { %673 = vmatprep.subr.bf16.mxu0 %v5585_v42 }
  0x76   : > { %479 = vadd.xlane.f32.xlu1 %v450_v35  ;;  %477 = vadd.xlane.f32.xlu0 %v449_v36 }
  0x78   : > { %674 = vmatpush1.bf16.msra.mxu0 %v5587_v45 }
  0x79   : > { %675 = vmatprep.subr.bf16.mxu0 %v5588_v46 }
  0x7a   : > { %483 = vadd.xlane.f32.xlu1 %v452_v43  ;;  %481 = vadd.xlane.f32.xlu0 %v451_v44 }
  0x7c   : > { %676 = vmatpush1.bf16.msra.mxu0 %v5590_v48 }
  0xeb   : > { %v454_v49 = vpop.xlane.xlu0 %453  ;;  %v458_v50 = vpop.xlane.xlu1 %457 }
  0xec   : > { %v486_v51 = vmul.f32 0.0078125, %v454_v49  ;;  %v488_v52 = vmul.f32 0.0078125, %v458_v50 }
  0xee   : > { %5667 = vrsqrt.f32 %v486_v51 }
  0xef   : > { %v456_v53 = vpop.xlane.xlu0 %455  ;;  %v460_v54 = vpop.xlane.xlu1 %459 }
  0xf0   : > { %v487_v55 = vmul.f32 0.0078125, %v456_v53  ;;  %v489_v56 = vmul.f32 0.0078125, %v460_v54 }
  0xf2   : > { %5669 = vrsqrt.f32 %v487_v55 }
  0xf3   : > { %5671 = vrsqrt.f32 %v488_v52  ;;  %v464_v57 = vpop.xlane.xlu1 %463  ;;  %v462_v58 = vpop.xlane.xlu0 %461 }
  0xf4   : > { %5673 = vrsqrt.f32 %v489_v56  ;;  %v491_v59 = vmul.f32 0.0078125, %v464_v57  ;;  %v490_v60 = vmul.f32 0.0078125, %v462_v58 }
  0xf6   : > { %5675 = vrsqrt.f32 %v491_v59 }
  0xf7   : > { %5677 = vrsqrt.f32 %v490_v60  ;;  %v468_v62 = vpop.xlane.xlu1 %467  ;;  %v466_v3 = vpop.xlane.xlu0 %465 }
  0xf8   : > { %v5668_v61 = vpop.eup %5667  ;;  %v493_v13 = vmul.f32 0.0078125, %v468_v62  ;;  %v492_v15 = vmul.f32 0.0078125, %v466_v3 }
  0xf9   : > { %v518_v63 = vmul.f32 %v5668_v61, %v6490_v0 }
  0xfa   : > { %5679 = vrsqrt.f32 %v493_v13 }
  0xfb   : > { %v541_v16 = vmul.f32 %v6622_v6, %v518_v63  ;;  %5681 = vrsqrt.f32 %v492_v15  ;;  %v472_v22 = vpop.xlane.xlu1 %471  ;;  %v470_v26 = vpop.xlane.xlu0 %469 }
  0xfc   : > { %v5670_v4 = vpop.eup %5669  ;;  %v495_v31 = vmul.f32 0.0078125, %v472_v22  ;;  %v494_v32 = vmul.f32 0.0078125, %v470_v26 }
  0xfd   : > { %v5672_v7 = vpop.eup %5671  ;;  %v519_v12 = vmul.f32 %v5670_v4, %v6496_v2 }
  0xfe   : > { %v5674_v14 = vpop.eup %5673  ;;  %v520_v0 = vmul.f32 %v5672_v7, %v6493_v1  ;;  %5683 = vrsqrt.f32 %v495_v31 }
  0xff   : > { %v542_v17 = vmul.f32 %v6622_v6, %v519_v12  ;;  %v521_v21 = vmul.f32 %v5674_v14, %v6503_v5  ;;  %5685 = vrsqrt.f32 %v494_v32  ;;  %v476_v5 = vpop.xlane.xlu1 %475  ;;  %v474_v40 = vpop.xlane.xlu0 %473 }
 0x100   : > { %v5676_v25 = vpop.eup %5675  ;;  %v543_v2 = vmul.f32 %v6622_v6, %v520_v0  ;;  %v497_v42 = vmul.f32 0.0078125, %v476_v5  ;;  %v496_v43 = vmul.f32 0.0078125, %v474_v40 }
 0x101   : > { %v557_v18 = vpack.c.bf16 %v542_v17, %v541_v16  ;;  %v5678_v27 = vpop.eup %5677  ;;  %v544_v30 = vmul.f32 %v6622_v6, %v521_v21  ;;  %v523_v1 = vmul.f32 %v5676_v25, %v6510_v8  ;;  %v5591_v25 = vld [vmem:[%s8672_s3] sm:$0xff]  }
 0x102   : > { %v522_v33 = vmul.f32 %v5678_v27, %v6513_v9  ;;  %5687 = vrsqrt.f32 %v497_v42  ;;  %5004 = vmatprep.subr.bf16.mxu1 %v5591_v25 }
 0x103   : > { %694 = vmatmul.mubr.bf16.vlgmr.msra.gmra.mrb[0].mxu0 %v557_v18  ;;  %v558_v34 = vpack.c.bf16 %v544_v30, %v543_v2  ;;  %v546_v37 = vmul.f32 %v6622_v6, %v523_v1  ;;  %5689 = vrsqrt.f32 %v496_v43  ;;  %v480_v45 = vpop.xlane.xlu1 %479  ;;  %v478_v50 = vpop.xlane.xlu0 %477  ;;  %5005 = vmatpush3.bf16.msra.mxu1 %v5591_v25 }
 0x104   : > { %703 = vmatprep.mubr.bf16.mxu0 %v8690_v47  ;;  %v5680_v35 = vpop.eup %5679  ;;  %v545_v36 = vmul.f32 %v6622_v6, %v522_v33  ;;  %v499_v52 = vmul.f32 0.0078125, %v480_v45  ;;  %v498_v53 = vmul.f32 0.0078125, %v478_v50 }
 0x105   : > { %v5682_v41 = vpop.eup %5681  ;;  %v525_v8 = vmul.f32 %v5680_v35, %v6516_v10 }
 0x106   : > { %v559_v44 = vpack.c.bf16 %v546_v37, %v545_v36  ;;  %v524_v9 = vmul.f32 %v5682_v41, %v6519_v11  ;;  %5691 = vrsqrt.f32 %v499_v52  ;;  %v5594_v36 = vld [vmem:[%s8673_s4 + $0x8] sm:$0xff]  }
 0x107   : > { %v548_v49 = vmul.f32 %v6622_v6, %v525_v8  ;;  %5693 = vrsqrt.f32 %v498_v53  ;;  %v484_v55 = vpop.xlane.xlu1 %483  ;;  %v482_v59 = vpop.xlane.xlu0 %481 }
 0x108   : > { %v5684_v46 = vpop.eup %5683  ;;  %v547_v48 = vmul.f32 %v6622_v6, %v524_v9  ;;  %v501_v61 = vmul.f32 0.0078125, %v484_v55  ;;  %v500_v62 = vmul.f32 0.0078125, %v482_v59 }
 0x109   : > { %v5686_v51 = vpop.eup %5685  ;;  %v527_v10 = vmul.f32 %v5684_v46, %v6541_v19 }
 0x10a   : > { %v560_v54 = vpack.c.bf16 %v548_v49, %v547_v48  ;;  %v526_v11 = vmul.f32 %v5686_v51, %v6544_v20  ;;  %5695 = vrsqrt.f32 %v501_v61 }
 0x10b   : > { %704 = vmatmul.mubr.bf16.gmra.mrb[4].mxu0 %v558_v34  ;;  %v550_v58 = vmul.f32 %v6622_v6, %v527_v10  ;;  %5697 = vrsqrt.f32 %v500_v62 }
 0x10c   : > { %713 = vmatprep.mubr.bf16.mxu0 %v8690_v47  ;;  %v5688_v56 = vpop.eup %5687  ;;  %v549_v57 = vmul.f32 %v6622_v6, %v526_v11 }
 0x10d   : > { %v5690_v60 = vpop.eup %5689  ;;  %v529_v19 = vmul.f32 %v5688_v56, %v6551_v23 }
 0x10e   : > { %v561_v63 = vpack.c.bf16 %v550_v58, %v549_v57  ;;  %v528_v20 = vmul.f32 %v5690_v60, %v6554_v24 }
 0x10f   : > { %v552_v7 = vmul.f32 %v6622_v6, %v529_v19 }
 0x110   : > { %v5692_v3 = vpop.eup %5691  ;;  %v551_v4 = vmul.f32 %v6622_v6, %v528_v20 }
 0x111   : > { %v5694_v12 = vpop.eup %5693  ;;  %v531_v15 = vmul.f32 %v5692_v3, %v6564_v28 }
 0x112   : > { %v562_v13 = vpack.c.bf16 %v552_v7, %v551_v4  ;;  %v530_v14 = vmul.f32 %v5694_v12, %v6567_v29 }
 0x113   : > { %714 = vmatmul.mubr.bf16.gmra.mrb[8].mxu0 %v559_v44  ;;  %v554_v24 = vmul.f32 %v6622_v6, %v531_v15 }
 0x114   : > { %723 = vmatprep.mubr.bf16.mxu0 %v8690_v47  ;;  %v5696_v16 = vpop.eup %5695  ;;  %v553_v23 = vmul.f32 %v6622_v6, %v530_v14 }
 0x115   : > { %v5698_v17 = vpop.eup %5697  ;;  %v533_v21 = vmul.f32 %v5696_v16, %v6590_v38  ;;  %v5593_v38 = vld [vmem:[%s8673_s4] sm:$0xff]  }
 0x116   : > { %v563_v18 = vpack.c.bf16 %v554_v24, %v553_v23  ;;  %v532_v0 = vmul.f32 %v5698_v17, %v6593_v39  ;;  %v5592_v39 = vld [vmem:[%s8672_s3 + $0x8] sm:$0xff]  }
 0x117   : > { %v556_v29 = vmul.f32 %v6622_v6, %v533_v21  ;;  %5006 = vmatprep.subr.bf16.mxu1 %v5592_v39 }
 0x118   : > { %v555_v22 = vmul.f32 %v6622_v6, %v532_v0  ;;  %5007 = vmatpush3.bf16.msra.mxu1 %v5592_v39 }
 0x119   : > { %5024 = vmatprep.subr.bf16.mxu1 %v5593_v38 }
 0x11a   : > { %v564_v28 = vpack.c.bf16 %v556_v29, %v555_v22 }
 0x11b   : > { %724 = vmatmul.mubr.bf16.gmra.mrb[12].mxu0 %v560_v54 }
 0x11c   : > { %733 = vmatprep.mubr.bf16.mxu0 %v8690_v47 }
 0x123   : > { %734 = vmatmul.mubr.bf16.gmra.mrb[16].mxu0 %v561_v63 }
 0x124   : > { %743 = vmatprep.mubr.bf16.mxu0 %v8690_v47 }
 0x12b   : > { %744 = vmatmul.mubr.bf16.gmra.mrb[20].mxu0 %v562_v13 }
 0x12c   : > { %753 = vmatprep.mubr.bf16.mxu0 %v8690_v47 }
 0x133   : > { %754 = vmatmul.mubr.bf16.gmra.mrb[24].mxu0 %v563_v18 }
 0x134   : > { %763 = vmatprep.mubr.bf16.mxu0 %v8690_v47 }
 0x13b   : > { %764 = vmatmul.mubr.bf16.gmra.mrb[28].mxu0 %v564_v28 }
 0x1d6   : > { %v695_v6 = vpop.f32.mrb[0].mxu0 }
 0x1d7   : > { %v697_v26 = vpop.f32.mrb[1].mxu0 }
 0x1d8   : > { %v699_v27 = vpop.f32.mrb[2].mxu0 }
 0x1d9   : > { %v6671_v2 = vpack.c.bf16 %v699_v27, %v695_v6  ;;  %v701_v30 = vpop.f32.mrb[3].mxu0 }
 0x1da   : > { %v774_v31 = vpack.c.bf16 %v701_v30, %v697_v26 }
 0x1db   : > { %5060 = vmatprep.mubr.msk.bf16.mxu0 %vm798_vm0, %v6671_v2 }
 0x1dc   : > { %932 = vrot.lane.b32.xlu0 %v774_v31, %s6268_s17  ;;  %5008 = vmatprep.mubr.msk.bf16.mxu1 %vm798_vm0, %v774_v31 }
 0x1de   : > { %v705_v32 = vpop.f32.mrb[4].mxu0 }
 0x1df   : > { %v707_v33 = vpop.f32.mrb[5].mxu0 }
 0x1e0   : > { %v709_v1 = vpop.f32.mrb[6].mxu0 }
 0x1e1   : > { %v6677_v34 = vpack.c.bf16 %v709_v1, %v705_v32  ;;  %v711_v5 = vpop.f32.mrb[7].mxu0 }
 0x1e2   : > { %v775_v35 = vpack.c.bf16 %v711_v5, %v707_v33 }
 0x1e4   : > { %934 = vrot.lane.b32.xlu1 %v775_v35, %s6268_s17  ;;  %5009 = vmatmul.mubr.msk.bf16.vlgmr.msra.gmra.mrb[0].mxu1 %vm798_vm0, %v775_v35 }
 0x1e5   : > { %5025 = vmatpush3.bf16.msra.mxu1 %v5593_v38 }
 0x1e6   : > { %v715_v37 = vpop.f32.mrb[8].mxu0  ;;  %5026 = vmatprep.subr.bf16.mxu1 %v5594_v36 }
 0x1e7   : > { %v717_v40 = vpop.f32.mrb[9].mxu0 }
 0x1e8   : > { %v719_v41 = vpop.f32.mrb[10].mxu0 }
 0x1e9   : > { %v6684_v42 = vpack.c.bf16 %v719_v41, %v715_v37  ;;  %v721_v43 = vpop.f32.mrb[11].mxu0  ;;  %5027 = vmatpush3.bf16.msra.mxu1 %v5594_v36 }
 0x1ea   : > { %v776_v44 = vpack.c.bf16 %v721_v43, %v717_v40 }
 0x1ec   : > { %936 = vrot.lane.b32.xlu1 %v776_v44, %s6268_s17  ;;  %5012 = vmatprep.mubr.msk.bf16.mxu1 %vm798_vm0, %v776_v44 }
 0x1ee   : > { %v725_v9 = vpop.f32.mrb[12].mxu0 }
 0x1ef   : > { %v727_v8 = vpop.f32.mrb[13].mxu0 }
 0x1f0   : > { %v729_v45 = vpop.f32.mrb[14].mxu0 }
 0x1f1   : > { %v6688_v46 = vpack.c.bf16 %v729_v45, %v725_v9  ;;  %v731_v48 = vpop.f32.mrb[15].mxu0 }
 0x1f2   : > { %v777_v49 = vpack.c.bf16 %v731_v48, %v727_v8 }
 0x1f4   : > { %938 = vrot.lane.b32.xlu1 %v777_v49, %s6268_s17  ;;  %5013 = vmatmul.mubr.msk.bf16.gmra.mrb[4].mxu1 %vm798_vm0, %v777_v49 }
 0x1f6   : > { %v735_v50 = vpop.f32.mrb[16].mxu0 }
 0x1f7   : > { %v737_v51 = vpop.f32.mrb[17].mxu0 }
 0x1f8   : > { %v739_v52 = vpop.f32.mrb[18].mxu0 }
 0x1f9   : > { %v6692_v53 = vpack.c.bf16 %v739_v52, %v735_v50  ;;  %v741_v54 = vpop.f32.mrb[19].mxu0 }
 0x1fa   : > { %v778_v11 = vpack.c.bf16 %v741_v54, %v737_v51 }
 0x1fc   : > { %940 = vrot.lane.b32.xlu0 %v778_v11, %s6268_s17  ;;  %5016 = vmatprep.mubr.msk.bf16.mxu1 %vm798_vm0, %v778_v11 }
 0x1fe   : > { %v745_v10 = vpop.f32.mrb[20].mxu0 }
 0x1ff   : > { %v747_v55 = vpop.f32.mrb[21].mxu0 }
 0x200   : > { %v749_v56 = vpop.f32.mrb[22].mxu0 }
 0x201   : > { %v6696_v57 = vpack.c.bf16 %v749_v56, %v745_v10  ;;  %v751_v58 = vpop.f32.mrb[23].mxu0 }
 0x202   : > { %v779_v59 = vpack.c.bf16 %v751_v58, %v747_v55 }
 0x204   : > { %942 = vrot.lane.b32.xlu1 %v779_v59, %s6268_s17  ;;  %5017 = vmatmul.mubr.msk.bf16.gmra.mrb[8].mxu1 %vm798_vm0, %v779_v59 }
 0x206   : > { %v755_v60 = vpop.f32.mrb[24].mxu0 }
 0x207   : > { %v757_v61 = vpop.f32.mrb[25].mxu0 }
 0x208   : > { %v759_v62 = vpop.f32.mrb[26].mxu0 }
 0x209   : > { %v6700_v63 = vpack.c.bf16 %v759_v62, %v755_v60  ;;  %v761_v20 = vpop.f32.mrb[27].mxu0 }
 0x20a   : > { %v780_v19 = vpack.c.bf16 %v761_v20, %v757_v61 }
 0x20c   : > { %944 = vrot.lane.b32.xlu0 %v780_v19, %s6268_s17  ;;  %5020 = vmatprep.mubr.msk.bf16.mxu1 %vm798_vm0, %v780_v19 }
 0x20e   : > { %v765_v3 = vpop.f32.mrb[28].mxu0 }
 0x20f   : > { %v767_v4 = vpop.f32.mrb[29].mxu0 }
 0x210   : > { %v769_v7 = vpop.f32.mrb[30].mxu0 }
 0x211   : > { %v6704_v12 = vpack.c.bf16 %v769_v7, %v765_v3  ;;  %v771_v13 = vpop.f32.mrb[31].mxu0 }
 0x212   : > { %v781_v14 = vpack.c.bf16 %v771_v13, %v767_v4 }
 0x214   : > { %946 = vrot.lane.b32.xlu1 %v781_v14, %s6268_s17  ;;  %5021 = vmatmul.mubr.msk.bf16.gmra.mrb[12].mxu1 %vm798_vm0, %v781_v14 }
 0x24e   : > { %v933_v15 = vpop.permute.xlu0 %932 }
 0x24f   : > { %5028 = vmatprep.mubr.msk.bf16.mxu1 %vm798_vm0, %v933_v15 }
 0x256   : > { %v935_v16 = vpop.permute.xlu1 %934 }
 0x257   : > { %5029 = vmatmul.mubr.msk.bf16.vlgmr.msra.gmra.mrb[16].mxu1 %vm798_vm0, %v935_v16 }
 0x25e   : > { %v937_v23 = vpop.permute.xlu1 %936 }
 0x25f   : > { %5032 = vmatprep.mubr.msk.bf16.mxu1 %vm798_vm0, %v937_v23 }
 0x266   : > { %v939_v24 = vpop.permute.xlu1 %938 }
 0x267   : > { %5033 = vmatmul.mubr.msk.bf16.gmra.mrb[20].mxu1 %vm798_vm0, %v939_v24 }
 0x26e   : > { %v941_v17 = vpop.permute.xlu0 %940 }
 0x26f   : > { %5036 = vmatprep.mubr.msk.bf16.mxu1 %vm798_vm0, %v941_v17 }
 0x276   : > { %v943_v18 = vpop.permute.xlu1 %942 }
 0x277   : > { %5037 = vmatmul.mubr.msk.bf16.gmra.mrb[24].mxu1 %vm798_vm0, %v943_v18 }
 0x27e   : > { %v945_v0 = vpop.permute.xlu0 %944 }
 0x27f   : > { %5040 = vmatprep.mubr.msk.bf16.mxu1 %vm798_vm0, %v945_v0 }
 0x286   : > { %v947_v21 = vpop.permute.xlu1 %946 }
 0x287   : > { %5041 = vmatmul.mubr.msk.bf16.gmra.mrb[28].mxu1 %vm798_vm0, %v947_v21 }
 0x2b7   : > { %v5010_v22 = vpop.f32.mrb[0].mxu1 }
 0x2b8   : > { %v857_v29 = vpop.f32.mrb[1].mxu1 }
 0x2b9   : > { %v5011_v28 = vpop.f32.mrb[2].mxu1 }
 0x2ba   : > { %v6716_v25 = vpack.c.bf16 %v5011_v28, %v5010_v22  ;;  %v860_v39 = vpop.f32.mrb[3].mxu1  ;;  %v1105_v28 = vlaneseq }
 0x2bb   : > { %v6718_v38 = vpack.c.bf16 %v860_v39, %v857_v29 }
 0x2bc   : > { %1584 = vrot.lane.b32.xlu1 %v6716_v25, %s6268_s17  ;;  %v1168_v26 = vsel %vm798_vm0, %v6716_v25, 0  ;;  %v6818_v39 = vshrl.u32 %v1105_v28, 7 }
 0x2bd   : > { %5348 = vmatprep.subr.msk.bf16.mxu0 %vm798_vm0, %v6718_v38  ;;  %1582 = vrot.lane.b32.xlu0 %v6718_v38, %s6268_s17  ;;  %v1165_v6 = vsel %vm798_vm0, %v6718_v38, 0 }
 0x2be   : > { %5045 = vmatpush3.bf16.xpose.msra.mxu0 %v1165_v6  ;;  %v6821_v6 = vadd.s32 16, %v6818_v39 }
 0x2bf   : > { %5349 = vmatprep.subr.msk.bf16.mxu0 %vm798_vm0, %v6716_v25 }
 0x2c6   : > { %5047 = vmatpush3.bf16.xpose.msra.mxu0 %v1168_v26  ;;  %v6823_v26 = vand.u32 127, %v1105_v28 }
 0x2c7   : > { %v5014_v27 = vpop.f32.mrb[4].mxu1 }
 0x2c8   : > { %v873_v30 = vpop.f32.mrb[5].mxu1  ;;  %vm1126_vm1 = vcmp.gt.s32.totalorder %v6823_v26, %v6821_v6  ;;  %vm1124_vm3 = vcmp.gt.s32.totalorder %v6823_v26, %v6818_v39 }
 0x2c9   : > { %v5015_v31 = vpop.f32.mrb[6].mxu1 }
 0x2ca   : > { %v6732_v32 = vpack.c.bf16 %v5015_v31, %v5014_v27  ;;  %v876_v33 = vpop.f32.mrb[7].mxu1  ;;  %v6826_v27 = vadd.s32 8, %v6818_v39 }
 0x2cb   : > { %v6734_v1 = vpack.c.bf16 %v876_v33, %v873_v30 }
 0x2cc   : > { %8762 = vst [vmem:[#allocation14_spill] sm:$0xff] %v6732_v32  ;;  %v1174_v35 = vsel %vm798_vm0, %v6732_v32, 0  ;;  %vm1125_vm2 = vcmp.gt.s32.totalorder %v6823_v26, %v6826_v27 }
 0x2cd   : > { %8763 = vst [vmem:[#allocation15_spill] sm:$0xff] %v6734_v1  ;;  %5350 = vmatprep.subr.msk.bf16.mxu0 %vm798_vm0, %v6734_v1  ;;  %v1171_v5 = vsel %vm798_vm0, %v6734_v1, 0 }
 0x2ce   : > { %5049 = vmatpush3.bf16.xpose.msra.mxu0 %v1171_v5 }
 0x2cf   : > { %5351 = vmatprep.subr.msk.bf16.mxu0 %vm798_vm0, %v6732_v32 }
 0x2d6   : > { %5051 = vmatpush3.bf16.xpose.msra.mxu0 %v1174_v35  ;;  %v6841_v35 = vadd.s32 24, %v6818_v39 }
 0x2d7   : > { %v5018_v36 = vpop.f32.mrb[8].mxu1 }
 0x2d8   : > { %v889_v37 = vpop.f32.mrb[9].mxu1  ;;  %vm1127_vm4 = vcmp.gt.s32.totalorder %v6823_v26, %v6841_v35 }
 0x2d9   : > { %v5019_v40 = vpop.f32.mrb[10].mxu1 }
 0x2da   : > { %v6744_v41 = vpack.c.bf16 %v5019_v40, %v5018_v36  ;;  %v892_v43 = vpop.f32.mrb[11].mxu1  ;;  %v6849_v40 = vadd.s32 56, %v6818_v39 }
 0x2db   : > { %v6746_v44 = vpack.c.bf16 %v892_v43, %v889_v37 }
 0x2dc   : > { %8764 = vst [vmem:[#allocation16_spill] sm:$0xff] %v6744_v41  ;;  %v1180_v8 = vsel %vm798_vm0, %v6744_v41, 0  ;;  %vm1131_vm5 = vcmp.gt.s32.totalorder %v6823_v26, %v6849_v40 }
 0x2dd   : > { %8765 = vst [vmem:[#allocation17_spill] sm:$0xff] %v6746_v44  ;;  %5352 = vmatprep.subr.msk.bf16.mxu0 %vm798_vm0, %v6746_v44  ;;  %v1177_v9 = vsel %vm798_vm0, %v6746_v44, 0 }
 0x2de   : > { %5053 = vmatpush3.bf16.xpose.msra.mxu0 %v1177_v9  ;;  %v6861_v9 = vadd.s32 48, %v6818_v39 }
 0x2df   : > { %5353 = vmatprep.subr.msk.bf16.mxu0 %vm798_vm0, %v6744_v41 }
 0x2e0   : > { %8770 = vst [vmem:[#allocation22_spill] sm:$0xff] %v6861_v9  ;;  %vm1130_vm6 = vcmp.gt.s32.totalorder %v6823_v26, %v6861_v9 }
 0x2e6   : > { %5055 = vmatpush3.bf16.xpose.msra.mxu0 %v1180_v8 }
 0x2e7   : > { %v5022_v45 = vpop.f32.mrb[12].mxu1 }
 0x2e8   : > { %v905_v48 = vpop.f32.mrb[13].mxu1 }
 0x2e9   : > { %v5023_v49 = vpop.f32.mrb[14].mxu1 }
 0x2ea   : > { %v6756_v50 = vpack.c.bf16 %v5023_v49, %v5022_v45  ;;  %v908_v51 = vpop.f32.mrb[15].mxu1  ;;  %v6866_v45 = vadd.s32 40, %v6818_v39 }
 0x2eb   : > { %v6758_v52 = vpack.c.bf16 %v908_v51, %v905_v48 }
 0x2ec   : > { %v1186_v11 = vsel %vm798_vm0, %v6756_v50, 0  ;;  %8771 = vst [vmem:[#allocation23_spill] sm:$0xff] %v6866_v45  ;;  %vm1129_vm7 = vcmp.gt.s32.totalorder %v6823_v26, %v6866_v45 }
 0x2ed   : > { %5354 = vmatprep.subr.msk.bf16.mxu0 %vm798_vm0, %v6758_v52  ;;  %v1183_v54 = vsel %vm798_vm0, %v6758_v52, 0 }
 0x2ee   : > { %5057 = vmatpush3.bf16.xpose.msra.mxu0 %v1183_v54  ;;  %v6877_v54 = vadd.s32 32, %v6818_v39 }
 0x2ef   : > { %5355 = vmatprep.subr.msk.bf16.mxu0 %vm798_vm0, %v6756_v50 }
 0x2f0   : > { %8772 = vst [vmem:[#allocation24_spill] sm:$0xff] %v6877_v54  ;;  %vm1128_vm8 = vcmp.gt.s32.totalorder %v6823_v26, %v6877_v54 }
 0x2f6   : > { %5059 = vmatpush3.bf16.xpose.msra.mxu0 %v1186_v11 }
 0x2fd   : > { %5061 = vmatmul.mubr.msk.bf16.vlgmr.msra.gmra.mrb[32].mxu0 %vm798_vm0, %v6677_v34 }
 0x2fe   : > { %5064 = vmatprep.mubr.msk.bf16.mxu0 %vm798_vm0, %v6684_v42 }
 0x305   : > { %5065 = vmatmul.mubr.msk.bf16.gmra.mrb[36].mxu0 %vm798_vm0, %v6688_v46 }
 0x306   : > { %5068 = vmatprep.mubr.msk.bf16.mxu0 %vm798_vm0, %v6692_v53 }
 0x30d   : > { %5069 = vmatmul.mubr.msk.bf16.gmra.mrb[40].mxu0 %vm798_vm0, %v6696_v57 }
 0x30e   : > { %5072 = vmatprep.mubr.msk.bf16.mxu0 %vm798_vm0, %v6700_v63 }
 0x315   : > { %5073 = vmatmul.mubr.msk.bf16.gmra.mrb[44].mxu0 %vm798_vm0, %v6704_v12 }
 0x32a   : > { %v5030_v10 = vpop.f32.mrb[16].mxu1 }
 0x32b   : > { %v1018_v55 = vpop.f32.mrb[17].mxu1 }
 0x32c   : > { %v5031_v56 = vpop.f32.mrb[18].mxu1 }
 0x32d   : > { %v6782_v58 = vpack.c.bf16 %v5031_v56, %v5030_v10  ;;  %v1021_v59 = vpop.f32.mrb[19].mxu1 }
 0x32e   : > { %v6784_v60 = vpack.c.bf16 %v1021_v59, %v1018_v55  ;;  %v6888_v55 = vadd.s32 88, %v6818_v39  ;;  %v6899_v59 = vadd.s32 80, %v6818_v39 }
 0x32f   : > { %v6813_v29 = vpop.permute.xlu0 %1582 }
 0x330   : > { %5076 = vmatprep.subr.bf16.mxu1 %v6784_v60  ;;  %8773 = vst [vmem:[#allocation25_spill] sm:$0xff] %v6888_v55  ;;  %8774 = vst [vmem:[#allocation26_spill] sm:$0xff] %v6899_v59  ;;  %vm1135_vm9 = vcmp.gt.s32.totalorder %v6823_v26, %v6888_v55  ;;  %vm1134_vm10 = vcmp.gt.s32.totalorder %v6823_v26, %v6899_v59 }
 0x331   : > { %5077 = vmatpush3.bf16.msra.mxu1 %v6784_v60 }
 0x332   : > { %5078 = vmatprep.subr.bf16.mxu1 %v6782_v58 }
 0x335   : > { %5079 = vmatpush3.bf16.msra.mxu1 %v6782_v58 }
 0x33a   : > { %v5034_v61 = vpop.f32.mrb[20].mxu1 }
 0x33b   : > { %v1034_v62 = vpop.f32.mrb[21].mxu1 }
 0x33c   : > { %v5035_v20 = vpop.f32.mrb[22].mxu1 }
 0x33d   : > { %v6790_v19 = vpack.c.bf16 %v5035_v20, %v5034_v61  ;;  %v1037_v3 = vpop.f32.mrb[23].mxu1  ;;  %v6910_v20 = vadd.s32 72, %v6818_v39 }
 0x33e   : > { %v6792_v4 = vpack.c.bf16 %v1037_v3, %v1034_v62 }
 0x33f   : > { %8775 = vst [vmem:[#allocation27_spill] sm:$0xff] %v6910_v20  ;;  %vm8722_vm11 = vcmp.gt.s32.totalorder %v6823_v26, %v6910_v20 }
 0x340   : > { %5080 = vmatprep.subr.bf16.mxu1 %v6792_v4 }
 0x341   : > { %5081 = vmatpush3.bf16.msra.mxu1 %v6792_v4 }
 0x342   : > { %5082 = vmatprep.subr.bf16.mxu1 %v6790_v19 }
 0x345   : > { %5083 = vmatpush3.bf16.msra.mxu1 %v6790_v19 }
 0x34a   : > { %v5038_v7 = vpop.f32.mrb[24].mxu1 }
 0x34b   : > { %v1050_v13 = vpop.f32.mrb[25].mxu1 }
 0x34c   : > { %v5039_v14 = vpop.f32.mrb[26].mxu1 }
 0x34d   : > { %v6798_v15 = vpack.c.bf16 %v5039_v14, %v5038_v7  ;;  %v1053_v16 = vpop.f32.mrb[27].mxu1  ;;  %v6921_v14 = vadd.s32 64, %v6818_v39 }
 0x34e   : > { %v6800_v23 = vpack.c.bf16 %v1053_v16, %v1050_v13 }
 0x34f   : > { %8766 = vst [vmem:[#allocation18_spill] sm:$0xff] %v6798_v15  ;;  %8776 = vst [vmem:[#allocation28_spill] sm:$0xff] %v6921_v14  ;;  %vm1132_vm12 = vcmp.gt.s32.totalorder %v6823_v26, %v6921_v14 }
 0x350   : > { %8767 = vst [vmem:[#allocation19_spill] sm:$0xff] %v6800_v23  ;;  %5084 = vmatprep.subr.bf16.mxu1 %v6800_v23 }
 0x351   : > { %5085 = vmatpush3.bf16.msra.mxu1 %v6800_v23 }
 0x352   : > { %5086 = vmatprep.subr.bf16.mxu1 %v6798_v15 }
 0x355   : > { %5087 = vmatpush3.bf16.msra.mxu1 %v6798_v15 }
 0x35a   : > { %v5042_v24 = vpop.f32.mrb[28].mxu1 }
 0x35b   : > { %v1066_v17 = vpop.f32.mrb[29].mxu1 }
 0x35c   : > { %v5043_v18 = vpop.f32.mrb[30].mxu1 }
 0x35d   : > { %v6806_v0 = vpack.c.bf16 %v5043_v18, %v5042_v24  ;;  %v1069_v21 = vpop.f32.mrb[31].mxu1  ;;  %v6940_v18 = vadd.s32 112, %v6818_v39 }
 0x35e   : > { %v6808_v22 = vpack.c.bf16 %v1069_v21, %v1066_v17 }
 0x35f   : > { %8768 = vst [vmem:[#allocation20_spill] sm:$0xff] %v6806_v0  ;;  %8777 = vst [vmem:[#allocation29_spill] sm:$0xff] %v6940_v18  ;;  %vm1138_vm13 = vcmp.gt.s32.totalorder %v6823_v26, %v6940_v18 }
 0x360   : > { %8769 = vst [vmem:[#allocation21_spill] sm:$0xff] %v6808_v22  ;;  %5088 = vmatprep.subr.bf16.mxu1 %v6808_v22 }
 0x361   : > { %5089 = vmatpush3.bf16.msra.mxu1 %v6808_v22 }
 0x362   : > { %5090 = vmatprep.subr.bf16.mxu1 %v6806_v0 }
 0x365   : > { %5091 = vmatpush3.bf16.msra.mxu1 %v6806_v0 }
 0x366   : > { %5356 = vmatprep.subr.msk.bf16.mxu1 %vm798_vm0, %v6813_v29 }
 0x3d0   : > { %v5062_v30 = vpop.f32.mrb[32].mxu0 }
 0x3d1   : > { %v1222_v31 = vpop.f32.mrb[33].mxu0  ;;  %v6833_v33 = vsel %vm1126_vm1, -1e+30, %v5062_v30 }
 0x3d2   : > { %1305 = vmax.xlane.f32.xlu0 %v6833_v33  ;;  %v5063_v5 = vpop.f32.mrb[34].mxu0  ;;  %v6855_v43 = vsel %vm1124_vm3, -1e+30, %v1222_v31 }
 0x3d3   : > { %v1225_v36 = vpop.f32.mrb[35].mxu0  ;;  %v6871_v49 = vsel %vm1127_vm4, -1e+30, %v5063_v5 }
 0x3d4   : > { %v6846_v37 = vsel %vm1125_vm2, -1e+30, %v1225_v36  ;;  %v6957_v36 = vadd.s32 96, %v6818_v39 }
 0x3d5   : > { %1303 = vmax.xlane.f32.xlu1 %v6846_v37 }
 0x3d6   : > { %1301 = vmax.xlane.f32.xlu0 %v6855_v43  ;;  %8778 = vst [vmem:[#allocation30_spill] sm:$0xff] %v6957_v36  ;;  %vm8689_vm14 = vcmp.gt.s32.totalorder %v6823_v26, %v6957_v36 }
 0x3d8   : > { %v5066_v8 = vpop.f32.mrb[36].mxu0 }
 0x3d9   : > { %v1238_v48 = vpop.f32.mrb[37].mxu0  ;;  %v6893_v56 = vsel %vm1130_vm6, -1e+30, %v5066_v8 }
 0x3da   : > { %1307 = vmax.xlane.f32.xlu0 %v6871_v49  ;;  %v5067_v51 = vpop.f32.mrb[38].mxu0  ;;  %v6915_v7 = vsel %vm1128_vm8, -1e+30, %v1238_v48 }
 0x3db   : > { %v1241_v11 = vpop.f32.mrb[39].mxu0  ;;  %v6882_v10 = vsel %vm1131_vm5, -1e+30, %v5067_v51 }
 0x3dc   : > { %1315 = vmax.xlane.f32.xlu1 %v6882_v10  ;;  %v6904_v61 = vsel %vm1129_vm7, -1e+30, %v1241_v11  ;;  %v6975_v11 = vadd.s32 120, %v6818_v39 }
 0x3de   : > { %1313 = vmax.xlane.f32.xlu0 %v6893_v56  ;;  %8779 = vst [vmem:[#allocation31_spill] sm:$0xff] %v6975_v11  ;;  %vm1139_vm15 = vcmp.gt.s32.totalorder %v6823_v26, %v6975_v11 }
 0x3e0   : > { %1311 = vmax.xlane.f32.xlu1 %v6904_v61  ;;  %v5070_v62 = vpop.f32.mrb[40].mxu0 }
 0x3e1   : > { %v1254_v3 = vpop.f32.mrb[41].mxu0  ;;  %v6934_v17 = vsel %vm1134_vm10, -1e+30, %v5070_v62  ;;  %v6980_v62 = vadd.s32 104, %v6818_v39 }
 0x3e2   : > { %1309 = vmax.xlane.f32.xlu0 %v6915_v7  ;;  %v5071_v13 = vpop.f32.mrb[42].mxu0  ;;  %v6951_v31 = vsel %vm1132_vm12, -1e+30, %v1254_v3 }
 0x3e3   : > { %v1257_v16 = vpop.f32.mrb[43].mxu0  ;;  %v6926_v24 = vsel %vm1135_vm9, -1e+30, %v5071_v13  ;;  %8780 = vst [vmem:[#allocation32_spill] sm:$0xff] %v6980_v62 }
 0x3e4   : > { %1323 = vmax.xlane.f32.xlu1 %v6926_v24  ;;  %v6945_v21 = vsel %vm8722_vm11, -1e+30, %v1257_v16 }
 0x3e6   : > { %1321 = vmax.xlane.f32.xlu0 %v6934_v17 }
 0x3e8   : > { %1319 = vmax.xlane.f32.xlu1 %v6945_v21  ;;  %v5074_v28 = vpop.f32.mrb[44].mxu0 }
 0x3e9   : > { %v1270_v30 = vpop.f32.mrb[45].mxu0  ;;  %v1299_v48 = vsel %vm1138_vm13, -1e+30, %v5074_v28 }
 0x3ea   : > { %1317 = vmax.xlane.f32.xlu0 %v6951_v31  ;;  %v5075_v5 = vpop.f32.mrb[46].mxu0  ;;  %v6967_v51 = vsel %vm8689_vm14, -1e+30, %v1270_v30  ;;  %vm1137_vm14 = vcmp.gt.s32.totalorder %v6823_v26, %v6980_v62  ;;  %v6997_v30 = vpop.permute.xlu1 %1584 }
 0x3eb   : > { %v1273_v8 = vpop.f32.mrb[47].mxu0  ;;  %v6985_v3 = vsel %vm1139_vm15, -1e+30, %v5075_v5 }
 0x3ec   : > { %v6993_v13 = vsel %vm1137_vm14, -1e+30, %v1273_v8 }
 0x3ee   : > { %1329 = vmax.xlane.f32.xlu0 %v1299_v48 }
 0x3f2   : > { %1325 = vmax.xlane.f32.xlu0 %v6967_v51 }
 0x3f9   : > { %1588 = vrot.lane.b32.xlu1 %v6732_v32, %s6268_s17 }
 0x408   : > { %1586 = vrot.lane.b32.xlu0 %v6734_v1, %s6268_s17 }
 0x41d   : > { %1331 = vmax.xlane.f32.xlu1 %v6985_v3 }
 0x421   : > { %1327 = vmax.xlane.f32.xlu1 %v6993_v13 }
 0x45f   : > { %v1306_v16 = vpop.xlane.xlu0 %1305 }
 0x460   : > { %v1335_v28 = vsub.f32 %v6833_v33, %v1306_v16 }
 0x462   : > { %v1353_v47 = vmul.f32 1.442695, %v1335_v28  ;;  %v1304_v1 = vpop.xlane.xlu1 %1303 }
 0x463   : > { %v1302_v5 = vpop.xlane.xlu0 %1301  ;;  %v1334_v18 = vsub.f32 %v6846_v37, %v1304_v1 }
 0x464   : > { %5699 = vpow2.f32 %v1353_v47  ;;  %v1333_v11 = vsub.f32 %v6855_v43, %v1302_v5 }
 0x465   : > { %v1351_v14 = vmul.f32 1.442695, %v1334_v18 }
 0x466   : > { %v1349_v32 = vmul.f32 1.442695, %v1333_v11 }
 0x467   : > { %v1308_v36 = vpop.xlane.xlu0 %1307 }
 0x468   : > { %5701 = vpow2.f32 %v1349_v32  ;;  %v1336_v8 = vsub.f32 %v6871_v49, %v1308_v36 }
 0x469   : > { %v1316_v49 = vpop.xlane.xlu1 %1315 }
 0x46a   : > { %v1355_v62 = vmul.f32 1.442695, %v1336_v8  ;;  %v1340_v55 = vsub.f32 %v6882_v10, %v1316_v49 }
 0x46b   : > { %v1314_v32 = vpop.xlane.xlu0 %1313 }
 0x46c   : > { %5703 = vpow2.f32 %v1355_v62  ;;  %v1339_v36 = vsub.f32 %v6893_v56, %v1314_v32  ;;  %v1363_v56 = vmul.f32 1.442695, %v1340_v55 }
 0x46d   : > { %5705 = vpow2.f32 %v1351_v14  ;;  %v1312_v18 = vpop.xlane.xlu1 %1311 }
 0x46e   : > { %v7002_v20 = vpop.eup %5699  ;;  %v1361_v62 = vmul.f32 1.442695, %v1339_v36  ;;  %v1338_v16 = vsub.f32 %v6904_v61, %v1312_v18 }
 0x46f   : > { %1385 = vadd.xlane.f32.xlu0 %v7002_v20  ;;  %v1310_v37 = vpop.xlane.xlu0 %1309 }
 0x470   : > { %v1337_v5 = vsub.f32 %v6915_v7, %v1310_v37  ;;  %5707 = vpow2.f32 %v1361_v62  ;;  %v1359_v8 = vmul.f32 1.442695, %v1338_v16 }
 0x471   : > { %v1324_v28 = vpop.xlane.xlu1 %1323 }
 0x472   : > { %v7005_v33 = vpop.eup %5701  ;;  %v1357_v54 = vmul.f32 1.442695, %v1337_v5  ;;  %5709 = vpow2.f32 %v1359_v8 }
 0x473   : > { %1381 = vadd.xlane.f32.xlu0 %v7005_v33  ;;  %v1322_v43 = vpop.xlane.xlu0 %1321 }
 0x474   : > { %5711 = vpow2.f32 %v1357_v54  ;;  %v1343_v32 = vsub.f32 %v6934_v17, %v1322_v43 }
 0x476   : > { %v7008_v47 = vpop.eup %5703  ;;  %v1369_v10 = vmul.f32 1.442695, %v1343_v32 }
 0x477   : > { %1387 = vadd.xlane.f32.xlu1 %v7008_v47  ;;  %v7011_v1 = vpop.eup %5705  ;;  %v1318_v14 = vpop.xlane.xlu0 %1317 }
 0x47a   : > { %v7026_v7 = vpop.eup %5707 }
 0x47b   : > { %1383 = vadd.xlane.f32.xlu1 %v7011_v1  ;;  %v1330_v11 = vpop.xlane.xlu0 %1329 }
 0x47c   : > { %v1347_v59 = vsub.f32 %v1299_v48, %v1330_v11  ;;  %v1341_v48 = vsub.f32 %v6951_v31, %v1318_v14  ;;  %v7030_v37 = vpop.eup %5709 }
 0x47e   : > { %v1377_v45 = vmul.f32 1.442695, %v1347_v59  ;;  %v7035_v55 = vpop.eup %5711 }
 0x480   : > { %5713 = vpow2.f32 %v1377_v45  ;;  %v1365_v45 = vmul.f32 1.442695, %v1341_v48 }
 0x481   : > { %5715 = vpow2.f32 %v1363_v56 }
 0x489   : > { %1590 = vrot.lane.b32.xlu0 %v6746_v44, %s6268_s17  ;;  %v1326_v44 = vpop.xlane.xlu0 %1325 }
 0x48a   : > { %v1345_v9 = vsub.f32 %v6967_v51, %v1326_v44  ;;  %v7037_v17 = vpop.eup %5713 }
 0x48c   : > { %1592 = vrot.lane.b32.xlu1 %v6744_v41, %s6268_s17  ;;  %v1320_v41 = vpop.xlane.xlu1 %1319  ;;  %v1373_v61 = vmul.f32 1.442695, %v1345_v9  ;;  %v1344_v9 = vsub.f32 %v6926_v24, %v1324_v28 }
 0x48d   : > { %v1342_v51 = vsub.f32 %v6945_v21, %v1320_v41  ;;  %v1587_v28 = vpop.permute.xlu0 %1586 }
 0x48e   : > { %5717 = vpow2.f32 %v1373_v61  ;;  %v1371_v31 = vmul.f32 1.442695, %v1344_v9 }
 0x48f   : > { %5719 = vpow2.f32 %v1369_v10  ;;  %v1367_v49 = vmul.f32 1.442695, %v1342_v51 }
 0x490   : > { %v7024_v18 = vpop.permute.xlu1 %1588 }
 0x4a8   : > { %1393 = vadd.xlane.f32.xlu0 %v7026_v7 }
 0x4aa   : > { %v1332_v59 = vpop.xlane.xlu1 %1331 }
 0x4ab   : > { %v1348_v44 = vsub.f32 %v6985_v3, %v1332_v59  ;;  %v7042_v3 = vpop.eup %5715 }
 0x4ac   : > { %1391 = vadd.xlane.f32.xlu0 %v7030_v37  ;;  %v7044_v24 = vpop.eup %5717 }
 0x4ad   : > { %v1379_v54 = vmul.f32 1.442695, %v1348_v44  ;;  %v7049_v36 = vpop.eup %5719 }
 0x4ae   : > { %v1328_v43 = vpop.xlane.xlu1 %1327 }
 0x4af   : > { %5721 = vpow2.f32 %v1379_v54  ;;  %v1346_v14 = vsub.f32 %v6993_v13, %v1328_v43  ;;  %v1623_v43 = vsel %vm798_vm0, %v6813_v29, 0  ;;  %v1632_v29 = vsel %vm798_vm0, %v7024_v18, 0 }
 0x4b0   : > { %1389 = vadd.xlane.f32.xlu1 %v7035_v55  ;;  %1409 = vadd.xlane.f32.xlu0 %v7037_v17  ;;  %5723 = vpow2.f32 %v1365_v45 }
 0x4b1   : > { %5725 = vpow2.f32 %v1371_v31  ;;  %v1375_v41 = vmul.f32 1.442695, %v1346_v14 }
 0x4b2   : > { %5727 = vpow2.f32 %v1367_v49 }
 0x4b3   : > { %5729 = vpow2.f32 %v1375_v41 }
 0x4b4   : > { %1395 = vadd.xlane.f32.xlu1 %v7042_v3  ;;  %1405 = vadd.xlane.f32.xlu0 %v7044_v24 }
 0x4b8   : > { %1401 = vadd.xlane.f32.xlu1 %v7049_v36 }
 0x4b9   : > { %v7052_v11 = vpop.eup %5721 }
 0x4ba   : > { %1411 = vadd.xlane.f32.xlu0 %v7052_v11  ;;  %v7055_v21 = vpop.eup %5723 }
 0x4bb   : > { %v7058_v62 = vpop.eup %5725 }
 0x4bc   : > { %1397 = vadd.xlane.f32.xlu1 %v7055_v21  ;;  %v7061_v13 = vpop.eup %5727 }
 0x4bd   : > { %v7064_v16 = vpop.eup %5729 }
 0x4c0   : > { %1403 = vadd.xlane.f32.xlu1 %v7058_v62 }
 0x4c4   : > { %1399 = vadd.xlane.f32.xlu1 %v7061_v13 }
 0x4c8   : > { %1407 = vadd.xlane.f32.xlu1 %v7064_v16 }
 0x4d0   : > { %1594 = vrot.lane.b32.xlu0 %v6758_v52, %s6268_s17 }
 0x4d4   : > { %1558 = vrot.lane.b32.xlu0 %v6671_v2, %s6268_s17 }
 0x4d8   : > { %1562 = vrot.lane.b32.xlu0 %v6684_v42, %s6268_s17 }
 0x4d9   : > { %1596 = vrot.lane.b32.xlu1 %v6756_v50, %s6268_s17 }
 0x4dc   : > { %1566 = vrot.lane.b32.xlu0 %v6692_v53, %s6268_s17 }
 0x4dd   : > { %1560 = vrot.lane.b32.xlu1 %v6677_v34, %s6268_s17 }
 0x4e0   : > { %1570 = vrot.lane.b32.xlu0 %v6700_v63, %s6268_s17 }
 0x4e1   : > { %1564 = vrot.lane.b32.xlu1 %v6688_v46, %s6268_s17 }
 0x4e4   : > { %1919 = vrot.lane.b32.xlu0 %v6784_v60, %s6268_s17 }
 0x4e5   : > { %1568 = vrot.lane.b32.xlu1 %v6696_v57, %s6268_s17 }
 0x4e8   : > { %1923 = vrot.lane.b32.xlu0 %v6792_v4, %s6268_s17 }
 0x4e9   : > { %1572 = vrot.lane.b32.xlu1 %v6704_v12, %s6268_s17 }
 0x4ec   : > { %1927 = vrot.lane.b32.xlu0 %v6800_v23, %s6268_s17 }
 0x4ed   : > { %1921 = vrot.lane.b32.xlu1 %v6782_v58, %s6268_s17 }
 0x4f0   : > { %1931 = vrot.lane.b32.xlu0 %v6808_v22, %s6268_s17 }
 0x4f1   : > { %1925 = vrot.lane.b32.xlu1 %v6790_v19, %s6268_s17 }
 0x4f4   : > { %2056 = vrot.lane.b32.xlu0 %v6718_v38, %s6269_s22 }
 0x4f5   : > { %1929 = vrot.lane.b32.xlu1 %v6798_v15, %s6268_s17 }
 0x4f9   : > { %1933 = vrot.lane.b32.xlu1 %v6806_v0, %s6268_s17 }
 0x4fc   : > { %v1386_v5 = vpop.xlane.xlu0 %1385 }
 0x4fd   : > { %2058 = vrot.lane.b32.xlu1 %v6716_v25, %s6269_s22 }
 0x500   : > { %v1382_v8 = vpop.xlane.xlu0 %1381 }
 0x504   : > { %v1388_v56 = vpop.xlane.xlu1 %1387 }
 0x505   : > { %5731 = vrcp.f32 %v1388_v56 }
 0x506   : > { %5733 = vrcp.f32 %v1382_v8 }
 0x507   : > { %5735 = vrcp.f32 %v1386_v5 }
 0x508   : > { %v1384_v32 = vpop.xlane.xlu1 %1383 }
 0x509   : > { %5737 = vrcp.f32 %v1384_v32 }
 0x50c   : > { %v1593_v49 = vpop.permute.xlu1 %1592 }
 0x50d   : > { %v1638_v8 = vsel %vm798_vm0, %v1593_v49, 0 }
 0x50f   : > { %v5732_v61 = vpop.eup %5731 }
 0x510   : > { %v5734_v10 = vpop.eup %5733  ;;  %v1420_v44 = vmul.f32 %v5732_v61, %v7008_v47  ;;  %v1626_v47 = vsel %vm798_vm0, %v6997_v30, 0 }
 0x511   : > { %v5736_v48 = vpop.eup %5735  ;;  %v1414_v9 = vmul.f32 %v5734_v10, %v7005_v33  ;;  %v1629_v33 = vsel %vm798_vm0, %v1587_v28, 0 }
 0x512   : > { %v1418_v54 = vmul.f32 %v5736_v48, %v7002_v20  ;;  %v1591_v20 = vpop.permute.xlu0 %1590 }
 0x513   : > { %v5738_v59 = vpop.eup %5737 }
 0x514   : > { %v1416_v45 = vmul.f32 %v5738_v59, %v7011_v1  ;;  %v1446_v51 = vpack.c.bf16 %v1420_v44, %v1418_v54 }
 0x516   : > { %v1445_v31 = vpack.c.bf16 %v1416_v45, %v1414_v9 }
 0x518   : > { %5092 = vmatprep.mubr.bf16.mxu1 %v1445_v31 }
 0x519   : > { %5093 = vmatmul.mubr.bf16.vlgmr.msra.gmra.mrb[32].mxu1 %v1446_v51 }
 0x51a   : > { %5109 = vmatpush3.bf16.xpose.msra.mxu1 %v1623_v43 }
 0x51b   : > { %5357 = vmatprep.subr.msk.bf16.mxu1 %vm798_vm0, %v6997_v30  ;;  %v1635_v30 = vsel %vm798_vm0, %v1591_v20, 0 }
 0x522   : > { %5111 = vmatpush3.bf16.xpose.msra.mxu1 %v1626_v47 }
 0x523   : > { %5358 = vmatprep.subr.msk.bf16.mxu1 %vm798_vm0, %v1587_v28 }
 0x52a   : > { %5113 = vmatpush3.bf16.xpose.msra.mxu1 %v1629_v33 }
 0x52b   : > { %5359 = vmatprep.subr.msk.bf16.mxu1 %vm798_vm0, %v7024_v18 }
 0x532   : > { %5115 = vmatpush3.bf16.xpose.msra.mxu1 %v1632_v29 }
 0x533   : > { %5360 = vmatprep.subr.msk.bf16.mxu1 %vm798_vm0, %v1591_v20 }
 0x535   : > { %v1394_v1 = vpop.xlane.xlu0 %1393 }
 0x539   : > { %v1392_v14 = vpop.xlane.xlu0 %1391 }
 0x53a   : > { %5117 = vmatpush3.bf16.xpose.msra.mxu1 %v1635_v30  ;;  %5739 = vrcp.f32 %v1392_v14 }
 0x53b   : > { %5361 = vmatprep.subr.msk.bf16.mxu1 %vm798_vm0, %v1593_v49 }
 0x53d   : > { %v1390_v41 = vpop.xlane.xlu1 %1389  ;;  %v1410_v28 = vpop.xlane.xlu0 %1409 }
 0x53e   : > { %5741 = vrcp.f32 %v1390_v41 }
 0x53f   : > { %5743 = vrcp.f32 %v1394_v1 }
 0x541   : > { %v1396_v5 = vpop.xlane.xlu1 %1395  ;;  %v1406_v18 = vpop.xlane.xlu0 %1405 }
 0x542   : > { %5745 = vrcp.f32 %v1396_v5  ;;  %5119 = vmatpush3.bf16.xpose.msra.mxu1 %v1638_v8 }
 0x544   : > { %v5740_v32 = vpop.eup %5739 }
 0x545   : > { %v1402_v56 = vpop.xlane.xlu1 %1401  ;;  %v1424_v44 = vmul.f32 %v5740_v32, %v7030_v37 }
 0x547   : > { %v1412_v61 = vpop.xlane.xlu0 %1411 }
 0x548   : > { %v5742_v10 = vpop.eup %5741 }
 0x549   : > { %v1398_v48 = vpop.xlane.xlu1 %1397  ;;  %v1422_v59 = vmul.f32 %v5742_v10, %v7035_v55  ;;  %v5744_v9 = vpop.eup %5743 }
 0x54a   : > { %v1426_v47 = vmul.f32 %v5744_v9, %v7026_v7 }
 0x54b   : > { %v1595_v45 = vpop.permute.xlu0 %1594  ;;  %v1447_v54 = vpack.c.bf16 %v1424_v44, %v1422_v59 }
 0x54c   : > { %v5746_v31 = vpop.eup %5745  ;;  %5362 = vmatprep.subr.msk.bf16.mxu1 %vm798_vm0, %v1595_v45  ;;  %v1641_v51 = vsel %vm798_vm0, %v1595_v45, 0 }
 0x54d   : > { %v1404_v43 = vpop.xlane.xlu1 %1403  ;;  %5096 = vmatprep.mubr.bf16.mxu1 %v1447_v54  ;;  %5121 = vmatpush3.bf16.xpose.msra.mxu1 %v1641_v51  ;;  %v1428_v33 = vmul.f32 %v5746_v31, %v7042_v3 }
 0x54e   : > { %5747 = vrcp.f32 %v1404_v43 }
 0x54f   : > { %v1559_v20 = vpop.permute.xlu0 %1558  ;;  %v1448_v55 = vpack.c.bf16 %v1428_v33, %v1426_v47  ;;  %5749 = vrcp.f32 %v1398_v48 }
 0x550   : > { %5751 = vrcp.f32 %v1402_v56 }
 0x551   : > { %v1400_v37 = vpop.xlane.xlu1 %1399  ;;  %5097 = vmatmul.mubr.bf16.gmra.mrb[36].mxu1 %v1448_v55 }
 0x552   : > { %5753 = vrcp.f32 %v1400_v37 }
 0x553   : > { %v1563_v29 = vpop.permute.xlu0 %1562  ;;  %5755 = vrcp.f32 %v1406_v18 }
 0x555   : > { %v1408_v1 = vpop.xlane.xlu1 %1407 }
 0x556   : > { %5757 = vrcp.f32 %v1408_v1 }
 0x557   : > { %5759 = vrcp.f32 %v1412_v61  ;;  %v1567_v49 = vpop.permute.xlu0 %1566 }
 0x558   : > { %v5748_v30 = vpop.eup %5747  ;;  %5761 = vrcp.f32 %v1410_v28 }
 0x559   : > { %v1597_v14 = vpop.permute.xlu1 %1596  ;;  %v5750_v7 = vpop.eup %5749  ;;  %v1436_v56 = vmul.f32 %v5748_v30, %v7058_v62 }
 0x55a   : > { %5363 = vmatprep.subr.msk.bf16.mxu1 %vm798_vm0, %v1597_v14  ;;  %v1644_v3 = vsel %vm798_vm0, %v1597_v14, 0  ;;  %v5752_v41 = vpop.eup %5751  ;;  %v1430_v18 = vmul.f32 %v5750_v7, %v7055_v21 }
 0x55b   : > { %5123 = vmatpush3.bf16.xpose.msra.mxu1 %v1644_v3  ;;  %v1571_v5 = vpop.permute.xlu0 %1570  ;;  %v1434_v28 = vmul.f32 %v5752_v41, %v7049_v36 }
 0x55c   : > { %v5754_v8 = vpop.eup %5753 }
 0x55d   : > { %v1561_v32 = vpop.permute.xlu1 %1560  ;;  %v1432_v61 = vmul.f32 %v5754_v8, %v7061_v13  ;;  %v5756_v10 = vpop.eup %5755  ;;  %v1450_v9 = vpack.c.bf16 %v1436_v56, %v1434_v28 }
 0x55e   : > { %v1438_v31 = vmul.f32 %v5756_v10, %v7044_v24 }
 0x55f   : > { %v1920_v48 = vpop.permute.xlu0 %1919  ;;  %v1449_v59 = vpack.c.bf16 %v1432_v61, %v1430_v18 }
 0x560   : > { %v5758_v44 = vpop.eup %5757  ;;  %5140 = vmatprep.subr.bf16.mxu0 %v1920_v48 }
 0x561   : > { %v5760_v45 = vpop.eup %5759  ;;  %v1565_v54 = vpop.permute.xlu1 %1564  ;;  %5100 = vmatprep.mubr.bf16.mxu1 %v1449_v59  ;;  %5141 = vmatpush3.bf16.msra.mxu0 %v1920_v48  ;;  %v1440_v62 = vmul.f32 %v5758_v44, %v7064_v16 }
 0x562   : > { %5101 = vmatmul.mubr.bf16.gmra.mrb[40].mxu1 %v1450_v9  ;;  %v5762_v21 = vpop.eup %5761  ;;  %v1444_v13 = vmul.f32 %v5760_v45, %v7052_v11 }
 0x563   : > { %v1451_v51 = vpack.c.bf16 %v1440_v62, %v1438_v31  ;;  %v1442_v36 = vmul.f32 %v5762_v21, %v7037_v17  ;;  %v1924_v37 = vpop.permute.xlu0 %1923 }
 0x565   : > { %v1569_v43 = vpop.permute.xlu1 %1568  ;;  %5104 = vmatprep.mubr.bf16.mxu1 %v1451_v51  ;;  %v1452_v47 = vpack.c.bf16 %v1444_v13, %v1442_v36 }
 0x567   : > { %v1928_v11 = vpop.permute.xlu0 %1927 }
 0x569   : > { %v1573_v33 = vpop.permute.xlu1 %1572 }
 0x56a   : > { %5105 = vmatmul.mubr.bf16.gmra.mrb[44].mxu1 %v1452_v47 }
 0x56b   : > { %5124 = vmatprep.mubr.msk.bf16.mxu1 %vm798_vm0, %v1559_v20  ;;  %v1932_v16 = vpop.permute.xlu0 %1931 }
 0x56d   : > { %v1922_v55 = vpop.permute.xlu1 %1921 }
 0x56e   : > { %5142 = vmatprep.subr.bf16.mxu0 %v1922_v55 }
 0x56f   : > { %5143 = vmatpush3.bf16.msra.mxu0 %v1922_v55 }
 0x570   : > { %5144 = vmatprep.subr.bf16.mxu0 %v1924_v37 }
 0x571   : > { %v1926_v24 = vpop.permute.xlu1 %1925 }
 0x572   : > { %5125 = vmatmul.mubr.msk.bf16.vlgmr.msra.gmra.mrb[48].mxu1 %vm798_vm0, %v1561_v32 }
 0x573   : > { %5128 = vmatprep.mubr.msk.bf16.mxu1 %vm798_vm0, %v1563_v29  ;;  %5145 = vmatpush3.bf16.msra.mxu0 %v1924_v37  ;;  %v7150_v29 = vpop.permute.xlu0 %2056 }
 0x574   : > { %5146 = vmatprep.subr.bf16.mxu0 %v1926_v24 }
 0x575   : > { %v1930_v17 = vpop.permute.xlu1 %1929 }
 0x577   : > { %5147 = vmatpush3.bf16.msra.mxu0 %v1926_v24 }
 0x578   : > { %5148 = vmatprep.subr.bf16.mxu0 %v1928_v11 }
 0x579   : > { %v1934_v20 = vpop.permute.xlu1 %1933 }
 0x57a   : > { %5129 = vmatmul.mubr.msk.bf16.gmra.mrb[52].mxu1 %vm798_vm0, %v1565_v54 }
 0x57b   : > { %5132 = vmatprep.mubr.msk.bf16.mxu1 %vm798_vm0, %v1567_v49  ;;  %5149 = vmatpush3.bf16.msra.mxu0 %v1928_v11 }
 0x57c   : > { %5150 = vmatprep.subr.bf16.mxu0 %v1930_v17 }
 0x57f   : > { %5151 = vmatpush3.bf16.msra.mxu0 %v1930_v17 }
 0x580   : > { %5152 = vmatprep.subr.bf16.mxu0 %v1932_v16 }
 0x582   : > { %5133 = vmatmul.mubr.msk.bf16.gmra.mrb[56].mxu1 %vm798_vm0, %v1569_v43 }
 0x583   : > { %5136 = vmatprep.mubr.msk.bf16.mxu1 %vm798_vm0, %v1571_v5  ;;  %5153 = vmatpush3.bf16.msra.mxu0 %v1932_v16 }
 0x584   : > { %5154 = vmatprep.subr.bf16.mxu0 %v1934_v20 }
 0x587   : > { %5155 = vmatpush3.bf16.msra.mxu0 %v1934_v20 }
 0x588   : > { %5364 = vmatprep.subr.msk.bf16.mxu0 %vm798_vm0, %v7150_v29 }
 0x58a   : > { %5137 = vmatmul.mubr.msk.bf16.gmra.mrb[60].mxu1 %vm798_vm0, %v1573_v33 }
 0x5ec   : > { %v7155_v1 = vpop.f32.mrb[32].mxu1 }
 0x5ed   : > { %8781 = vst [vmem:[#allocation33_spill] sm:$0xff] %v7155_v1  ;;  %v7157_v49 = vpop.f32.mrb[33].mxu1 }
 0x5ee   : > { %8782 = vst [vmem:[#allocation34_spill] sm:$0xff] %v7157_v49  ;;  %v7159_v30 = vpop.f32.mrb[34].mxu1 }
 0x5ef   : > { %8783 = vst [vmem:[#allocation35_spill] sm:$0xff] %v7159_v30  ;;  %v7161_v14 = vpop.f32.mrb[35].mxu1 }
 0x5f0   : > { %8784 = vst [vmem:[#allocation36_spill] sm:$0xff] %v7161_v14 }
 0x624   : > { %v7163_v7 = vpop.f32.mrb[36].mxu1 }
 0x625   : > { %8785 = vst [vmem:[#allocation37_spill] sm:$0xff] %v7163_v7  ;;  %v7165_v3 = vpop.f32.mrb[37].mxu1  ;;  %v7275_v7 = vpop.permute.xlu1 %2058 }
 0x626   : > { %8786 = vst [vmem:[#allocation38_spill] sm:$0xff] %v7165_v3  ;;  %v7167_v41 = vpop.f32.mrb[38].mxu1 }
 0x627   : > { %8787 = vst [vmem:[#allocation39_spill] sm:$0xff] %v7167_v41  ;;  %v7169_v5 = vpop.f32.mrb[39].mxu1 }
 0x628   : > { %8788 = vst [vmem:[#allocation40_spill] sm:$0xff] %v7169_v5 }
 0x635   : > { %v7171_v8 = vpop.f32.mrb[40].mxu1 }
 0x636   : > { %8789 = vst [vmem:[#allocation41_spill] sm:$0xff] %v7171_v8  ;;  %v7173_v56 = vpop.f32.mrb[41].mxu1 }
 0x637   : > { %8790 = vst [vmem:[#allocation42_spill] sm:$0xff] %v7173_v56  ;;  %v7175_v32 = vpop.f32.mrb[42].mxu1 }
 0x638   : > { %8791 = vst [vmem:[#allocation43_spill] sm:$0xff] %v7175_v32  ;;  %v7177_v18 = vpop.f32.mrb[43].mxu1  ;;  %v8808_v32 = vld [vmem:[#allocation15_spill] sm:$0xff] }
 0x639   : > { %8792 = vst [vmem:[#allocation44_spill] sm:$0xff] %v7177_v18 }
 0x63d   : > { %v7179_v61 = vpop.f32.mrb[44].mxu1 }
 0x63e   : > { %8793 = vst [vmem:[#allocation45_spill] sm:$0xff] %v7179_v61  ;;  %v7181_v10 = vpop.f32.mrb[45].mxu1 }
 0x63f   : > { %8794 = vst [vmem:[#allocation46_spill] sm:$0xff] %v7181_v10  ;;  %v7183_v28 = vpop.f32.mrb[46].mxu1 }
 0x640   : > { %8795 = vst [vmem:[#allocation47_spill] sm:$0xff] %v7183_v28  ;;  %v7185_v48 = vpop.f32.mrb[47].mxu1 }
 0x641   : > { %8796 = vst [vmem:[#allocation48_spill] sm:$0xff] %v7185_v48 }
 0x645   : > { %v5126_v59 = vpop.f32.mrb[48].mxu1 }
 0x646   : > { %v1680_v44 = vpop.f32.mrb[49].mxu1  ;;  %v1745_v9 = vsel %vm1126_vm1, -1e+30, %v5126_v59 }
 0x647   : > { %1763 = vmax.xlane.f32.xlu0 %v1745_v9  ;;  %v5127_v45 = vpop.f32.mrb[50].mxu1  ;;  %v1743_v62 = vsel %vm1124_vm3, -1e+30, %v1680_v44 }
 0x648   : > { %v1683_v54 = vpop.f32.mrb[51].mxu1  ;;  %v1746_v13 = vsel %vm1127_vm4, -1e+30, %v5127_v45 }
 0x649   : > { %v1744_v31 = vsel %vm1125_vm2, -1e+30, %v1683_v54 }
 0x64a   : > { %1761 = vmax.xlane.f32.xlu1 %v1744_v31 }
 0x64b   : > { %1759 = vmax.xlane.f32.xlu0 %v1743_v62 }
 0x64d   : > { %v5130_v21 = vpop.f32.mrb[52].mxu1 }
 0x64e   : > { %v1696_v51 = vpop.f32.mrb[53].mxu1  ;;  %v7208_v55 = vsel %vm1130_vm6, -1e+30, %v5130_v21 }
 0x64f   : > { %1765 = vmax.xlane.f32.xlu0 %v1746_v13  ;;  %v5131_v43 = vpop.f32.mrb[54].mxu1  ;;  %v7220_v20 = vsel %vm1128_vm8, -1e+30, %v1696_v51 }
 0x650   : > { %v1699_v36 = vpop.f32.mrb[55].mxu1  ;;  %v7202_v47 = vsel %vm1131_vm5, -1e+30, %v5131_v43 }
 0x651   : > { %1773 = vmax.xlane.f32.xlu1 %v7202_v47  ;;  %v7214_v24 = vsel %vm1129_vm7, -1e+30, %v1699_v36 }
 0x653   : > { %1771 = vmax.xlane.f32.xlu0 %v7208_v55 }
 0x655   : > { %1769 = vmax.xlane.f32.xlu1 %v7214_v24  ;;  %v5134_v11 = vpop.f32.mrb[56].mxu1 }
 0x656   : > { %v1712_v17 = vpop.f32.mrb[57].mxu1  ;;  %v7232_v43 = vsel %vm1134_vm10, -1e+30, %v5134_v11 }
 0x657   : > { %1767 = vmax.xlane.f32.xlu0 %v7220_v20  ;;  %v5135_v59 = vpop.f32.mrb[58].mxu1  ;;  %v7244_v61 = vsel %vm1132_vm12, -1e+30, %v1712_v17  ;;  %v8807_v17 = vld [vmem:[#allocation14_spill] sm:$0xff] }
 0x658   : > { %v1715_v44 = vpop.f32.mrb[59].mxu1  ;;  %v7226_v54 = vsel %vm1135_vm9, -1e+30, %v5135_v59 }
 0x659   : > { %1781 = vmax.xlane.f32.xlu1 %v7226_v54  ;;  %v7238_v36 = vsel %vm8722_vm11, -1e+30, %v1715_v44  ;;  %v8805_v44 = vld [vmem:[#allocation30_spill] sm:$0xff] }
 0x65a   : > { %vm8806_vm11 = vcmp.gt.s32.totalorder %v6823_v26, %v8805_v44 }
 0x65b   : > { %1779 = vmax.xlane.f32.xlu0 %v7232_v43 }
 0x65d   : > { %1777 = vmax.xlane.f32.xlu1 %v7238_v36  ;;  %v5138_v10 = vpop.f32.mrb[60].mxu1 }
 0x65e   : > { %v1728_v48 = vpop.f32.mrb[61].mxu1  ;;  %v7250_v18 = vsel %vm1138_vm13, -1e+30, %v5138_v10 }
 0x65f   : > { %1775 = vmax.xlane.f32.xlu0 %v7244_v61  ;;  %v5139_v11 = vpop.f32.mrb[62].mxu1  ;;  %v7256_v8 = vsel %vm8806_vm11, -1e+30, %v1728_v48 }
 0x660   : > { %v1731_v28 = vpop.f32.mrb[63].mxu1  ;;  %v7266_v10 = vsel %vm1139_vm15, -1e+30, %v5139_v11 }
 0x661   : > { %v7272_v48 = vsel %vm1137_vm14, -1e+30, %v1731_v28 }
 0x663   : > { %1787 = vmax.xlane.f32.xlu0 %v7250_v18 }
 0x667   : > { %1783 = vmax.xlane.f32.xlu0 %v7256_v8 }
 0x66e   : > { %2062 = vrot.lane.b32.xlu1 %v8807_v17, %s6269_s22 }
 0x67d   : > { %2060 = vrot.lane.b32.xlu0 %v8808_v32, %s6269_s22 }
 0x692   : > { %1789 = vmax.xlane.f32.xlu1 %v7266_v10 }
 0x696   : > { %1785 = vmax.xlane.f32.xlu1 %v7272_v48 }
 0x6d4   : > { %v1764_v41 = vpop.xlane.xlu0 %1763 }
 0x6d5   : > { %v1793_v1 = vsub.f32 %v1745_v9, %v1764_v41 }
 0x6d7   : > { %v1811_v30 = vmul.f32 1.442695, %v1793_v1  ;;  %v1762_v49 = vpop.xlane.xlu1 %1761 }
 0x6d8   : > { %v1792_v14 = vsub.f32 %v1744_v31, %v1762_v49  ;;  %v1760_v32 = vpop.xlane.xlu0 %1759 }
 0x6d9   : > { %5763 = vpow2.f32 %v1811_v30  ;;  %v1791_v11 = vsub.f32 %v1743_v62, %v1760_v32 }
 0x6da   : > { %v1809_v3 = vmul.f32 1.442695, %v1792_v14  ;;  %v8811_v14 = vld [vmem:[#allocation17_spill] sm:$0xff] }
 0x6db   : > { %v1807_v17 = vmul.f32 1.442695, %v1791_v11 }
 0x6dc   : > { %5765 = vpow2.f32 %v1809_v3  ;;  %v1766_v44 = vpop.xlane.xlu0 %1765  ;;  %v8812_v3 = vld [vmem:[#allocation16_spill] sm:$0xff] }
 0x6dd   : > { %5767 = vpow2.f32 %v1807_v17  ;;  %v1794_v5 = vsub.f32 %v1746_v13, %v1766_v44 }
 0x6df   : > { %v1813_v28 = vmul.f32 1.442695, %v1794_v5  ;;  %v1774_v5 = vpop.xlane.xlu1 %1773 }
 0x6e0   : > { %v1772_v30 = vpop.xlane.xlu0 %1771  ;;  %v1798_v51 = vsub.f32 %v7202_v47, %v1774_v5 }
 0x6e1   : > { %5769 = vpow2.f32 %v1813_v28  ;;  %v1797_v9 = vsub.f32 %v7208_v55, %v1772_v30 }
 0x6e2   : > { %v1821_v45 = vmul.f32 1.442695, %v1798_v51 }
 0x6e3   : > { %v7277_v56 = vpop.eup %5763  ;;  %v1770_v31 = vpop.xlane.xlu1 %1769  ;;  %v1819_v13 = vmul.f32 1.442695, %v1797_v9 }
 0x6e4   : > { %1843 = vadd.xlane.f32.xlu1 %v7277_v56  ;;  %v1768_v41 = vpop.xlane.xlu0 %1767  ;;  %v1796_v17 = vsub.f32 %v7214_v24, %v1770_v31 }
 0x6e5   : > { %v1795_v44 = vsub.f32 %v7220_v20, %v1768_v41  ;;  %5771 = vpow2.f32 %v1819_v13 }
 0x6e6   : > { %v7280_v59 = vpop.eup %5765  ;;  %v1817_v21 = vmul.f32 1.442695, %v1796_v17 }
 0x6e7   : > { %v7282_v1 = vpop.eup %5767  ;;  %1841 = vadd.xlane.f32.xlu0 %v7280_v59  ;;  %v1782_v11 = vpop.xlane.xlu1 %1781 }
 0x6e8   : > { %1839 = vadd.xlane.f32.xlu1 %v7282_v1  ;;  %v1780_v32 = vpop.xlane.xlu0 %1779  ;;  %v1802_v47 = vsub.f32 %v7226_v54, %v1782_v11 }
 0x6eb   : > { %v7286_v49 = vpop.eup %5769  ;;  %v1778_v16 = vpop.xlane.xlu1 %1777 }
 0x6ec   : > { %1845 = vadd.xlane.f32.xlu1 %v7286_v49  ;;  %v1776_v62 = vpop.xlane.xlu0 %1775 }
 0x6ed   : > { %v1799_v20 = vsub.f32 %v7244_v61, %v1776_v62  ;;  %v1800_v61 = vsub.f32 %v7238_v36, %v1778_v16 }
 0x6ef   : > { %v1823_v5 = vmul.f32 1.442695, %v1799_v20  ;;  %v7302_v31 = vpop.eup %5771 }
 0x6f0   : > { %v1788_v28 = vpop.xlane.xlu0 %1787 }
 0x6f1   : > { %v1805_v55 = vsub.f32 %v7250_v18, %v1788_v28 }
 0x6f3   : > { %v1835_v24 = vmul.f32 1.442695, %v1805_v55 }
 0x6f4   : > { %v1784_v41 = vpop.xlane.xlu0 %1783 }
 0x6f5   : > { %v1803_v9 = vsub.f32 %v7256_v8, %v1784_v41 }
 0x6f7   : > { %v1831_v18 = vmul.f32 1.442695, %v1803_v9 }
 0x6fd   : > { %2064 = vrot.lane.b32.xlu0 %v8811_v14, %s6269_s22  ;;  %2066 = vrot.lane.b32.xlu1 %v8812_v3, %s6269_s22  ;;  %v1815_v14 = vmul.f32 1.442695, %v1795_v44  ;;  %v1801_v3 = vsub.f32 %v7232_v43, %v1780_v32  ;;  %v7304_v43 = vpop.permute.xlu1 %2062 }
 0x6ff   : > { %5773 = vpow2.f32 %v1815_v14  ;;  %v1827_v30 = vmul.f32 1.442695, %v1801_v3  ;;  %v1825_v14 = vmul.f32 1.442695, %v1800_v61 }
 0x700   : > { %5775 = vpow2.f32 %v1817_v21  ;;  %v1829_v21 = vmul.f32 1.442695, %v1802_v47 }
 0x701   : > { %5777 = vpow2.f32 %v1821_v45 }
 0x702   : > { %5779 = vpow2.f32 %v1827_v30  ;;  %v2061_v30 = vpop.permute.xlu0 %2060 }
 0x703   : > { %5781 = vpow2.f32 %v1835_v24 }
 0x704   : > { %5783 = vpow2.f32 %v1823_v5 }
 0x705   : > { %5785 = vpow2.f32 %v1831_v18 }
 0x706   : > { %5787 = vpow2.f32 %v1829_v21 }
 0x709   : > { %v7308_v45 = vpop.eup %5773 }
 0x70a   : > { %v7310_v8 = vpop.eup %5775 }
 0x70b   : > { %v7315_v32 = vpop.eup %5777 }
 0x70c   : > { %v7317_v16 = vpop.eup %5779 }
 0x70d   : > { %v7322_v13 = vpop.eup %5781 }
 0x70e   : > { %v7324_v44 = vpop.eup %5783 }
 0x70f   : > { %v7328_v17 = vpop.eup %5785 }
 0x710   : > { %v7330_v11 = vpop.eup %5787 }
 0x71c   : > { %1851 = vadd.xlane.f32.xlu0 %v7302_v31 }
 0x71f   : > { %v1790_v51 = vpop.xlane.xlu1 %1789 }
 0x720   : > { %v1806_v54 = vsub.f32 %v7266_v10, %v1790_v51  ;;  %1847 = vadd.xlane.f32.xlu0 %v7308_v45 }
 0x721   : > { %1849 = vadd.xlane.f32.xlu1 %v7310_v8 }
 0x722   : > { %v1837_v3 = vmul.f32 1.442695, %v1806_v54 }
 0x723   : > { %v1786_v62 = vpop.xlane.xlu1 %1785 }
 0x724   : > { %5789 = vpow2.f32 %v1837_v3  ;;  %v1804_v36 = vsub.f32 %v7272_v48, %v1786_v62  ;;  %1853 = vadd.xlane.f32.xlu0 %v7315_v32  ;;  %v2097_v3 = vsel %vm798_vm0, %v7150_v29, 0 }
 0x725   : > { %1859 = vadd.xlane.f32.xlu1 %v7317_v16  ;;  %5791 = vpow2.f32 %v1825_v14 }
 0x726   : > { %v1833_v10 = vmul.f32 1.442695, %v1804_v36 }
 0x728   : > { %1867 = vadd.xlane.f32.xlu0 %v7322_v13  ;;  %5793 = vpow2.f32 %v1833_v10 }
 0x729   : > { %1855 = vadd.xlane.f32.xlu1 %v7324_v44 }
 0x72c   : > { %1863 = vadd.xlane.f32.xlu0 %v7328_v17 }
 0x72d   : > { %1861 = vadd.xlane.f32.xlu1 %v7330_v11 }
 0x72e   : > { %v7334_v48 = vpop.eup %5789 }
 0x72f   : > { %v7336_v28 = vpop.eup %5791 }
 0x730   : > { %1869 = vadd.xlane.f32.xlu0 %v7334_v48 }
 0x731   : > { %1857 = vadd.xlane.f32.xlu1 %v7336_v28 }
 0x732   : > { %v7340_v55 = vpop.eup %5793 }
 0x735   : > { %1865 = vadd.xlane.f32.xlu1 %v7340_v55 }
 0x746   : > { %2070 = vrot.lane.b32.xlu1 %v6756_v50, %s6269_s22  ;;  %2068 = vrot.lane.b32.xlu0 %v6758_v52, %s6269_s22 }
 0x74a   : > { %2042 = vrot.lane.b32.xlu1 %v6677_v34, %s6269_s22  ;;  %2040 = vrot.lane.b32.xlu0 %v6671_v2, %s6269_s22 }
 0x74e   : > { %2046 = vrot.lane.b32.xlu1 %v6688_v46, %s6269_s22  ;;  %2044 = vrot.lane.b32.xlu0 %v6684_v42, %s6269_s22 }
 0x752   : > { %2050 = vrot.lane.b32.xlu1 %v6696_v57, %s6269_s22  ;;  %2048 = vrot.lane.b32.xlu0 %v6692_v53, %s6269_s22 }
 0x756   : > { %2054 = vrot.lane.b32.xlu1 %v6704_v12, %s6269_s22  ;;  %2052 = vrot.lane.b32.xlu0 %v6700_v63, %s6269_s22 }
 0x75a   : > { %2387 = vrot.lane.b32.xlu1 %v6782_v58, %s6269_s22  ;;  %2385 = vrot.lane.b32.xlu0 %v6784_v60, %s6269_s22 }
 0x75e   : > { %2391 = vrot.lane.b32.xlu1 %v6790_v19, %s6269_s22  ;;  %2389 = vrot.lane.b32.xlu0 %v6792_v4, %s6269_s22 }
 0x762   : > { %2395 = vrot.lane.b32.xlu1 %v6798_v15, %s6269_s22  ;;  %2393 = vrot.lane.b32.xlu0 %v6800_v23, %s6269_s22 }
 0x766   : > { %2399 = vrot.lane.b32.xlu1 %v6806_v0, %s6269_s22  ;;  %2397 = vrot.lane.b32.xlu0 %v6808_v22, %s6269_s22 }
 0x76a   : > { %2524 = vrot.lane.b32.xlu1 %v6716_v25, %s6270_s23  ;;  %2522 = vrot.lane.b32.xlu0 %v6718_v38, %s6270_s23 }
 0x771   : > { %v1844_v20 = vpop.xlane.xlu1 %1843 }
 0x774   : > { %v1842_v41 = vpop.xlane.xlu0 %1841 }
 0x775   : > { %5795 = vrcp.f32 %v1842_v41  ;;  %v1840_v24 = vpop.xlane.xlu1 %1839 }
 0x776   : > { %5797 = vrcp.f32 %v1840_v24 }
 0x777   : > { %5799 = vrcp.f32 %v1844_v20 }
 0x778   : > { %v2065_v29 = vpop.permute.xlu0 %2064 }
 0x779   : > { %v1846_v9 = vpop.xlane.xlu1 %1845 }
 0x77a   : > { %5801 = vrcp.f32 %v1846_v9 }
 0x77f   : > { %v5796_v47 = vpop.eup %5795 }
 0x780   : > { %v5798_v5 = vpop.eup %5797  ;;  %v1874_v18 = vmul.f32 %v5796_v47, %v7280_v59  ;;  %v2100_v59 = vsel %vm798_vm0, %v7275_v7, 0 }
 0x781   : > { %v1872_v21 = vmul.f32 %v5798_v5, %v7282_v1  ;;  %v5800_v61 = vpop.eup %5799  ;;  %v2106_v1 = vsel %vm798_vm0, %v7304_v43, 0 }
 0x782   : > { %v1876_v38 = vmul.f32 %v5800_v61, %v7277_v56  ;;  %v2103_v56 = vsel %vm798_vm0, %v2061_v30, 0 }
 0x783   : > { %v1903_v25 = vpack.c.bf16 %v1874_v18, %v1872_v21 }
 0x784   : > { %v5802_v51 = vpop.eup %5801 }
 0x785   : > { %v1878_v54 = vmul.f32 %v5802_v51, %v7286_v49  ;;  %5156 = vmatprep.mubr.bf16.mxu0 %v1903_v25  ;;  %v2109_v49 = vsel %vm798_vm0, %v2065_v29, 0 }
 0x787   : > { %v1904_v14 = vpack.c.bf16 %v1878_v54, %v1876_v38 }
 0x789   : > { %5157 = vmatmul.mubr.bf16.vlgmr.msra.gmra.mrb[48].mxu0 %v1904_v14 }
 0x78a   : > { %5173 = vmatpush3.bf16.xpose.msra.mxu0 %v2097_v3 }
 0x78b   : > { %5365 = vmatprep.subr.msk.bf16.mxu0 %vm798_vm0, %v7275_v7  ;;  %v2067_v7 = vpop.permute.xlu1 %2066 }
 0x792   : > { %5175 = vmatpush3.bf16.xpose.msra.mxu0 %v2100_v59 }
 0x793   : > { %5366 = vmatprep.subr.msk.bf16.mxu0 %vm798_vm0, %v2061_v30  ;;  %v2112_v30 = vsel %vm798_vm0, %v2067_v7, 0 }
 0x79a   : > { %5177 = vmatpush3.bf16.xpose.msra.mxu0 %v2103_v56 }
 0x79b   : > { %5367 = vmatprep.subr.msk.bf16.mxu0 %vm798_vm0, %v7304_v43 }
 0x7a2   : > { %5179 = vmatpush3.bf16.xpose.msra.mxu0 %v2106_v1 }
 0x7a3   : > { %5368 = vmatprep.subr.msk.bf16.mxu0 %vm798_vm0, %v2065_v29 }
 0x7a9   : > { %v1852_v62 = vpop.xlane.xlu0 %1851 }
 0x7aa   : > { %5181 = vmatpush3.bf16.xpose.msra.mxu0 %v2109_v49 }
 0x7ab   : > { %5369 = vmatprep.subr.msk.bf16.mxu0 %vm798_vm0, %v2067_v7 }
 0x7ad   : > { %v1848_v36 = vpop.xlane.xlu0 %1847 }
 0x7ae   : > { %5803 = vrcp.f32 %v1848_v36  ;;  %v1850_v10 = vpop.xlane.xlu1 %1849 }
 0x7af   : > { %5805 = vrcp.f32 %v1850_v10 }
 0x7b0   : > { %5807 = vrcp.f32 %v1852_v62 }
 0x7b1   : > { %v1854_v20 = vpop.xlane.xlu0 %1853 }
 0x7b2   : > { %5183 = vmatpush3.bf16.xpose.msra.mxu0 %v2112_v30  ;;  %5809 = vrcp.f32 %v1854_v20  ;;  %v1860_v43 = vpop.xlane.xlu1 %1859 }
 0x7b5   : > { %v1868_v41 = vpop.xlane.xlu0 %1867 }
 0x7b6   : > { %v1856_v24 = vpop.xlane.xlu1 %1855 }
 0x7b8   : > { %v5804_v9 = vpop.eup %5803 }
 0x7b9   : > { %v5806_v47 = vpop.eup %5805  ;;  %v1864_v5 = vpop.xlane.xlu0 %1863  ;;  %v1880_v18 = vmul.f32 %v5804_v9, %v7308_v45 }
 0x7ba   : > { %v5808_v21 = vpop.eup %5807  ;;  %v1862_v61 = vpop.xlane.xlu1 %1861  ;;  %v1882_v25 = vmul.f32 %v5806_v47, %v7310_v8 }
 0x7bb   : > { %5811 = vrcp.f32 %v1862_v61  ;;  %v1884_v14 = vmul.f32 %v5808_v21, %v7302_v31 }
 0x7bc   : > { %v5810_v51 = vpop.eup %5809  ;;  %v1905_v38 = vpack.c.bf16 %v1882_v25, %v1880_v18  ;;  %5813 = vrcp.f32 %v1856_v24 }
 0x7bd   : > { %v1870_v54 = vpop.xlane.xlu0 %1869  ;;  %v1886_v3 = vmul.f32 %v5810_v51, %v7315_v32  ;;  %5815 = vrcp.f32 %v1860_v43 }
 0x7be   : > { %v1858_v59 = vpop.xlane.xlu1 %1857  ;;  %5160 = vmatprep.mubr.bf16.mxu0 %v1905_v38 }
 0x7bf   : > { %5817 = vrcp.f32 %v1858_v59  ;;  %v1906_v56 = vpack.c.bf16 %v1886_v3, %v1884_v14 }
 0x7c0   : > { %5819 = vrcp.f32 %v1864_v5 }
 0x7c1   : > { %5161 = vmatmul.mubr.bf16.gmra.mrb[52].mxu0 %v1906_v56  ;;  %v2069_v45 = vpop.permute.xlu0 %2068 }
 0x7c2   : > { %v1866_v1 = vpop.xlane.xlu1 %1865  ;;  %5370 = vmatprep.subr.msk.bf16.mxu0 %vm798_vm0, %v2069_v45  ;;  %v2115_v8 = vsel %vm798_vm0, %v2069_v45, 0 }
 0x7c3   : > { %5821 = vrcp.f32 %v1866_v1  ;;  %5185 = vmatpush3.bf16.xpose.msra.mxu0 %v2115_v8 }
 0x7c4   : > { %5823 = vrcp.f32 %v1870_v54 }
 0x7c5   : > { %v2041_v29 = vpop.permute.xlu0 %2040  ;;  %v5812_v31 = vpop.eup %5811  ;;  %5825 = vrcp.f32 %v1868_v41 }
 0x7c6   : > { %v2071_v32 = vpop.permute.xlu1 %2070  ;;  %v5814_v49 = vpop.eup %5813  ;;  %v1894_v10 = vmul.f32 %v5812_v31, %v7330_v11 }
 0x7c7   : > { %5371 = vmatprep.subr.msk.bf16.mxu0 %vm798_vm0, %v2071_v32  ;;  %v5816_v62 = vpop.eup %5815  ;;  %v2118_v20 = vsel %vm798_vm0, %v2071_v32, 0  ;;  %v1888_v43 = vmul.f32 %v5814_v49, %v7324_v44 }
 0x7c8   : > { %v1892_v41 = vmul.f32 %v5816_v62, %v7317_v16 }
 0x7c9   : > { %v5818_v7 = vpop.eup %5817  ;;  %v2045_v36 = vpop.permute.xlu0 %2044 }
 0x7ca   : > { %v2043_v30 = vpop.permute.xlu1 %2042  ;;  %v1890_v24 = vmul.f32 %v5818_v7, %v7336_v28  ;;  %v5820_v9 = vpop.eup %5819  ;;  %v1908_v21 = vpack.c.bf16 %v1894_v10, %v1892_v41 }
 0x7cb   : > { %5187 = vmatpush3.bf16.xpose.msra.mxu0 %v2118_v20  ;;  %v1896_v11 = vmul.f32 %v5820_v9, %v7328_v17 }
 0x7cc   : > { %v1907_v47 = vpack.c.bf16 %v1890_v24, %v1888_v43 }
 0x7cd   : > { %v5822_v5 = vpop.eup %5821  ;;  %v2049_v18 = vpop.permute.xlu0 %2048 }
 0x7ce   : > { %v5824_v61 = vpop.eup %5823  ;;  %v2047_v25 = vpop.permute.xlu1 %2046  ;;  %5164 = vmatprep.mubr.bf16.mxu0 %v1907_v47  ;;  %v1898_v51 = vmul.f32 %v5822_v5, %v7340_v55 }
 0x7cf   : > { %5165 = vmatmul.mubr.bf16.gmra.mrb[56].mxu0 %v1908_v21  ;;  %v5826_v38 = vpop.eup %5825  ;;  %v1902_v28 = vmul.f32 %v5824_v61, %v7334_v48 }
 0x7d0   : > { %v1909_v44 = vpack.c.bf16 %v1898_v51, %v1896_v11  ;;  %v1900_v16 = vmul.f32 %v5826_v38, %v7322_v13 }
 0x7d1   : > { %v2053_v54 = vpop.permute.xlu0 %2052 }
 0x7d2   : > { %v2051_v14 = vpop.permute.xlu1 %2050  ;;  %5168 = vmatprep.mubr.bf16.mxu0 %v1909_v44  ;;  %v1910_v59 = vpack.c.bf16 %v1902_v28, %v1900_v16 }
 0x7d5   : > { %v2386_v3 = vpop.permute.xlu0 %2385 }
 0x7d6   : > { %v2055_v56 = vpop.permute.xlu1 %2054  ;;  %5204 = vmatprep.subr.bf16.mxu1 %v2386_v3 }
 0x7d7   : > { %5169 = vmatmul.mubr.bf16.gmra.mrb[60].mxu0 %v1910_v59  ;;  %5205 = vmatpush3.bf16.msra.mxu1 %v2386_v3 }
 0x7d8   : > { %5188 = vmatprep.mubr.msk.bf16.mxu0 %vm798_vm0, %v2041_v29 }
 0x7d9   : > { %v2390_v55 = vpop.permute.xlu0 %2389 }
 0x7da   : > { %v2388_v17 = vpop.permute.xlu1 %2387 }
 0x7db   : > { %5206 = vmatprep.subr.bf16.mxu1 %v2388_v17 }
 0x7dc   : > { %5207 = vmatpush3.bf16.msra.mxu1 %v2388_v17 }
 0x7dd   : > { %5208 = vmatprep.subr.bf16.mxu1 %v2390_v55  ;;  %v2394_v13 = vpop.permute.xlu0 %2393 }
 0x7de   : > { %v2392_v48 = vpop.permute.xlu1 %2391 }
 0x7df   : > { %5189 = vmatmul.mubr.msk.bf16.vlgmr.msra.gmra.mrb[64].mxu0 %vm798_vm0, %v2043_v30 }
 0x7e0   : > { %5192 = vmatprep.mubr.msk.bf16.mxu0 %vm798_vm0, %v2045_v36  ;;  %5209 = vmatpush3.bf16.msra.mxu1 %v2390_v55 }
 0x7e1   : > { %5210 = vmatprep.subr.bf16.mxu1 %v2392_v48  ;;  %v2398_v1 = vpop.permute.xlu0 %2397 }
 0x7e2   : > { %v2396_v45 = vpop.permute.xlu1 %2395 }
 0x7e4   : > { %5211 = vmatpush3.bf16.msra.mxu1 %v2392_v48 }
 0x7e5   : > { %5212 = vmatprep.subr.bf16.mxu1 %v2394_v13  ;;  %v7426_v29 = vpop.permute.xlu0 %2522 }
 0x7e6   : > { %v2400_v8 = vpop.permute.xlu1 %2399 }
 0x7e7   : > { %5193 = vmatmul.mubr.msk.bf16.gmra.mrb[68].mxu0 %vm798_vm0, %v2047_v25 }
 0x7e8   : > { %5196 = vmatprep.mubr.msk.bf16.mxu0 %vm798_vm0, %v2049_v18  ;;  %5213 = vmatpush3.bf16.msra.mxu1 %v2394_v13 }
 0x7e9   : > { %5214 = vmatprep.subr.bf16.mxu1 %v2396_v45 }
 0x7ec   : > { %5215 = vmatpush3.bf16.msra.mxu1 %v2396_v45 }
 0x7ed   : > { %5216 = vmatprep.subr.bf16.mxu1 %v2398_v1 }
 0x7ef   : > { %5197 = vmatmul.mubr.msk.bf16.gmra.mrb[72].mxu0 %vm798_vm0, %v2051_v14 }
 0x7f0   : > { %5200 = vmatprep.mubr.msk.bf16.mxu0 %vm798_vm0, %v2053_v54  ;;  %5217 = vmatpush3.bf16.msra.mxu1 %v2398_v1 }
 0x7f1   : > { %5218 = vmatprep.subr.bf16.mxu1 %v2400_v8 }
 0x7f4   : > { %5219 = vmatpush3.bf16.msra.mxu1 %v2400_v8 }
 0x7f5   : > { %5372 = vmatprep.subr.msk.bf16.mxu1 %vm798_vm0, %v7426_v29 }
 0x7f7   : > { %5201 = vmatmul.mubr.msk.bf16.gmra.mrb[76].mxu0 %vm798_vm0, %v2055_v56 }
 0x85c   : > { %v7431_v31 = vpop.f32.mrb[48].mxu0 }
 0x85d   : > { %8813 = vst [vmem:[#allocation22_spill] sm:$0xff] %v7431_v31  ;;  %v7433_v32 = vpop.f32.mrb[49].mxu0 }
 0x85e   : > { %8814 = vst [vmem:[#allocation23_spill] sm:$0xff] %v7433_v32  ;;  %v7435_v49 = vpop.f32.mrb[50].mxu0 }
 0x85f   : > { %8815 = vst [vmem:[#allocation49_spill] sm:$0xff] %v7435_v49  ;;  %v7439_v7 = vpop.f32.mrb[51].mxu0 }
 0x860   : > { %8816 = vst [vmem:[#allocation50_spill] sm:$0xff] %v7439_v7 }
 0x894   : > { %v7443_v10 = vpop.f32.mrb[52].mxu0 }
 0x895   : > { %8817 = vst [vmem:[#allocation51_spill] sm:$0xff] %v7443_v10  ;;  %v7445_v30 = vpop.f32.mrb[53].mxu0 }
 0x896   : > { %8818 = vst [vmem:[#allocation52_spill] sm:$0xff] %v7445_v30  ;;  %v7447_v20 = vpop.f32.mrb[54].mxu0  ;;  %v7567_v30 = vpop.permute.xlu1 %2524 }
 0x897   : > { %8819 = vst [vmem:[#allocation53_spill] sm:$0xff] %v7447_v20  ;;  %v7451_v24 = vpop.f32.mrb[55].mxu0 }
 0x898   : > { %8820 = vst [vmem:[#allocation54_spill] sm:$0xff] %v7451_v24 }
 0x8a2   : > { %v7455_v41 = vpop.f32.mrb[56].mxu0 }
 0x8a3   : > { %8821 = vst [vmem:[#allocation55_spill] sm:$0xff] %v7455_v41  ;;  %v7457_v47 = vpop.f32.mrb[57].mxu0 }
 0x8a4   : > { %8822 = vst [vmem:[#allocation56_spill] sm:$0xff] %v7457_v47  ;;  %v7459_v5 = vpop.f32.mrb[58].mxu0 }
 0x8a5   : > { %8823 = vst [vmem:[#allocation57_spill] sm:$0xff] %v7459_v5  ;;  %v7463_v21 = vpop.f32.mrb[59].mxu0 }
 0x8a6   : > { %8824 = vst [vmem:[#allocation58_spill] sm:$0xff] %v7463_v21  ;;  %v8839_v21 = vld [vmem:[#allocation15_spill] sm:$0xff] }
 0x8aa   : > { %v7467_v25 = vpop.f32.mrb[60].mxu0 }
 0x8ab   : > { %8825 = vst [vmem:[#allocation59_spill] sm:$0xff] %v7467_v25  ;;  %v7469_v11 = vpop.f32.mrb[61].mxu0 }
 0x8ac   : > { %8826 = vst [vmem:[#allocation60_spill] sm:$0xff] %v7469_v11  ;;  %v7471_v51 = vpop.f32.mrb[62].mxu0 }
 0x8ad   : > { %8827 = vst [vmem:[#allocation61_spill] sm:$0xff] %v7471_v51  ;;  %v7475_v44 = vpop.f32.mrb[63].mxu0 }
 0x8ae   : > { %8828 = vst [vmem:[#allocation62_spill] sm:$0xff] %v7475_v44 }
 0x8b2   : > { %v5190_v28 = vpop.f32.mrb[64].mxu0 }
 0x8b3   : > { %v2219_v14 = vsel %vm1126_vm1, -1e+30, %v5190_v28  ;;  %v2154_v16 = vpop.f32.mrb[65].mxu0 }
 0x8b4   : > { %2237 = vmax.xlane.f32.xlu0 %v2219_v14  ;;  %v5191_v3 = vpop.f32.mrb[66].mxu0  ;;  %v2217_v17 = vsel %vm1124_vm3, -1e+30, %v2154_v16 }
 0x8b5   : > { %v2157_v59 = vpop.f32.mrb[67].mxu0  ;;  %v2220_v48 = vsel %vm1127_vm4, -1e+30, %v5191_v3 }
 0x8b6   : > { %v2218_v56 = vsel %vm1125_vm2, -1e+30, %v2157_v59 }
 0x8b7   : > { %2235 = vmax.xlane.f32.xlu1 %v2218_v56 }
 0x8b8   : > { %2233 = vmax.xlane.f32.xlu0 %v2217_v17 }
 0x8ba   : > { %v5194_v55 = vpop.f32.mrb[68].mxu0 }
 0x8bb   : > { %v2170_v13 = vpop.f32.mrb[69].mxu0  ;;  %v7500_v28 = vsel %vm1130_vm6, -1e+30, %v5194_v55 }
 0x8bc   : > { %2239 = vmax.xlane.f32.xlu0 %v2220_v48  ;;  %v5195_v45 = vpop.f32.mrb[70].mxu0 }
 0x8bd   : > { %v7494_v1 = vsel %vm1131_vm5, -1e+30, %v5195_v45  ;;  %v2173_v8 = vpop.f32.mrb[71].mxu0  ;;  %v7512_v45 = vsel %vm1128_vm8, -1e+30, %v2170_v13  ;;  %v8832_v13 = vld [vmem:[#allocation27_spill] sm:$0xff] }
 0x8be   : > { %2247 = vmax.xlane.f32.xlu1 %v7494_v1  ;;  %v7506_v16 = vsel %vm1129_vm7, -1e+30, %v2173_v8  ;;  %vm8833_vm11 = vcmp.gt.s32.totalorder %v6823_v26, %v8832_v13 }
 0x8c0   : > { %2245 = vmax.xlane.f32.xlu0 %v7500_v28 }
 0x8c2   : > { %2243 = vmax.xlane.f32.xlu1 %v7506_v16  ;;  %v5198_v3 = vpop.f32.mrb[72].mxu0 }
 0x8c3   : > { %v2186_v54 = vpop.f32.mrb[73].mxu0  ;;  %v7524_v9 = vsel %vm1134_vm10, -1e+30, %v5198_v3 }
 0x8c4   : > { %2241 = vmax.xlane.f32.xlu0 %v7512_v45  ;;  %v5199_v55 = vpop.f32.mrb[74].mxu0  ;;  %v7536_v62 = vsel %vm1132_vm12, -1e+30, %v2186_v54  ;;  %v8838_v54 = vld [vmem:[#allocation14_spill] sm:$0xff] }
 0x8c5   : > { %v7518_v61 = vsel %vm1135_vm9, -1e+30, %v5199_v55  ;;  %v2189_v18 = vpop.f32.mrb[75].mxu0  ;;  %v8848_v55 = vld [vmem:[#allocation18_spill] sm:$0xff] }
 0x8c6   : > { %2255 = vmax.xlane.f32.xlu1 %v7518_v61  ;;  %v7530_v43 = vsel %vm8833_vm11, -1e+30, %v2189_v18  ;;  %v8836_v18 = vld [vmem:[#allocation30_spill] sm:$0xff] }
 0x8c7   : > { %vm8837_vm11 = vcmp.gt.s32.totalorder %v6823_v26, %v8836_v18 }
 0x8c8   : > { %2253 = vmax.xlane.f32.xlu0 %v7524_v9 }
 0x8ca   : > { %2251 = vmax.xlane.f32.xlu1 %v7530_v43  ;;  %v5202_v36 = vpop.f32.mrb[76].mxu0 }
 0x8cb   : > { %v2202_v11 = vpop.f32.mrb[77].mxu0  ;;  %v7542_v51 = vsel %vm1138_vm13, -1e+30, %v5202_v36 }
 0x8cc   : > { %2249 = vmax.xlane.f32.xlu0 %v7536_v62  ;;  %v5203_v3 = vpop.f32.mrb[78].mxu0  ;;  %v7548_v47 = vsel %vm8837_vm11, -1e+30, %v2202_v11 }
 0x8cd   : > { %v2205_v44 = vpop.f32.mrb[79].mxu0  ;;  %v7558_v36 = vsel %vm1139_vm15, -1e+30, %v5203_v3 }
 0x8ce   : > { %v7564_v11 = vsel %vm1137_vm14, -1e+30, %v2205_v44 }
 0x8d0   : > { %2261 = vmax.xlane.f32.xlu0 %v7542_v51 }
 0x8d4   : > { %2257 = vmax.xlane.f32.xlu0 %v7548_v47 }
 0x8db   : > { %2528 = vrot.lane.b32.xlu1 %v8838_v54, %s6270_s23 }
 0x8ea   : > { %2526 = vrot.lane.b32.xlu0 %v8839_v21, %s6270_s23 }
 0x8ff   : > { %2263 = vmax.xlane.f32.xlu1 %v7558_v36 }
 0x903   : > { %2259 = vmax.xlane.f32.xlu1 %v7564_v11 }
 0x941   : > { %v2238_v54 = vpop.xlane.xlu0 %2237 }
 0x942   : > { %v2267_v24 = vsub.f32 %v2219_v14, %v2238_v54 }
 0x944   : > { %v2285_v10 = vmul.f32 1.442695, %v2267_v24  ;;  %v2236_v21 = vpop.xlane.xlu1 %2235 }
 0x945   : > { %v2266_v20 = vsub.f32 %v2218_v56, %v2236_v21  ;;  %v2234_v32 = vpop.xlane.xlu0 %2233 }
 0x946   : > { %5827 = vpow2.f32 %v2285_v10  ;;  %v2265_v3 = vsub.f32 %v2217_v17, %v2234_v32 }
 0x947   : > { %v2283_v7 = vmul.f32 1.442695, %v2266_v20 }
 0x948   : > { %v2281_v31 = vmul.f32 1.442695, %v2265_v3 }
 0x949   : > { %5829 = vpow2.f32 %v2283_v7  ;;  %v2240_v49 = vpop.xlane.xlu0 %2239 }
 0x94a   : > { %5831 = vpow2.f32 %v2281_v31  ;;  %v2268_v22 = vsub.f32 %v2220_v48, %v2240_v49  ;;  %v8843_v49 = vld [vmem:[#allocation16_spill] sm:$0xff] }
 0x94b   : > { %v2248_v10 = vpop.xlane.xlu1 %2247 }
 0x94c   : > { %v2287_v44 = vmul.f32 1.442695, %v2268_v22  ;;  %v8842_v22 = vld [vmem:[#allocation17_spill] sm:$0xff]  ;;  %v2272_v41 = vsub.f32 %v7494_v1, %v2248_v10 }
 0x94d   : > { %v2246_v31 = vpop.xlane.xlu0 %2245 }
 0x94e   : > { %5833 = vpow2.f32 %v2287_v44  ;;  %v2271_v14 = vsub.f32 %v7500_v28, %v2246_v31  ;;  %v2295_v15 = vmul.f32 1.442695, %v2272_v41 }
 0x94f   : > { %v2244_v56 = vpop.xlane.xlu1 %2243 }
 0x950   : > { %v7569_v0 = vpop.eup %5827  ;;  %v2293_v48 = vmul.f32 1.442695, %v2271_v14  ;;  %v2270_v21 = vsub.f32 %v7506_v16, %v2244_v56 }
 0x951   : > { %2317 = vadd.xlane.f32.xlu1 %v7569_v0  ;;  %v2242_v7 = vpop.xlane.xlu0 %2241 }
 0x952   : > { %v2269_v54 = vsub.f32 %v7512_v45, %v2242_v7  ;;  %5835 = vpow2.f32 %v2293_v48  ;;  %v2291_v23 = vmul.f32 1.442695, %v2270_v21 }
 0x953   : > { %v7572_v5 = vpop.eup %5829  ;;  %v2256_v3 = vpop.xlane.xlu1 %2255 }
 0x954   : > { %v7574_v24 = vpop.eup %5831  ;;  %2315 = vadd.xlane.f32.xlu0 %v7572_v5  ;;  %v2276_v1 = vsub.f32 %v7518_v61, %v2256_v3 }
 0x955   : > { %2313 = vadd.xlane.f32.xlu1 %v7574_v24  ;;  %v2254_v20 = vpop.xlane.xlu0 %2253 }
 0x956   : > { %v2303_v41 = vmul.f32 1.442695, %v2276_v1 }
 0x957   : > { %v2252_v18 = vpop.xlane.xlu1 %2251 }
 0x958   : > { %v7578_v32 = vpop.eup %5833 }
 0x959   : > { %2319 = vadd.xlane.f32.xlu1 %v7578_v32  ;;  %v2250_v17 = vpop.xlane.xlu0 %2249 }
 0x95a   : > { %v2273_v45 = vsub.f32 %v7536_v62, %v2250_v17  ;;  %v2274_v62 = vsub.f32 %v7530_v43, %v2252_v18 }
 0x95c   : > { %v2297_v10 = vmul.f32 1.442695, %v2273_v45  ;;  %v7594_v56 = vpop.eup %5835  ;;  %v2563_v45 = vsel %vm798_vm0, %v7426_v29, 0 }
 0x95d   : > { %v2262_v44 = vpop.xlane.xlu0 %2261 }
 0x95e   : > { %v2279_v28 = vsub.f32 %v7542_v51, %v2262_v44 }
 0x960   : > { %v2309_v16 = vmul.f32 1.442695, %v2279_v28 }
 0x961   : > { %v2258_v7 = vpop.xlane.xlu0 %2257 }
 0x962   : > { %v2277_v14 = vsub.f32 %v7548_v47, %v2258_v7 }
 0x96a   : > { %2530 = vrot.lane.b32.xlu0 %v8842_v22, %s6270_s23  ;;  %2532 = vrot.lane.b32.xlu1 %v8843_v49, %s6270_s23  ;;  %v2289_v22 = vmul.f32 1.442695, %v2269_v54  ;;  %v2275_v49 = vsub.f32 %v7524_v9, %v2254_v20  ;;  %v7596_v9 = vpop.permute.xlu1 %2528  ;;  %v2299_v20 = vmul.f32 1.442695, %v2274_v62 }
 0x96c   : > { %5837 = vpow2.f32 %v2289_v22  ;;  %v2301_v31 = vmul.f32 1.442695, %v2275_v49 }
 0x96d   : > { %5839 = vpow2.f32 %v2291_v23  ;;  %v2305_v23 = vmul.f32 1.442695, %v2277_v14 }
 0x96e   : > { %5841 = vpow2.f32 %v2295_v15 }
 0x96f   : > { %5843 = vpow2.f32 %v2301_v31 }
 0x970   : > { %5845 = vpow2.f32 %v2309_v16 }
 0x971   : > { %5847 = vpow2.f32 %v2297_v10 }
 0x972   : > { %5849 = vpow2.f32 %v2305_v23 }
 0x973   : > { %5851 = vpow2.f32 %v2303_v41 }
 0x976   : > { %v7600_v15 = vpop.eup %5837 }
 0x977   : > { %v7602_v47 = vpop.eup %5839 }
 0x978   : > { %v7607_v48 = vpop.eup %5841 }
 0x979   : > { %v7609_v43 = vpop.eup %5843 }
 0x97a   : > { %v7614_v21 = vpop.eup %5845 }
 0x97b   : > { %v7616_v3 = vpop.eup %5847 }
 0x97c   : > { %v7620_v44 = vpop.eup %5849 }
 0x97d   : > { %v7622_v22 = vpop.eup %5851 }
 0x989   : > { %2325 = vadd.xlane.f32.xlu0 %v7594_v56 }
 0x98c   : > { %v2264_v51 = vpop.xlane.xlu1 %2263 }
 0x98d   : > { %v2280_v61 = vsub.f32 %v7558_v36, %v2264_v51  ;;  %2321 = vadd.xlane.f32.xlu0 %v7600_v15 }
 0x98e   : > { %2323 = vadd.xlane.f32.xlu1 %v7602_v47 }
 0x98f   : > { %v2311_v17 = vmul.f32 1.442695, %v2280_v61 }
 0x990   : > { %v2260_v54 = vpop.xlane.xlu1 %2259 }
 0x991   : > { %5853 = vpow2.f32 %v2311_v17  ;;  %v2278_v18 = vsub.f32 %v7564_v11, %v2260_v54  ;;  %2327 = vadd.xlane.f32.xlu0 %v7607_v48 }
 0x992   : > { %2333 = vadd.xlane.f32.xlu1 %v7609_v43  ;;  %5855 = vpow2.f32 %v2299_v20 }
 0x993   : > { %v2307_v36 = vmul.f32 1.442695, %v2278_v18 }
 0x995   : > { %2341 = vadd.xlane.f32.xlu0 %v7614_v21  ;;  %5857 = vpow2.f32 %v2307_v36 }
 0x996   : > { %2329 = vadd.xlane.f32.xlu1 %v7616_v3 }
 0x999   : > { %2337 = vadd.xlane.f32.xlu0 %v7620_v44 }
 0x99a   : > { %2335 = vadd.xlane.f32.xlu1 %v7622_v22 }
 0x99b   : > { %v7626_v11 = vpop.eup %5853 }
 0x99c   : > { %v7628_v49 = vpop.eup %5855 }
 0x99d   : > { %2343 = vadd.xlane.f32.xlu0 %v7626_v11 }
 0x99e   : > { %2331 = vadd.xlane.f32.xlu1 %v7628_v49 }
 0x99f   : > { %v7632_v28 = vpop.eup %5857 }
 0x9a2   : > { %2339 = vadd.xlane.f32.xlu1 %v7632_v28 }
 0x9b3   : > { %2536 = vrot.lane.b32.xlu1 %v6756_v50, %s6270_s23  ;;  %2534 = vrot.lane.b32.xlu0 %v6758_v52, %s6270_s23 }
 0x9b7   : > { %2508 = vrot.lane.b32.xlu1 %v6677_v34, %s6270_s23  ;;  %2506 = vrot.lane.b32.xlu0 %v6671_v2, %s6270_s23  ;;  %v2527_v2 = vpop.permute.xlu0 %2526 }
 0x9bb   : > { %2512 = vrot.lane.b32.xlu1 %v6688_v46, %s6270_s23  ;;  %2510 = vrot.lane.b32.xlu0 %v6684_v42, %s6270_s23 }
 0x9bf   : > { %2516 = vrot.lane.b32.xlu1 %v6696_v57, %s6270_s23  ;;  %2514 = vrot.lane.b32.xlu0 %v6692_v53, %s6270_s23 }
 0x9c3   : > { %2520 = vrot.lane.b32.xlu1 %v6704_v12, %s6270_s23  ;;  %2518 = vrot.lane.b32.xlu0 %v6700_v63, %s6270_s23 }
 0x9c7   : > { %2853 = vrot.lane.b32.xlu1 %v6782_v58, %s6270_s23  ;;  %2851 = vrot.lane.b32.xlu0 %v6784_v60, %s6270_s23 }
 0x9cb   : > { %2855 = vrot.lane.b32.xlu0 %v6792_v4, %s6270_s23 }
 0x9cf   : > { %2857 = vrot.lane.b32.xlu0 %v6790_v19, %s6270_s23 }
 0x9de   : > { %v2318_v34 = vpop.xlane.xlu1 %2317 }
 0x9e1   : > { %v2316_v42 = vpop.xlane.xlu0 %2315 }
 0x9e2   : > { %5859 = vrcp.f32 %v2316_v42  ;;  %v2314_v46 = vpop.xlane.xlu1 %2313 }
 0x9e3   : > { %5861 = vrcp.f32 %v2314_v46 }
 0x9e4   : > { %5863 = vrcp.f32 %v2318_v34 }
 0x9e5   : > { %v2531_v29 = vpop.permute.xlu0 %2530 }
 0x9e6   : > { %v2320_v53 = vpop.xlane.xlu1 %2319 }
 0x9e7   : > { %5865 = vrcp.f32 %v2320_v53 }
 0x9ec   : > { %v5860_v57 = vpop.eup %5859 }
 0x9ed   : > { %v5862_v63 = vpop.eup %5861  ;;  %v2348_v12 = vmul.f32 %v5860_v57, %v7572_v5  ;;  %v2566_v5 = vsel %vm798_vm0, %v7567_v30, 0 }
 0x9ee   : > { %v2346_v50 = vmul.f32 %v5862_v63, %v7574_v24  ;;  %v5864_v52 = vpop.eup %5863  ;;  %v2572_v24 = vsel %vm798_vm0, %v7596_v9, 0 }
 0x9ef   : > { %v2350_v19 = vmul.f32 %v5864_v52, %v7569_v0  ;;  %v2569_v0 = vsel %vm798_vm0, %v2527_v2, 0 }
 0x9f0   : > { %v2377_v58 = vpack.c.bf16 %v2348_v12, %v2346_v50 }
 0x9f1   : > { %v5866_v60 = vpop.eup %5865 }
 0x9f2   : > { %v2352_v4 = vmul.f32 %v5866_v60, %v7578_v32  ;;  %5220 = vmatprep.mubr.bf16.mxu1 %v2377_v58  ;;  %v2575_v32 = vsel %vm798_vm0, %v2531_v29, 0 }
 0x9f4   : > { %v2378_v31 = vpack.c.bf16 %v2352_v4, %v2350_v19 }
 0x9f6   : > { %5221 = vmatmul.mubr.bf16.vlgmr.msra.gmra.mrb[64].mxu1 %v2378_v31 }
 0x9f7   : > { %5237 = vmatpush3.bf16.xpose.msra.mxu1 %v2563_v45 }
 0x9f8   : > { %5373 = vmatprep.subr.msk.bf16.mxu1 %vm798_vm0, %v7567_v30  ;;  %v2533_v30 = vpop.permute.xlu1 %2532 }
 0x9f9   : > { %v2578_v1 = vsel %vm798_vm0, %v2533_v30, 0 }
 0x9ff   : > { %5239 = vmatpush3.bf16.xpose.msra.mxu1 %v2566_v5 }
 0xa00   : > { %5374 = vmatprep.subr.msk.bf16.mxu1 %vm798_vm0, %v2527_v2 }
 0xa07   : > { %5241 = vmatpush3.bf16.xpose.msra.mxu1 %v2569_v0 }
 0xa08   : > { %5375 = vmatprep.subr.msk.bf16.mxu1 %vm798_vm0, %v7596_v9 }
 0xa0f   : > { %5243 = vmatpush3.bf16.xpose.msra.mxu1 %v2572_v24 }
 0xa10   : > { %5376 = vmatprep.subr.msk.bf16.mxu1 %vm798_vm0, %v2531_v29 }
 0xa16   : > { %v2326_v7 = vpop.xlane.xlu0 %2325 }
 0xa17   : > { %5245 = vmatpush3.bf16.xpose.msra.mxu1 %v2575_v32 }
 0xa18   : > { %5377 = vmatprep.subr.msk.bf16.mxu1 %vm798_vm0, %v2533_v30 }
 0xa1a   : > { %v2322_v16 = vpop.xlane.xlu0 %2321 }
 0xa1b   : > { %5867 = vrcp.f32 %v2322_v16  ;;  %v2324_v14 = vpop.xlane.xlu1 %2323 }
 0xa1c   : > { %5869 = vrcp.f32 %v2324_v14 }
 0xa1d   : > { %5871 = vrcp.f32 %v2326_v7 }
 0xa1e   : > { %v2328_v10 = vpop.xlane.xlu0 %2327 }
 0xa1f   : > { %5247 = vmatpush3.bf16.xpose.msra.mxu1 %v2578_v1  ;;  %5873 = vrcp.f32 %v2328_v10  ;;  %v2334_v9 = vpop.xlane.xlu1 %2333 }
 0xa22   : > { %v2342_v23 = vpop.xlane.xlu0 %2341 }
 0xa23   : > { %v2330_v41 = vpop.xlane.xlu1 %2329 }
 0xa25   : > { %v5868_v62 = vpop.eup %5867 }
 0xa26   : > { %v5870_v51 = vpop.eup %5869  ;;  %v2338_v61 = vpop.xlane.xlu0 %2337  ;;  %v2354_v20 = vmul.f32 %v5868_v62, %v7600_v15 }
 0xa27   : > { %v5872_v17 = vpop.eup %5871  ;;  %v2336_v54 = vpop.xlane.xlu1 %2335  ;;  %v2356_v18 = vmul.f32 %v5870_v51, %v7602_v47 }
 0xa28   : > { %5875 = vrcp.f32 %v2336_v54  ;;  %v2358_v42 = vmul.f32 %v5872_v17, %v7594_v56 }
 0xa29   : > { %v5874_v36 = vpop.eup %5873  ;;  %v2379_v2 = vpack.c.bf16 %v2356_v18, %v2354_v20  ;;  %5877 = vrcp.f32 %v2330_v41 }
 0xa2a   : > { %v2344_v34 = vpop.xlane.xlu0 %2343  ;;  %v2360_v46 = vmul.f32 %v5874_v36, %v7607_v48  ;;  %5879 = vrcp.f32 %v2334_v9 }
 0xa2b   : > { %v2332_v53 = vpop.xlane.xlu1 %2331  ;;  %5224 = vmatprep.mubr.bf16.mxu1 %v2379_v2 }
 0xa2c   : > { %5881 = vrcp.f32 %v2332_v53  ;;  %v2380_v57 = vpack.c.bf16 %v2360_v46, %v2358_v42 }
 0xa2d   : > { %5883 = vrcp.f32 %v2338_v61 }
 0xa2e   : > { %5225 = vmatmul.mubr.bf16.gmra.mrb[68].mxu1 %v2380_v57  ;;  %v2535_v15 = vpop.permute.xlu0 %2534 }
 0xa2f   : > { %v2581_v63 = vsel %vm798_vm0, %v2535_v15, 0  ;;  %v2340_v47 = vpop.xlane.xlu1 %2339  ;;  %5378 = vmatprep.subr.msk.bf16.mxu1 %vm798_vm0, %v2535_v15 }
 0xa30   : > { %5885 = vrcp.f32 %v2340_v47  ;;  %5249 = vmatpush3.bf16.xpose.msra.mxu1 %v2581_v63 }
 0xa31   : > { %5887 = vrcp.f32 %v2344_v34 }
 0xa32   : > { %v2507_v12 = vpop.permute.xlu0 %2506  ;;  %v5876_v56 = vpop.eup %5875  ;;  %5889 = vrcp.f32 %v2342_v23 }
 0xa33   : > { %v2537_v48 = vpop.permute.xlu1 %2536  ;;  %v5878_v50 = vpop.eup %5877  ;;  %v2368_v19 = vmul.f32 %v5876_v56, %v7622_v22 }
 0xa34   : > { %5379 = vmatprep.subr.msk.bf16.mxu1 %vm798_vm0, %v2537_v48  ;;  %v5880_v52 = vpop.eup %5879  ;;  %v2584_v4 = vsel %vm798_vm0, %v2537_v48, 0  ;;  %v2362_v45 = vmul.f32 %v5878_v50, %v7616_v3 }
 0xa35   : > { %v2366_v24 = vmul.f32 %v5880_v52, %v7609_v43 }
 0xa36   : > { %v5882_v58 = vpop.eup %5881  ;;  %v2511_v60 = vpop.permute.xlu0 %2510 }
 0xa37   : > { %v2509_v31 = vpop.permute.xlu1 %2508  ;;  %v2364_v5 = vmul.f32 %v5882_v58, %v7628_v49  ;;  %v5884_v0 = vpop.eup %5883  ;;  %v2382_v30 = vpack.c.bf16 %v2368_v19, %v2366_v24 }
 0xa38   : > { %5251 = vmatpush3.bf16.xpose.msra.mxu1 %v2584_v4  ;;  %v2370_v22 = vmul.f32 %v5884_v0, %v7620_v44 }
 0xa39   : > { %v2381_v29 = vpack.c.bf16 %v2364_v5, %v2362_v45 }
 0xa3a   : > { %v5886_v32 = vpop.eup %5885  ;;  %v2515_v7 = vpop.permute.xlu0 %2514 }
 0xa3b   : > { %v5888_v16 = vpop.eup %5887  ;;  %v2513_v14 = vpop.permute.xlu1 %2512  ;;  %5228 = vmatprep.mubr.bf16.mxu1 %v2381_v29  ;;  %v2372_v1 = vmul.f32 %v5886_v32, %v7632_v28 }
 0xa3c   : > { %5229 = vmatmul.mubr.bf16.gmra.mrb[72].mxu1 %v2382_v30  ;;  %v5890_v10 = vpop.eup %5889  ;;  %v2376_v49 = vmul.f32 %v5888_v16, %v7626_v11 }
 0xa3d   : > { %v2383_v3 = vpack.c.bf16 %v2372_v1, %v2370_v22  ;;  %v2374_v43 = vmul.f32 %v5890_v10, %v7614_v21  ;;  %v8844_v21 = vmov 0  }
 0xa3e   : > { %v2519_v9 = vpop.permute.xlu0 %2518 }
 0xa3f   : > { %v2517_v23 = vpop.permute.xlu1 %2516  ;;  %5232 = vmatprep.mubr.bf16.mxu1 %v2383_v3  ;;  %v2384_v62 = vpack.c.bf16 %v2376_v49, %v2374_v43 }
 0xa42   : > { %v2852_v41 = vpop.permute.xlu0 %2851 }
 0xa43   : > { %v2521_v51 = vpop.permute.xlu1 %2520  ;;  %5268 = vmatprep.subr.bf16.mxu0 %v2852_v41 }
 0xa44   : > { %5233 = vmatmul.mubr.bf16.gmra.mrb[76].mxu1 %v2384_v62  ;;  %5269 = vmatpush3.bf16.msra.mxu0 %v2852_v41 }
 0xa45   : > { %5252 = vmatprep.mubr.msk.bf16.mxu1 %vm798_vm0, %v2507_v12 }
 0xa46   : > { %v2856_v44 = vpop.permute.xlu0 %2855 }
 0xa47   : > { %v2854_v28 = vpop.permute.xlu1 %2853 }
 0xa48   : > { %5270 = vmatprep.subr.bf16.mxu0 %v2854_v28 }
 0xa49   : > { %5271 = vmatpush3.bf16.msra.mxu0 %v2854_v28 }
 0xa4a   : > { %5272 = vmatprep.subr.bf16.mxu0 %v2856_v44  ;;  %v2858_v11 = vpop.permute.xlu0 %2857 }
 0xa4c   : > { %5253 = vmatmul.mubr.msk.bf16.vlgmr.msra.gmra.mrb[80].mxu1 %vm798_vm0, %v2509_v31 }
 0xa4d   : > { %5256 = vmatprep.mubr.msk.bf16.mxu1 %vm798_vm0, %v2511_v60  ;;  %5273 = vmatpush3.bf16.msra.mxu0 %v2856_v44 }
 0xa4e   : > { %5274 = vmatprep.subr.bf16.mxu0 %v2858_v11 }
 0xa51   : > { %5275 = vmatpush3.bf16.msra.mxu0 %v2858_v11 }
 0xa54   : > { %5257 = vmatmul.mubr.msk.bf16.gmra.mrb[84].mxu1 %vm798_vm0, %v2513_v14 }
 0xa55   : > { %5260 = vmatprep.mubr.msk.bf16.mxu1 %vm798_vm0, %v2515_v7 }
 0xa5c   : > { %5261 = vmatmul.mubr.msk.bf16.gmra.mrb[88].mxu1 %vm798_vm0, %v2517_v23 }
 0xa5d   : > { %5264 = vmatprep.mubr.msk.bf16.mxu1 %vm798_vm0, %v2519_v9 }
 0xa64   : > { %5265 = vmatmul.mubr.msk.bf16.gmra.mrb[92].mxu1 %vm798_vm0, %v2521_v51  ;;  %v8849_v51 = vld [vmem:[#allocation19_spill] sm:$0xff] }
 0xa65   : > { %3772 = vmatprep.mubr.bf16.mxu1 %v8844_v21 }
 0xac9   : > { %v7708_v61 = vpop.f32.mrb[64].mxu1 }
 0xaca   : > { %v7710_v20 = vpop.f32.mrb[65].mxu1 }
 0xacb   : > { %v7712_v17 = vpop.f32.mrb[66].mxu1 }
 0xacc   : > { %v5462_v54 = vpack.i.bf16 %v7712_v17, %v7708_v61  ;;  %v7716_v18 = vpop.f32.mrb[67].mxu1 }
 0xacd   : > { %v5457_v36 = vpack.i.bf16 %v7716_v18, %v7710_v20 }
 0xb01   : > { %v7720_v2 = vpop.f32.mrb[68].mxu1 }
 0xb02   : > { %v7722_v34 = vpop.f32.mrb[69].mxu1 }
 0xb03   : > { %v7724_v42 = vpop.f32.mrb[70].mxu1 }
 0xb04   : > { %v5492_v46 = vpack.i.bf16 %v7724_v42, %v7720_v2  ;;  %v7728_v53 = vpop.f32.mrb[71].mxu1 }
 0xb05   : > { %v5487_v57 = vpack.i.bf16 %v7728_v53, %v7722_v34 }
 0xb0f   : > { %v7732_v15 = vpop.f32.mrb[72].mxu1 }
 0xb10   : > { %v7734_v63 = vpop.f32.mrb[73].mxu1 }
 0xb11   : > { %v7736_v47 = vpop.f32.mrb[74].mxu1 }
 0xb12   : > { %v5522_v12 = vpack.i.bf16 %v7736_v47, %v7732_v15  ;;  %v7740_v56 = vpop.f32.mrb[75].mxu1  ;;  %v8873_v15 = vld [vmem:[#allocation59_spill] sm:$0xff] }
 0xb13   : > { %v5517_v48 = vpack.i.bf16 %v7740_v56, %v7734_v63  ;;  %v8875_v63 = vld [vmem:[#allocation62_spill] sm:$0xff]  ;;  %v8876_v56 = vld [vmem:[#allocation60_spill] sm:$0xff] }
 0xb17   : > { %v7744_v50 = vpop.f32.mrb[76].mxu1 }
 0xb18   : > { %v7746_v52 = vpop.f32.mrb[77].mxu1 }
 0xb19   : > { %v7748_v58 = vpop.f32.mrb[78].mxu1 }
 0xb1a   : > { %v5552_v60 = vpack.i.bf16 %v7748_v58, %v7744_v50  ;;  %v7752_v19 = vpop.f32.mrb[79].mxu1 }
 0xb1b   : > { %v5547_v4 = vpack.i.bf16 %v7752_v19, %v7746_v52  ;;  %v8879_v19 = vld [vmem:[#allocation34_spill] sm:$0xff] }
 0xb1f   : > { %v5254_v31 = vpop.f32.mrb[80].mxu1 }
 0xb20   : > { %v2685_v45 = vsel %vm1126_vm1, -1e+30, %v5254_v31  ;;  %v2620_v5 = vpop.f32.mrb[81].mxu1  ;;  %vm8845_vm1 = vcmp.gt.s32.totalorder %v6823_v26, %v8832_v13 }
 0xb21   : > { %2703 = vmax.xlane.f32.xlu0 %v2685_v45  ;;  %v5255_v0 = vpop.f32.mrb[82].mxu1  ;;  %v2683_v32 = vsel %vm1124_vm3, -1e+30, %v2620_v5  ;;  %vm3180_vm3 = vcmask 523264  }
 0xb22   : > { %v2623_v24 = vpop.f32.mrb[83].mxu1  ;;  %v2686_v6 = vsel %vm1127_vm4, -1e+30, %v5255_v0  ;;  %vm3197_vm4 = vcmask 785408  }
 0xb23   : > { %v2684_v29 = vsel %vm1125_vm2, -1e+30, %v2623_v24  ;;  %vm8847_vm2 = vmmov %vm8837_vm11 }
 0xb24   : > { %2701 = vmax.xlane.f32.xlu1 %v2684_v29 }
 0xb25   : > { %2699 = vmax.xlane.f32.xlu0 %v2683_v32 }
 0xb27   : > { %v5258_v7 = vpop.f32.mrb[84].mxu1 }
 0xb28   : > { %v2636_v30 = vpop.f32.mrb[85].mxu1  ;;  %v2689_v22 = vsel %vm1130_vm6, -1e+30, %v5258_v7 }
 0xb29   : > { %2705 = vmax.xlane.f32.xlu0 %v2686_v6  ;;  %v5259_v16 = vpop.f32.mrb[86].mxu1  ;;  %v2687_v40 = vsel %vm1128_vm8, -1e+30, %v2636_v30 }
 0xb2a   : > { %v2690_v14 = vsel %vm1131_vm5, -1e+30, %v5259_v16  ;;  %v2639_v27 = vpop.f32.mrb[87].mxu1 }
 0xb2b   : > { %2713 = vmax.xlane.f32.xlu1 %v2690_v14  ;;  %v7777_v1 = vsel %vm1129_vm7, -1e+30, %v2639_v27 }
 0xb2d   : > { %2711 = vmax.xlane.f32.xlu0 %v2689_v22 }
 0xb2f   : > { %2709 = vmax.xlane.f32.xlu1 %v7777_v1  ;;  %v5262_v35 = vpop.f32.mrb[88].mxu1 }
 0xb30   : > { %v2652_v10 = vpop.f32.mrb[89].mxu1  ;;  %v7792_v37 = vsel %vm1134_vm10, -1e+30, %v5262_v35 }
 0xb31   : > { %2707 = vmax.xlane.f32.xlu0 %v2687_v40  ;;  %v5263_v3 = vpop.f32.mrb[90].mxu1  ;;  %v7804_v49 = vsel %vm1132_vm12, -1e+30, %v2652_v10 }
 0xb32   : > { %v7786_v33 = vsel %vm1135_vm9, -1e+30, %v5263_v3  ;;  %v2655_v9 = vpop.f32.mrb[91].mxu1 }
 0xb33   : > { %2721 = vmax.xlane.f32.xlu1 %v7786_v33  ;;  %v7798_v59 = vsel %vm8845_vm1, -1e+30, %v2655_v9 }
 0xb35   : > { %2719 = vmax.xlane.f32.xlu0 %v7792_v37 }
 0xb37   : > { %2717 = vmax.xlane.f32.xlu1 %v7798_v59  ;;  %v5266_v38 = vpop.f32.mrb[92].mxu1 }
 0xb38   : > { %v2668_v23 = vpop.f32.mrb[93].mxu1  ;;  %v7810_v41 = vsel %vm1138_vm13, -1e+30, %v5266_v38 }
 0xb39   : > { %2715 = vmax.xlane.f32.xlu0 %v7804_v49  ;;  %v5267_v8 = vpop.f32.mrb[94].mxu1  ;;  %v7816_v62 = vsel %vm8847_vm2, -1e+30, %v2668_v23 }
 0xb3a   : > { %v2671_v43 = vpop.f32.mrb[95].mxu1  ;;  %v7826_v25 = vsel %vm1139_vm15, -1e+30, %v5267_v8 }
 0xb3b   : > { %v7832_v11 = vsel %vm1137_vm14, -1e+30, %v2671_v43 }
 0xb3d   : > { %2727 = vmax.xlane.f32.xlu0 %v7810_v41 }
 0xb41   : > { %2723 = vmax.xlane.f32.xlu0 %v7816_v62 }
 0xb48   : > { %2861 = vrot.lane.b32.xlu1 %v8848_v55, %s6270_s23 }
 0xb57   : > { %2859 = vrot.lane.b32.xlu0 %v8849_v51, %s6270_s23 }
 0xb6c   : > { %2729 = vmax.xlane.f32.xlu1 %v7826_v25 }
 0xb70   : > { %2725 = vmax.xlane.f32.xlu1 %v7832_v11 }
 0xbae   : > { %v2704_v31 = vpop.xlane.xlu0 %2703 }
 0xbaf   : > { %v2733_v5 = vsub.f32 %v2685_v45, %v2704_v31 }
 0xbb1   : > { %v2751_v0 = vmul.f32 1.442695, %v2733_v5  ;;  %v2702_v7 = vpop.xlane.xlu1 %2701 }
 0xbb2   : > { %v2700_v24 = vpop.xlane.xlu0 %2699  ;;  %v2732_v27 = vsub.f32 %v2684_v29, %v2702_v7 }
 0xbb3   : > { %5891 = vpow2.f32 %v2751_v0  ;;  %v2731_v30 = vsub.f32 %v2683_v32, %v2700_v24 }
 0xbb4   : > { %v2749_v38 = vmul.f32 1.442695, %v2732_v27 }
 0xbb5   : > { %v2747_v16 = vmul.f32 1.442695, %v2731_v30 }
 0xbb6   : > { %v2706_v35 = vpop.xlane.xlu0 %2705 }
 0xbb7   : > { %5893 = vpow2.f32 %v2747_v16  ;;  %v2734_v10 = vsub.f32 %v2686_v6, %v2706_v35 }
 0xbb8   : > { %v2714_v3 = vpop.xlane.xlu1 %2713 }
 0xbb9   : > { %v2753_v9 = vmul.f32 1.442695, %v2734_v10  ;;  %v2738_v26 = vsub.f32 %v2690_v14, %v2714_v3  ;;  %v8852_v3 = vld [vmem:[#allocation20_spill] sm:$0xff] }
 0xbba   : > { %v2712_v23 = vpop.xlane.xlu0 %2711 }
 0xbbb   : > { %5895 = vpow2.f32 %v2753_v9  ;;  %v2737_v8 = vsub.f32 %v2689_v22, %v2712_v23  ;;  %v2761_v55 = vmul.f32 1.442695, %v2738_v26  ;;  %v8853_v9 = vld [vmem:[#allocation21_spill] sm:$0xff] }
 0xbbc   : > { %v2710_v43 = vpop.xlane.xlu1 %2709  ;;  %5897 = vpow2.f32 %v2749_v38 }
 0xbbd   : > { %v7835_v13 = vpop.eup %5891  ;;  %v2759_v45 = vmul.f32 1.442695, %v2737_v8  ;;  %v2736_v29 = vsub.f32 %v7777_v1, %v2710_v43 }
 0xbbe   : > { %2783 = vadd.xlane.f32.xlu1 %v7835_v13  ;;  %v2708_v32 = vpop.xlane.xlu0 %2707 }
 0xbbf   : > { %5899 = vpow2.f32 %v2759_v45  ;;  %v2735_v6 = vsub.f32 %v2687_v40, %v2708_v32  ;;  %v2757_v22 = vmul.f32 1.442695, %v2736_v29 }
 0xbc0   : > { %5901 = vpow2.f32 %v2761_v55  ;;  %v2722_v0 = vpop.xlane.xlu1 %2721 }
 0xbc1   : > { %v7839_v51 = vpop.eup %5893  ;;  %v2755_v44 = vmul.f32 1.442695, %v2735_v6  ;;  %v2742_v26 = vsub.f32 %v7786_v33, %v2722_v0 }
 0xbc2   : > { %2779 = vadd.xlane.f32.xlu1 %v7839_v51  ;;  %v2720_v14 = vpop.xlane.xlu0 %2719 }
 0xbc3   : > { %5903 = vpow2.f32 %v2755_v44  ;;  %v2769_v43 = vmul.f32 1.442695, %v2742_v26  ;;  %v2741_v45 = vsub.f32 %v7792_v37, %v2720_v14 }
 0xbc4   : > { %5905 = vpow2.f32 %v2757_v22  ;;  %v2718_v30 = vpop.xlane.xlu1 %2717 }
 0xbc5   : > { %v7842_v28 = vpop.eup %5895  ;;  %v2740_v23 = vsub.f32 %v7798_v59, %v2718_v30  ;;  %v2767_v29 = vmul.f32 1.442695, %v2741_v45 }
 0xbc6   : > { %2785 = vadd.xlane.f32.xlu1 %v7842_v28  ;;  %v2716_v31 = vpop.xlane.xlu0 %2715  ;;  %v7845_v5 = vpop.eup %5897 }
 0xbc7   : > { %v2739_v38 = vsub.f32 %v7804_v49, %v2716_v31  ;;  %v2765_v55 = vmul.f32 1.442695, %v2740_v23 }
 0xbc8   : > { %v2862_v10 = vpop.permute.xlu1 %2861 }
 0xbc9   : > { %v7847_v1 = vpop.eup %5899  ;;  %v2763_v8 = vmul.f32 1.442695, %v2739_v38  ;;  %v8858_v38 = vld [vmem:[#allocation23_spill] sm:$0xff] }
 0xbca   : > { %2781 = vadd.xlane.f32.xlu1 %v7845_v5  ;;  %2791 = vadd.xlane.f32.xlu0 %v7847_v1  ;;  %v2728_v40 = vpop.xlane.xlu0 %2727  ;;  %v7851_v24 = vpop.eup %5901 }
 0xbcb   : > { %5907 = vpow2.f32 %v2763_v8  ;;  %v2745_v33 = vsub.f32 %v7810_v41, %v2728_v40 }
 0xbcc   : > { %5909 = vpow2.f32 %v2769_v43 }
 0xbcd   : > { %v7853_v7 = vpop.eup %5903  ;;  %5911 = vpow2.f32 %v2765_v55  ;;  %v2775_v14 = vmul.f32 1.442695, %v2745_v33 }
 0xbce   : > { %2793 = vadd.xlane.f32.xlu0 %v7851_v24  ;;  %2787 = vadd.xlane.f32.xlu1 %v7853_v7  ;;  %v2724_v16 = vpop.xlane.xlu0 %2723  ;;  %v7857_v27 = vpop.eup %5905  ;;  %5913 = vpow2.f32 %v2767_v29 }
 0xbcf   : > { %v2743_v6 = vsub.f32 %v7816_v62, %v2724_v16 }
 0xbd1   : > { %v2771_v59 = vmul.f32 1.442695, %v2743_v6 }
 0xbd2   : > { %2789 = vadd.xlane.f32.xlu0 %v7857_v27  ;;  %v2860_v35 = vpop.permute.xlu0 %2859 }
 0xbd3   : > { %5276 = vmatprep.subr.bf16.mxu0 %v2860_v35 }
 0xbd4   : > { %5277 = vmatpush3.bf16.msra.mxu0 %v2860_v35  ;;  %v8854_v35 = vld [vmem:[#allocation49_spill] sm:$0xff] }
 0xbd5   : > { %5278 = vmatprep.subr.bf16.mxu0 %v2862_v10  ;;  %v7872_v0 = vpop.eup %5907 }
 0xbd6   : > { %v7875_v30 = vpop.eup %5909 }
 0xbd7   : > { %v7877_v62 = vpop.eup %5911 }
 0xbd8   : > { %5279 = vmatpush3.bf16.msra.mxu0 %v2862_v10  ;;  %v7881_v41 = vpop.eup %5913  ;;  %v8855_v10 = vld [vmem:[#allocation22_spill] sm:$0xff] }
 0xbdf   : > { %2865 = vrot.lane.b32.xlu1 %v8852_v3, %s6270_s23  ;;  %v8856_v3 = vpack.i.bf16 %v8854_v35, %v8855_v10 }
 0xbe8   : > { %2863 = vrot.lane.b32.xlu0 %v8853_v9, %s6270_s23  ;;  %v8857_v9 = vld [vmem:[#allocation50_spill] sm:$0xff] }
 0xbe9   : > { %v8859_v26 = vpack.i.bf16 %v8857_v9, %v8858_v38 }
 0xbf9   : > { %v2730_v32 = vpop.xlane.xlu1 %2729 }
 0xbfa   : > { %v2746_v22 = vsub.f32 %v7826_v25, %v2730_v32 }
 0xbfc   : > { %v2777_v37 = vmul.f32 1.442695, %v2746_v22 }
 0xbfd   : > { %v2726_v44 = vpop.xlane.xlu1 %2725 }
 0xbfe   : > { %v2744_v49 = vsub.f32 %v7832_v11, %v2726_v44 }
 0xc00   : > { %v2773_v31 = vmul.f32 1.442695, %v2744_v49 }
 0xc02   : > { %5915 = vpow2.f32 %v2773_v31 }
 0xc03   : > { %2795 = vadd.xlane.f32.xlu1 %v7872_v0  ;;  %5917 = vpow2.f32 %v2771_v59 }
 0xc04   : > { %5919 = vpow2.f32 %v2777_v37 }
 0xc05   : > { %5921 = vpow2.f32 %v2775_v14 }
 0xc07   : > { %2797 = vadd.xlane.f32.xlu0 %v7877_v62  ;;  %2801 = vadd.xlane.f32.xlu1 %v7875_v30 }
 0xc0b   : > { %2799 = vadd.xlane.f32.xlu0 %v7881_v41 }
 0xc0c   : > { %v7884_v25 = vpop.eup %5915 }
 0xc0d   : > { %2805 = vadd.xlane.f32.xlu1 %v7884_v25  ;;  %v7887_v11 = vpop.eup %5917 }
 0xc0e   : > { %v7890_v40 = vpop.eup %5919 }
 0xc0f   : > { %2803 = vadd.xlane.f32.xlu0 %v7887_v11  ;;  %v7893_v16 = vpop.eup %5921 }
 0xc11   : > { %2809 = vadd.xlane.f32.xlu1 %v7890_v40 }
 0xc13   : > { %2807 = vadd.xlane.f32.xlu0 %v7893_v16 }
 0xc22   : > { %5453 = vrot.lane.b32.xlu1 %v8856_v3, %s6270_s23 }
 0xc26   : > { %5458 = vrot.lane.b32.xlu1 %v5457_v36, %s6269_s22 }
 0xc29   : > { %5448 = vrot.lane.b32.xlu0 %v8859_v26, %s6270_s23 }
 0xc2a   : > { %5463 = vrot.lane.b32.xlu1 %v5462_v54, %s6269_s22 }
 0xc4b   : > { %v2784_v23 = vpop.xlane.xlu1 %2783 }
 0xc4f   : > { %v2780_v8 = vpop.xlane.xlu1 %2779 }
 0xc50   : > { %5923 = vrcp.f32 %v2780_v8 }
 0xc53   : > { %v2786_v43 = vpop.xlane.xlu1 %2785 }
 0xc57   : > { %v2782_v45 = vpop.xlane.xlu1 %2781  ;;  %v2792_v55 = vpop.xlane.xlu0 %2791 }
 0xc58   : > { %5925 = vrcp.f32 %v2782_v45 }
 0xc59   : > { %5927 = vrcp.f32 %v2786_v43 }
 0xc5a   : > { %5929 = vrcp.f32 %v2784_v23  ;;  %v5924_v32 = vpop.eup %5923 }
 0xc5b   : > { %v2788_v20 = vpop.xlane.xlu1 %2787  ;;  %v2794_v18 = vpop.xlane.xlu0 %2793  ;;  %v2812_v17 = vmul.f32 %v5924_v32, %v7839_v51 }
 0xc5c   : > { %5931 = vrcp.f32 %v2788_v20 }
 0xc5f   : > { %v2790_v36 = vpop.xlane.xlu0 %2789  ;;  %v2866_v22 = vpop.permute.xlu1 %2865 }
 0xc60   : > { %5933 = vrcp.f32 %v2790_v36 }
 0xc61   : > { %5935 = vrcp.f32 %v2794_v18 }
 0xc62   : > { %v5926_v29 = vpop.eup %5925  ;;  %5937 = vrcp.f32 %v2792_v55 }
 0xc63   : > { %v5928_v6 = vpop.eup %5927  ;;  %v2864_v61 = vpop.permute.xlu0 %2863  ;;  %v2814_v54 = vmul.f32 %v5926_v29, %v7845_v5 }
 0xc64   : > { %5280 = vmatprep.subr.bf16.mxu0 %v2864_v61  ;;  %v5930_v44 = vpop.eup %5929  ;;  %v2818_v33 = vmul.f32 %v5928_v6, %v7842_v28 }
 0xc65   : > { %5281 = vmatpush3.bf16.msra.mxu0 %v2864_v61  ;;  %v2843_v49 = vpack.c.bf16 %v2814_v54, %v2812_v17  ;;  %v2816_v31 = vmul.f32 %v5930_v44, %v7835_v13 }
 0xc66   : > { %5282 = vmatprep.subr.bf16.mxu0 %v2866_v22  ;;  %v5932_v59 = vpop.eup %5931 }
 0xc67   : > { %5284 = vmatprep.mubr.bf16.mxu0 %v2843_v49  ;;  %v2844_v14 = vpack.c.bf16 %v2818_v33, %v2816_v31  ;;  %v2820_v51 = vmul.f32 %v5932_v59, %v7853_v7  ;;  %v5600_v31 = vld [vmem:[%s8674_s5 + $0x28] sm:$0xff]  }
 0xc69   : > { %5283 = vmatpush3.bf16.msra.mxu0 %v2866_v22 }
 0xc6a   : > { %v5934_v37 = vpop.eup %5933 }
 0xc6b   : > { %v5936_v35 = vpop.eup %5935  ;;  %v2822_v5 = vmul.f32 %v5934_v37, %v7857_v27  ;;  %v5601_v37 = vld [vmem:[%s8674_s5 + $0x30] sm:$0xff]  }
 0xc6c   : > { %5285 = vmatmul.mubr.bf16.vlgmr.msra.gmra.mrb[80].mxu0 %v2844_v14  ;;  %v5938_v10 = vpop.eup %5937  ;;  %v2826_v9 = vmul.f32 %v5936_v35, %v7851_v24  ;;  %v5602_v14 = vld [vmem:[%s8674_s5 + $0x38] sm:$0xff]  }
 0xc6d   : > { %v2845_v3 = vpack.c.bf16 %v2822_v5, %v2820_v51  ;;  %v2824_v28 = vmul.f32 %v5938_v10, %v7847_v1 }
 0xc6f   : > { %5288 = vmatprep.mubr.bf16.mxu0 %v2845_v3  ;;  %v2846_v38 = vpack.c.bf16 %v2826_v9, %v2824_v28 }
 0xc74   : > { %5289 = vmatmul.mubr.bf16.gmra.mrb[84].mxu0 %v2846_v38  ;;  %v8860_v38 = vld [vmem:[#allocation53_spill] sm:$0xff] }
 0xc90   : > { %v2796_v26 = vpop.xlane.xlu1 %2795 }
 0xc91   : > { %5939 = vrcp.f32 %v2796_v26  ;;  %v8861_v26 = vld [vmem:[#allocation51_spill] sm:$0xff] }
 0xc94   : > { %v2802_v13 = vpop.xlane.xlu1 %2801  ;;  %v2798_v23 = vpop.xlane.xlu0 %2797 }
 0xc95   : > { %5941 = vrcp.f32 %v2798_v23 }
 0xc96   : > { %5943 = vrcp.f32 %v2802_v13  ;;  %v8862_v13 = vpack.i.bf16 %v8860_v38, %v8861_v26 }
 0xc98   : > { %v2800_v8 = vpop.xlane.xlu0 %2799 }
 0xc99   : > { %5945 = vrcp.f32 %v2800_v8  ;;  %v8863_v8 = vld [vmem:[#allocation54_spill] sm:$0xff] }
 0xc9a   : > { %v2806_v7 = vpop.xlane.xlu1 %2805 }
 0xc9b   : > { %5947 = vrcp.f32 %v2806_v7  ;;  %v5940_v43 = vpop.eup %5939  ;;  %v8864_v7 = vld [vmem:[#allocation52_spill] sm:$0xff] }
 0xc9c   : > { %v2804_v27 = vpop.xlane.xlu0 %2803  ;;  %v2828_v20 = vmul.f32 %v5940_v43, %v7872_v0 }
 0xc9d   : > { %5949 = vrcp.f32 %v2804_v27  ;;  %v8865_v27 = vpack.i.bf16 %v8863_v8, %v8864_v7 }
 0xc9e   : > { %v2810_v45 = vpop.xlane.xlu1 %2809 }
 0xc9f   : > { %5951 = vrcp.f32 %v2810_v45  ;;  %v5942_v24 = vpop.eup %5941 }
 0xca0   : > { %v2808_v55 = vpop.xlane.xlu0 %2807  ;;  %v5944_v1 = vpop.eup %5943  ;;  %v2830_v18 = vmul.f32 %v5942_v24, %v7877_v62 }
 0xca1   : > { %5953 = vrcp.f32 %v2808_v55  ;;  %v2834_v6 = vmul.f32 %v5944_v1, %v7875_v30  ;;  %v5595_v30 = vld [vmem:[%s8674_s5] sm:$0xff]   ;;  %v8866_v1 = vld [vmem:[#allocation57_spill] sm:$0xff] }
 0xca2   : > { %v2847_v32 = vpack.c.bf16 %v2830_v18, %v2828_v20  ;;  %5300 = vmatprep.subr.bf16.mxu0 %v5595_v30  ;;  %v8867_v20 = vld [vmem:[#allocation55_spill] sm:$0xff] }
 0xca3   : > { %v5946_v36 = vpop.eup %5945  ;;  %5301 = vmatpush3.bf16.msra.mxu0 %v5595_v30  ;;  %v8868_v18 = vpack.i.bf16 %v8866_v1, %v8867_v20 }
 0xca4   : > { %v2832_v29 = vmul.f32 %v5946_v36, %v7881_v41  ;;  %5292 = vmatprep.mubr.bf16.mxu0 %v2847_v32  ;;  %v8869_v36 = vld [vmem:[#allocation58_spill] sm:$0xff]  ;;  %v8870_v32 = vld [vmem:[#allocation56_spill] sm:$0xff] }
 0xca5   : > { %v5948_v61 = vpop.eup %5947 }
 0xca6   : > { %v2848_v17 = vpack.c.bf16 %v2834_v6, %v2832_v29  ;;  %v2838_v22 = vmul.f32 %v5948_v61, %v7884_v25  ;;  %v5597_v25 = vld [vmem:[%s8674_s5 + $0x10] sm:$0xff]   ;;  %v8871_v29 = vpack.i.bf16 %v8869_v36, %v8870_v32  ;;  %v8872_v61 = vld [vmem:[#allocation61_spill] sm:$0xff] }
 0xca7   : > { %v5950_v54 = vpop.eup %5949  ;;  %v8874_v47 = vpack.i.bf16 %v8872_v61, %v8873_v15 }
 0xca8   : > { %5293 = vmatmul.mubr.bf16.gmra.mrb[88].mxu0 %v2848_v17  ;;  %v2836_v44 = vmul.f32 %v5950_v54, %v7887_v11  ;;  %v5596_v11 = vld [vmem:[%s8674_s5 + $0x8] sm:$0xff]  }
 0xca9   : > { %v5952_v49 = vpop.eup %5951  ;;  %5302 = vmatprep.subr.bf16.mxu0 %v5596_v11 }
 0xcaa   : > { %v2849_v33 = vpack.c.bf16 %v2838_v22, %v2836_v44  ;;  %v2842_v59 = vmul.f32 %v5952_v49, %v7890_v40  ;;  %5303 = vmatpush3.bf16.msra.mxu0 %v5596_v11  ;;  %v5598_v40 = vld [vmem:[%s8674_s5 + $0x18] sm:$0xff]   ;;  %v5454_v49 = vpop.permute.xlu1 %5453 }
 0xcab   : > { %v5954_v0 = vpop.eup %5953  ;;  %5304 = vmatprep.subr.bf16.mxu0 %v5597_v25  ;;  %v5456_v30 = vunpack.i.h.bf16 %v5454_v49  ;;  %v5455_v11 = vunpack.i.l.bf16 %v5454_v49 }
 0xcac   : > { %5296 = vmatprep.mubr.bf16.mxu0 %v2849_v33  ;;  %v2840_v62 = vmul.f32 %v5954_v0, %v7893_v16  ;;  %v5599_v16 = vld [vmem:[%s8674_s5 + $0x20] sm:$0xff]   ;;  %v5449_v0 = vpop.permute.xlu0 %5448 }
 0xcae   : > { %v2850_v41 = vpack.c.bf16 %v2842_v59, %v2840_v62  ;;  %5305 = vmatpush3.bf16.msra.mxu0 %v5597_v25  ;;  %v5459_v33 = vpop.permute.xlu1 %5458  ;;  %v5451_v59 = vunpack.i.h.bf16 %v5449_v0 }
 0xcaf   : > { %5306 = vmatprep.subr.bf16.mxu0 %v5598_v40  ;;  %v5461_v58 = vunpack.i.h.bf16 %v5459_v33 }
 0xcb0   : > { %5297 = vmatmul.mubr.bf16.gmra.mrb[92].mxu0 %v2850_v41  ;;  %v5450_v41 = vunpack.i.l.bf16 %v5449_v0 }
 0xcb2   : > { %5307 = vmatpush3.bf16.msra.mxu0 %v5598_v40  ;;  %v5464_v62 = vpop.permute.xlu1 %5463  ;;  %v8878_v40 = vld [vmem:[#allocation36_spill] sm:$0xff] }
 0xcb3   : > { %5308 = vmatprep.subr.bf16.mxu0 %v5599_v16  ;;  %v5466_v25 = vunpack.i.h.bf16 %v5464_v62  ;;  %v5465_v50 = vunpack.i.l.bf16 %v5464_v62  ;;  %v3165_v52 = vsel %vm798_vm0, %v8878_v40, %v5451_v59 }
 0xcb6   : > { %5309 = vmatpush3.bf16.msra.mxu0 %v5599_v16 }
 0xcb7   : > { %5310 = vmatprep.subr.bf16.mxu0 %v5600_v31 }
 0xcba   : > { %5311 = vmatpush3.bf16.msra.mxu0 %v5600_v31  ;;  %v8880_v31 = vld [vmem:[#allocation35_spill] sm:$0xff] }
 0xcbb   : > { %5312 = vmatprep.subr.bf16.mxu0 %v5601_v37 }
 0xcbe   : > { %5313 = vmatpush3.bf16.msra.mxu0 %v5601_v37  ;;  %v3167_v37 = vsel %vm798_vm0, %v8880_v31, %v5456_v30 }
 0xcbf   : > { %5314 = vmatprep.subr.bf16.mxu0 %v5602_v14 }
 0xcc2   : > { %5315 = vmatpush3.bf16.msra.mxu0 %v5602_v14  ;;  %v8881_v14 = vld [vmem:[#allocation33_spill] sm:$0xff] }
 0xd3f   : > { %v5286_v35 = vpop.f32.mrb[80].mxu0 }
 0xd40   : > { %v2909_v51 = vpop.f32.mrb[81].mxu0 }
 0xd41   : > { %v5287_v5 = vpop.f32.mrb[82].mxu0 }
 0xd42   : > { %v5472_v10 = vpack.i.bf16 %v5287_v5, %v5286_v35  ;;  %v2912_v3 = vpop.f32.mrb[83].mxu0  ;;  %v3166_v35 = vsel %vm798_vm0, %v8881_v14, %v5455_v11 }
 0xd43   : > { %v5467_v9 = vpack.i.bf16 %v2912_v3, %v2909_v51  ;;  %v3183_v3 = vsel %vm3180_vm3, %v3166_v35, %v5465_v50 }
 0xd44   : > { %5473 = vrot.lane.b32.xlu1 %v5472_v10, %s6268_s17 }
 0xd45   : > { %5468 = vrot.lane.b32.xlu0 %v5467_v9, %s6268_s17  ;;  %v3184_v9 = vsel %vm3180_vm3, %v3167_v37, %v5466_v25 }
 0xd47   : > { %v5290_v28 = vpop.f32.mrb[84].mxu0 }
 0xd48   : > { %5483 = vrot.lane.b32.xlu1 %v8862_v13, %s6270_s23  ;;  %v2925_v23 = vpop.f32.mrb[85].mxu0  ;;  %v3182_v13 = vsel %vm3180_vm3, %v3165_v52, %v5461_v58 }
 0xd49   : > { %5478 = vrot.lane.b32.xlu0 %v8865_v27, %s6270_s23  ;;  %v5291_v43 = vpop.f32.mrb[86].mxu0 }
 0xd4a   : > { %v5502_v45 = vpack.i.bf16 %v5291_v43, %v5290_v28  ;;  %v2928_v24 = vpop.f32.mrb[87].mxu0 }
 0xd4b   : > { %v5497_v55 = vpack.i.bf16 %v2928_v24, %v2925_v23 }
 0xd4c   : > { %5493 = vrot.lane.b32.xlu1 %v5492_v46, %s6269_s22 }
 0xd4d   : > { %5488 = vrot.lane.b32.xlu0 %v5487_v57, %s6269_s22 }
 0xd50   : > { %5503 = vrot.lane.b32.xlu1 %v5502_v45, %s6268_s17 }
 0xd51   : > { %5498 = vrot.lane.b32.xlu0 %v5497_v55, %s6268_s17 }
 0xd54   : > { %5513 = vrot.lane.b32.xlu1 %v8868_v18, %s6270_s23 }
 0xd55   : > { %5508 = vrot.lane.b32.xlu0 %v8871_v29, %s6270_s23 }
 0xd58   : > { %5523 = vrot.lane.b32.xlu1 %v5522_v12, %s6269_s22 }
 0xd59   : > { %5518 = vrot.lane.b32.xlu0 %v5517_v48, %s6269_s22  ;;  %v8877_v48 = vpack.i.bf16 %v8875_v63, %v8876_v56  ;;  %v8885_v63 = vld [vmem:[#allocation38_spill] sm:$0xff] }
 0xd7b   : > { %v5294_v2 = vpop.f32.mrb[88].mxu0 }
 0xd7c   : > { %v2941_v34 = vpop.f32.mrb[89].mxu0 }
 0xd7d   : > { %v5295_v42 = vpop.f32.mrb[90].mxu0 }
 0xd7e   : > { %v5532_v46 = vpack.i.bf16 %v5295_v42, %v5294_v2  ;;  %v2944_v53 = vpop.f32.mrb[91].mxu0 }
 0xd7f   : > { %v5527_v57 = vpack.i.bf16 %v2944_v53, %v2941_v34  ;;  %v8882_v53 = vld [vmem:[#allocation39_spill] sm:$0xff] }
 0xd80   : > { %5533 = vrot.lane.b32.xlu1 %v5532_v46, %s6268_s17 }
 0xd81   : > { %5528 = vrot.lane.b32.xlu0 %v5527_v57, %s6268_s17 }
 0xd83   : > { %v5298_v6 = vpop.f32.mrb[92].mxu0 }
 0xd84   : > { %5543 = vrot.lane.b32.xlu1 %v8874_v47, %s6270_s23  ;;  %v2957_v12 = vpop.f32.mrb[93].mxu0  ;;  %v8884_v47 = vld [vmem:[#allocation40_spill] sm:$0xff] }
 0xd85   : > { %5538 = vrot.lane.b32.xlu0 %v8877_v48, %s6270_s23  ;;  %v5299_v17 = vpop.f32.mrb[94].mxu0 }
 0xd86   : > { %v5562_v54 = vpack.i.bf16 %v5299_v17, %v5298_v6  ;;  %v2960_v44 = vpop.f32.mrb[95].mxu0  ;;  %v8883_v6 = vld [vmem:[#allocation37_spill] sm:$0xff] }
 0xd87   : > { %v5557_v22 = vpack.i.bf16 %v2960_v44, %v2957_v12 }
 0xd88   : > { %5553 = vrot.lane.b32.xlu1 %v5552_v60, %s6269_s22  ;;  %v5460_v60 = vunpack.i.l.bf16 %v5459_v33 }
 0xd89   : > { %5548 = vrot.lane.b32.xlu0 %v5547_v4, %s6269_s22  ;;  %v3164_v4 = vsel %vm798_vm0, %v8879_v19, %v5450_v41  ;;  %s8571_s22 = scalar_lea.vmem [#allocation7], %s4607_s28  ;;  %s4775_s28 = sshll.u32 %s6355_s21, 11 }
 0xd8a   : > { %v3181_v26 = vsel %vm3180_vm3, %v3164_v4, %v5460_v60  ;;  %s4516_s23 = sshll.u32 %s8571_s22, 4  ;;  %s8620_s12 = scalar_lea.hbm %s8901_s30, %s4775_s28  ;;  %s8622_s23 = int_to_ptr.vmem [resolvable:$true] %s4516_s23 }
 0xd8b   : > { %s4503_s21 = scalar_lea.sflag [#allocation4], %s6473_s26  ;;  %s6189_s13 = scalar_lea.vmem %s8622_s23, 2048 }
 0xd8c   : > { %5563 = vrot.lane.b32.xlu1 %v5562_v54, %s6268_s17  ;;  %p6190_p4 = scmp.ne.s32.totalorder %s8622_s23, %s6189_s13  ;;  %p6196_p10 = scmp.lt.s32.totalorder %s8622_s23, %s6194_s24 }
 0xd8d   : > { %5558 = vrot.lane.b32.xlu0 %v5557_v22, %s6268_s17  ;;  %p6197_p13 = scmp.lt.s32.totalorder %s6195_s15, %s6189_s13 }
 0xd8e   : > { %p6191_p6 = pnand %p6190_p4, %p6425_p12 }
 0xd8f   : > { %p6198_p3 = por %p6197_p13, %p6196_p10 }
 0xd90   : > { %p6192_p8 = pneg %p6191_p6 }
 0xd92   : > { %p6199_p7 = pnand %p6198_p3, %p6192_p8 }
 0xdb6   : > { %v5474_v16 = vpop.permute.xlu1 %5473 }
 0xdb7   : > { %v5476_v51 = vunpack.i.h.bf16 %v5474_v16  ;;  %v5475_v5 = vunpack.i.l.bf16 %v5474_v16  ;;  %v5469_v10 = vpop.permute.xlu0 %5468 }
 0xdb8   : > { %v5471_v28 = vunpack.i.h.bf16 %v5469_v10  ;;  %v5470_v38 = vunpack.i.l.bf16 %v5469_v10 }
 0xdb9   : > { %v3201_v23 = vsel %vm3197_vm4, %v3184_v9, %v5476_v51  ;;  %v3200_v8 = vsel %vm3197_vm4, %v3183_v3, %v5475_v5  ;;  %v8886_v5 = vld [vmem:[#allocation43_spill] sm:$0xff]  ;;  %v8887_v3 = vld [vmem:[#allocation41_spill] sm:$0xff] }
 0xdba   : > { %v3215_v7 = vpack.c.bf16 %v3201_v23, %v3200_v8  ;;  %v5484_v27 = vpop.permute.xlu1 %5483  ;;  %v3198_v43 = vsel %vm3197_vm4, %v3181_v26, %v5470_v38  ;;  %v3199_v45 = vsel %vm3197_vm4, %v3182_v13, %v5471_v28  ;;  %v8888_v38 = vld [vmem:[#allocation44_spill] sm:$0xff]  ;;  %v8889_v13 = vld [vmem:[#allocation42_spill] sm:$0xff] }
 0xdbb   : > { %v5479_v24 = vpop.permute.xlu0 %5478  ;;  %v3214_v55 = vpack.c.bf16 %v3199_v45, %v3198_v43  ;;  %v5486_v1 = vunpack.i.h.bf16 %v5484_v27  ;;  %v5485_v20 = vunpack.i.l.bf16 %v5484_v27 }
 0xdbc   : > { %v5481_v36 = vunpack.i.h.bf16 %v5479_v24  ;;  %v5480_v32 = vunpack.i.l.bf16 %v5479_v24 }
 0xdbd   : > { %5316 = vmatprep.mubr.bf16.mxu0 %v3214_v55  ;;  %v3171_v57 = vsel %vm798_vm0, %v8882_v53, %v5486_v1  ;;  %v3170_v61 = vsel %vm798_vm0, %v8883_v6, %v5485_v20 }
 0xdbe   : > { %v5494_v18 = vpop.permute.xlu1 %5493  ;;  %5317 = vmatmul.mubr.bf16.vlgmr.msra.gmra.mrb[96].mxu0 %v3215_v7  ;;  %v3169_v12 = vsel %vm798_vm0, %v8884_v47, %v5481_v36  ;;  %v3168_v56 = vsel %vm798_vm0, %v8885_v63, %v5480_v32 }
 0xdbf   : > { %v5489_v29 = vpop.permute.xlu0 %5488  ;;  %v5496_v2 = vunpack.i.h.bf16 %v5494_v18  ;;  %v5495_v34 = vunpack.i.l.bf16 %v5494_v18 }
 0xdc0   : > { %v5491_v42 = vunpack.i.h.bf16 %v5489_v29  ;;  %v5490_v46 = vunpack.i.l.bf16 %v5489_v29 }
 0xdc1   : > { %v3187_v44 = vsel %vm3180_vm3, %v3170_v61, %v5495_v34  ;;  %v3188_v22 = vsel %vm3180_vm3, %v3171_v57, %v5496_v2 }
 0xdc2   : > { %v5504_v15 = vpop.permute.xlu1 %5503  ;;  %v3185_v0 = vsel %vm3180_vm3, %v3168_v56, %v5490_v46  ;;  %v3186_v62 = vsel %vm3180_vm3, %v3169_v12, %v5491_v42 }
 0xdc3   : > { %v5506_v48 = vunpack.i.h.bf16 %v5504_v15  ;;  %v5505_v17 = vunpack.i.l.bf16 %v5504_v15  ;;  %v5499_v54 = vpop.permute.xlu0 %5498 }
 0xdc4   : > { %v5501_v49 = vunpack.i.h.bf16 %v5499_v54  ;;  %v5500_v33 = vunpack.i.l.bf16 %v5499_v54 }
 0xdc5   : > { %v3204_v59 = vsel %vm3197_vm4, %v3187_v44, %v5505_v17  ;;  %v3205_v41 = vsel %vm3197_vm4, %v3188_v22, %v5506_v48  ;;  %v8890_v17 = vld [vmem:[#allocation47_spill] sm:$0xff]  ;;  %v8891_v44 = vld [vmem:[#allocation45_spill] sm:$0xff] }
 0xdc6   : > { %v3202_v30 = vsel %vm3197_vm4, %v3185_v0, %v5500_v33  ;;  %v3203_v11 = vsel %vm3197_vm4, %v3186_v62, %v5501_v49  ;;  %v3217_v25 = vpack.c.bf16 %v3205_v41, %v3204_v59  ;;  %v5514_v58 = vpop.permute.xlu1 %5513  ;;  %v8892_v33 = vld [vmem:[#allocation48_spill] sm:$0xff]  ;;  %v8893_v62 = vld [vmem:[#allocation46_spill] sm:$0xff] }
 0xdc7   : > { %v3216_v50 = vpack.c.bf16 %v3203_v11, %v3202_v30  ;;  %v5509_v60 = vpop.permute.xlu0 %5508  ;;  %v5516_v52 = vunpack.i.h.bf16 %v5514_v58  ;;  %v5515_v19 = vunpack.i.l.bf16 %v5514_v58 }
 0xdc8   : > { %v5511_v16 = vunpack.i.h.bf16 %v5509_v60  ;;  %v5510_v31 = vunpack.i.l.bf16 %v5509_v60 }
 0xdc9   : > { %5320 = vmatprep.mubr.bf16.mxu0 %v3216_v50  ;;  %v3175_v10 = vsel %vm798_vm0, %v8886_v5, %v5516_v52  ;;  %v3174_v9 = vsel %vm798_vm0, %v8887_v3, %v5515_v19  ;;  %v5606_v5 = vld [vmem:[#allocation5 + $0x8] ss:$16 sps:$4 sm:$0xff]   ;;  %v5611_v3 = vld [vmem:[#allocation5 + $0x24] ss:$16 sps:$4 sm:$0xff]  }
 0xdca   : > { %5321 = vmatmul.mubr.bf16.gmra.mrb[100].mxu0 %v3217_v25  ;;  %v5524_v40 = vpop.permute.xlu1 %5523  ;;  %v3173_v26 = vsel %vm798_vm0, %v8888_v38, %v5511_v16  ;;  %v3172_v23 = vsel %vm798_vm0, %v8889_v13, %v5510_v31  ;;  %v5612_v38 = vld [vmem:[#allocation5 + $0x28] ss:$16 sps:$4 sm:$0xff]   ;;  %v5620_v13 = vld [vmem:[#allocation5 + $0x4c] ss:$16 sps:$4 sm:$0xff]  }
 0xdcb   : > { %v5519_v4 = vpop.permute.xlu0 %5518  ;;  %v5526_v37 = vunpack.i.h.bf16 %v5524_v40  ;;  %v5525_v14 = vunpack.i.l.bf16 %v5524_v40 }
 0xdcc   : > { %v5521_v35 = vunpack.i.h.bf16 %v5519_v4  ;;  %v5520_v51 = vunpack.i.l.bf16 %v5519_v4 }
 0xdcd   : > { %v3191_v43 = vsel %vm3180_vm3, %v3174_v9, %v5525_v14  ;;  %v3192_v45 = vsel %vm3180_vm3, %v3175_v10, %v5526_v37  ;;  %v5608_v10 = vld [vmem:[#allocation5 + $0xc] ss:$16 sps:$4 sm:$0xff]  }
 0xdce   : > { %v3189_v1 = vsel %vm3180_vm3, %v3172_v23, %v5520_v51  ;;  %v3190_v20 = vsel %vm3180_vm3, %v3173_v26, %v5521_v35  ;;  %v5603_v35 = vld [vmem:[#allocation5] ss:$16 sps:$4 sm:$0xff]   ;;  %v5605_v51 = vld [vmem:[#allocation5 + $0x4] ss:$16 sps:$4 sm:$0xff]   ;;  %v5614_v9 = vld [vmem:[#allocation5 + $0x2c] ss:$16 sps:$4 sm:$0xff]   ;;  %3853 = vmatprep.subr.bf16.mxu0 %v5608_v10 }
 0xdcf   : > { %3740 = vmatprep.subr.bf16.mxu1 %v5605_v51  ;;  %3854 = vmatpush1.bf16.msra.mxu0 %v5606_v5  ;;  %v5617_v26 = vld [vmem:[#allocation5 + $0x44] ss:$16 sps:$4 sm:$0xff]   ;;  %v5615_v23 = vld [vmem:[#allocation5 + $0x40] ss:$16 sps:$4 sm:$0xff]   ;;  %v5648_v51 = vld [vmem:[#allocation5 + $0xe8] ss:$16 sps:$4 sm:$0xff]  }
 0xdd0   : > { %3741 = vmatpush1.bf16.msra.mxu1 %v5603_v35  ;;  %3855 = vmatprep.subr.bf16.mxu0 %v5614_v9  ;;  %v5645_v35 = vld [vmem:[#allocation5 + $0xe0] ss:$16 sps:$4 sm:$0xff]  }
 0xdd1   : > { %3742 = vmatprep.subr.bf16.mxu1 %v5611_v3  ;;  %v6123_v3 = vld [vmem:[%s6479_s27 + $0x40] sm:$0xff] }
 0xdd3   : > { %3856 = vmatpush1.bf16.msra.mxu0 %v5612_v38 }
 0xdd4   : > { %3857 = vmatprep.subr.bf16.mxu0 %v5620_v13 }
 0xdf2   : > { %v5534_v28 = vpop.permute.xlu1 %5533 }
 0xdf3   : > { %v5536_v8 = vunpack.i.h.bf16 %v5534_v28  ;;  %v5535_v7 = vunpack.i.l.bf16 %v5534_v28  ;;  %v5529_v27 = vpop.permute.xlu0 %5528  ;;  %v5609_v28 = vld [vmem:[#allocation5 + $0x20] ss:$16 sps:$4 sm:$0xff]  }
 0xdf4   : > { %v5531_v24 = vunpack.i.h.bf16 %v5529_v27  ;;  %v5530_v55 = vunpack.i.l.bf16 %v5529_v27  ;;  %3743 = vmatpush1.bf16.msra.mxu1 %v5609_v28 }
 0xdf5   : > { %v3208_v18 = vsel %vm3197_vm4, %v3191_v43, %v5535_v7  ;;  %v3209_v36 = vsel %vm3197_vm4, %v3192_v45, %v5536_v8  ;;  %3744 = vmatprep.subr.bf16.mxu1 %v5617_v26  ;;  %v5618_v8 = vld [vmem:[#allocation5 + $0x48] ss:$16 sps:$4 sm:$0xff]   ;;  %v6115_v43 = vld [vmem:[%s6479_s27] sm:$0xff]  ;;  %v6124_v26 = vld [vmem:[%s6479_s27 + $0x50] sm:$0xff] }
 0xdf6   : > { %v5544_v32 = vpop.permute.xlu1 %5543  ;;  %v3206_v29 = vsel %vm3197_vm4, %v3189_v1, %v5530_v55  ;;  %v3207_v2 = vsel %vm3197_vm4, %v3190_v20, %v5531_v24  ;;  %v3219_v34 = vpack.c.bf16 %v3209_v36, %v3208_v18  ;;  %3858 = vmatpush1.bf16.msra.mxu0 %v5618_v8  ;;  %v6116_v1 = vld [vmem:[%s6479_s27 + $0x10] sm:$0xff]  ;;  %v6117_v18 = vld [vmem:[%s6479_s27 + $0x8] sm:$0xff] }
 0xdf7   : > { %v5539_v42 = vpop.permute.xlu0 %5538  ;;  %v3218_v46 = vpack.c.bf16 %v3207_v2, %v3206_v29  ;;  %v5546_v53 = vunpack.i.h.bf16 %v5544_v32  ;;  %v5545_v57 = vunpack.i.l.bf16 %v5544_v32  ;;  %v6118_v2 = vld [vmem:[%s6479_s27 + $0x18] sm:$0xff] }
 0xdf8   : > { %v5541_v61 = vunpack.i.h.bf16 %v5539_v42  ;;  %v5540_v15 = vunpack.i.l.bf16 %v5539_v42  ;;  %3745 = vmatpush1.bf16.msra.mxu1 %v5615_v23  ;;  %v6125_v23 = vld [vmem:[%s6479_s27 + $0x48] sm:$0xff] }
 0xdf9   : > { %5324 = vmatprep.mubr.bf16.mxu0 %v3218_v46  ;;  %v3179_v54 = vsel %vm798_vm0, %v8890_v17, %v5546_v53  ;;  %v3178_v22 = vsel %vm798_vm0, %v8891_v44, %v5545_v57 }
 0xdfa   : > { %v5554_v6 = vpop.permute.xlu1 %5553  ;;  %5325 = vmatmul.mubr.bf16.gmra.mrb[104].mxu0 %v3219_v34  ;;  %v3177_v0 = vsel %vm798_vm0, %v8892_v33, %v5541_v61  ;;  %v3176_v59 = vsel %vm798_vm0, %v8893_v62, %v5540_v15  ;;  %v5623_v33 = vld [vmem:[#allocation5 + $0x64] ss:$16 sps:$4 sm:$0xff]   ;;  %v5621_v62 = vld [vmem:[#allocation5 + $0x60] ss:$16 sps:$4 sm:$0xff]  }
 0xdfb   : > { %v5549_v47 = vpop.permute.xlu0 %5548  ;;  %v5556_v12 = vunpack.i.h.bf16 %v5554_v6  ;;  %v5555_v63 = vunpack.i.l.bf16 %v5554_v6  ;;  %v6119_v6 = vld [vmem:[%s6479_s27 + $0x20] sm:$0xff]  ;;  %3746 = vmatprep.subr.bf16.mxu1 %v5623_v33 }
 0xdfc   : > { %v5551_v56 = vunpack.i.h.bf16 %v5549_v47  ;;  %v5550_v48 = vunpack.i.l.bf16 %v5549_v47  ;;  %3747 = vmatpush1.bf16.msra.mxu1 %v5621_v62 }
 0xdfd   : > { %v3195_v25 = vsel %vm3180_vm3, %v3178_v22, %v5555_v63  ;;  %v3196_v50 = vsel %vm3180_vm3, %v3179_v54, %v5556_v12  ;;  %v6120_v12 = vld [vmem:[%s6479_s27 + $0x30] sm:$0xff]  ;;  %v6122_v54 = vld [vmem:[%s6479_s27 + $0x38] sm:$0xff] }
 0xdfe   : > { %v5564_v49 = vpop.permute.xlu1 %5563  ;;  %v3193_v40 = vsel %vm3180_vm3, %v3176_v59, %v5550_v48  ;;  %v3194_v52 = vsel %vm3180_vm3, %v3177_v0, %v5551_v56  ;;  %v6121_v56 = vld [vmem:[%s6479_s27 + $0x28] sm:$0xff] }
 0xdff   : > { %v5566_v41 = vunpack.i.h.bf16 %v5564_v49  ;;  %v5565_v30 = vunpack.i.l.bf16 %v5564_v49  ;;  %v5559_v11 = vpop.permute.xlu0 %5558  ;;  %v5626_v0 = vld [vmem:[#allocation5 + $0x6c] ss:$16 sps:$4 sm:$0xff]   ;;  %v5624_v59 = vld [vmem:[#allocation5 + $0x68] ss:$16 sps:$4 sm:$0xff]  }
 0xe00   : > { %v5561_v58 = vunpack.i.h.bf16 %v5559_v11  ;;  %v5560_v60 = vunpack.i.l.bf16 %v5559_v11  ;;  %3859 = vmatprep.subr.bf16.mxu0 %v5626_v0  ;;  %v5632_v11 = vld [vmem:[#allocation5 + $0x8c] ss:$16 sps:$4 sm:$0xff]  }
 0xe01   : > { %v3212_v19 = vsel %vm3197_vm4, %v3195_v25, %v5565_v30  ;;  %v3213_v4 = vsel %vm3197_vm4, %v3196_v50, %v5566_v41  ;;  %3860 = vmatpush1.bf16.msra.mxu0 %v5624_v59  ;;  %v5629_v30 = vld [vmem:[#allocation5 + $0x84] ss:$16 sps:$4 sm:$0xff]   ;;  %v5627_v25 = vld [vmem:[#allocation5 + $0x80] ss:$16 sps:$4 sm:$0xff]   ;;  %v5630_v50 = vld [vmem:[#allocation5 + $0x88] ss:$16 sps:$4 sm:$0xff]  }
 0xe02   : > { %v3210_v16 = vsel %vm3197_vm4, %v3193_v40, %v5560_v60  ;;  %v3211_v31 = vsel %vm3197_vm4, %v3194_v52, %v5561_v58  ;;  %v3221_v37 = vpack.c.bf16 %v3213_v4, %v3212_v19  ;;  %3748 = vmatprep.subr.bf16.mxu1 %v5629_v30  ;;  %3861 = vmatprep.subr.bf16.mxu0 %v5632_v11  ;;  %v5635_v58 = vld [vmem:[#allocation5 + $0xa4] ss:$16 sps:$4 sm:$0xff]   ;;  %v5638_v60 = vld [vmem:[#allocation5 + $0xac] ss:$16 sps:$4 sm:$0xff]   ;;  %v5633_v40 = vld [vmem:[#allocation5 + $0xa0] ss:$16 sps:$4 sm:$0xff]  }
 0xe03   : > { %v3220_v14 = vpack.c.bf16 %v3211_v31, %v3210_v16  ;;  %3749 = vmatpush1.bf16.msra.mxu1 %v5627_v25  ;;  %v5636_v52 = vld [vmem:[#allocation5 + $0xa8] ss:$16 sps:$4 sm:$0xff]   ;;  %v5641_v19 = vld [vmem:[#allocation5 + $0xc4] ss:$16 sps:$4 sm:$0xff]   ;;  %v5644_v4 = vld [vmem:[#allocation5 + $0xcc] ss:$16 sps:$4 sm:$0xff]  }
 0xe04   : > { %3750 = vmatprep.subr.bf16.mxu1 %v5635_v58  ;;  %v5639_v16 = vld [vmem:[#allocation5 + $0xc0] ss:$16 sps:$4 sm:$0xff]   ;;  %v5642_v31 = vld [vmem:[#allocation5 + $0xc8] ss:$16 sps:$4 sm:$0xff]  }
 0xe05   : > { %5328 = vmatprep.mubr.bf16.mxu0 %v3220_v14  ;;  %3862 = vmatpush1.bf16.msra.mxu0 %v5630_v50  ;;  %v5650_v14 = vld [vmem:[#allocation5 + $0xec] ss:$16 sps:$4 sm:$0xff]  }
 0xe06   : > { %5329 = vmatmul.mubr.bf16.gmra.mrb[108].mxu0 %v3221_v37  ;;  %3863 = vmatprep.subr.bf16.mxu0 %v5638_v60  ;;  %v5647_v37 = vld [vmem:[#allocation5 + $0xe4] ss:$16 sps:$4 sm:$0xff]  }
 0xe07   : > { %3885 = vmatprep.mubr.bf16.mxu0 %v8844_v21  ;;  %3751 = vmatpush1.bf16.msra.mxu1 %v5633_v40 }
 0xe08   : > { %3752 = vmatprep.subr.bf16.mxu1 %v5641_v19 }
 0xe09   : > { %3864 = vmatpush1.bf16.msra.mxu0 %v5636_v52 }
 0xe0a   : > { %3865 = vmatprep.subr.bf16.mxu0 %v5644_v4  ;;  %v8157_v4 = vld [vmem:[%s8675_s6] ss:$0 sm:$0xff] }
 0xe0b   : > { %3753 = vmatpush1.bf16.msra.mxu1 %v5639_v16 }
 0xe0c   : > { %3754 = vmatprep.subr.bf16.mxu1 %v5647_v37 }
 0xe0d   : > { %3866 = vmatpush1.bf16.msra.mxu0 %v5642_v31 }
 0xe0e   : > { %3867 = vmatprep.subr.bf16.mxu0 %v5650_v14 }
 0xe0f   : > { %3755 = vmatpush1.bf16.msra.mxu1 %v5645_v35 }
 0xe11   : > { %3868 = vmatpush1.bf16.msra.mxu0 %v5648_v51 }
 0xe91   : > { %v5318_v7 = vpop.f32.mrb[96].mxu0 }
 0xe92   : > { %v3320_v27 = vpop.f32.mrb[97].mxu0  ;;  %v8077_v20 = vadd.f32 %v6116_v1, %v5318_v7 }
 0xe93   : > { %v8074_v45 = vadd.f32 %v6115_v43, %v3320_v27  ;;  %v5319_v24 = vpop.f32.mrb[98].mxu0  ;;  %v6126_v27 = vld [vmem:[%s6479_s27 + $0x58] sm:$0xff] }
 0xe94   : > { %v3323_v55 = vpop.f32.mrb[99].mxu0  ;;  %v8087_v34 = vadd.f32 %v6118_v2, %v5319_v24  ;;  %v3401_v42 = vmul.f32 %v8077_v20, %v8077_v20 }
 0xe95   : > { %v8080_v36 = vadd.f32 %v6117_v18, %v3323_v55  ;;  %v3399_v32 = vmul.f32 %v8074_v45, %v8074_v45 }
 0xe96   : > { %v3402_v53 = vmul.f32 %v8087_v34, %v8087_v34 }
 0xe97   : > { %3415 = vadd.xlane.f32.xlu0 %v3399_v32  ;;  %v3400_v29 = vmul.f32 %v8080_v36, %v8080_v36 }
 0xe99   : > { %3417 = vadd.xlane.f32.xlu1 %v3400_v29  ;;  %v6127_v29 = vld [vmem:[%s6479_s27 + $0x60] sm:$0xff] }
 0xe9b   : > { %3419 = vadd.xlane.f32.xlu0 %v3401_v42 }
 0xe9d   : > { %v5322_v46 = vpop.f32.mrb[100].mxu0 }
 0xe9e   : > { %v3336_v57 = vpop.f32.mrb[101].mxu0  ;;  %v8097_v63 = vadd.f32 %v6120_v12, %v5322_v46  ;;  %v6130_v12 = vld [vmem:[%s6479_s27 + $0x78] sm:$0xff] }
 0xe9f   : > { %v8094_v61 = vadd.f32 %v6119_v6, %v3336_v57  ;;  %3421 = vadd.xlane.f32.xlu0 %v3402_v53  ;;  %v5323_v15 = vpop.f32.mrb[102].mxu0  ;;  %v6128_v53 = vld [vmem:[%s6479_s27 + $0x70] sm:$0xff]  ;;  %v6129_v6 = vld [vmem:[%s6479_s27 + $0x68] sm:$0xff] }
 0xea0   : > { %v3339_v47 = vpop.f32.mrb[103].mxu0  ;;  %v8105_v44 = vadd.f32 %v6122_v54, %v5323_v15  ;;  %v3405_v49 = vmul.f32 %v8097_v63, %v8097_v63 }
 0xea1   : > { %v8100_v48 = vadd.f32 %v6121_v56, %v3339_v47  ;;  %v3403_v17 = vmul.f32 %v8094_v61, %v8094_v61 }
 0xea2   : > { %v3406_v41 = vmul.f32 %v8105_v44, %v8105_v44 }
 0xea3   : > { %3423 = vadd.xlane.f32.xlu0 %v3403_v17  ;;  %v3404_v22 = vmul.f32 %v8100_v48, %v8100_v48 }
 0xea5   : > { %3425 = vadd.xlane.f32.xlu1 %v3404_v22 }
 0xea7   : > { %3427 = vadd.xlane.f32.xlu0 %v3405_v49 }
 0xea9   : > { %3429 = vadd.xlane.f32.xlu1 %v3406_v41 }
 0xecd   : > { %v5326_v5 = vpop.f32.mrb[104].mxu0 }
 0xece   : > { %v3352_v10 = vpop.f32.mrb[105].mxu0  ;;  %v8117_v13 = vadd.f32 %v6124_v26, %v5326_v5 }
 0xecf   : > { %v8114_v9 = vadd.f32 %v6123_v3, %v3352_v10  ;;  %v5327_v28 = vpop.f32.mrb[106].mxu0 }
 0xed0   : > { %v3355_v38 = vpop.f32.mrb[107].mxu0  ;;  %v8125_v43 = vadd.f32 %v6126_v27, %v5327_v28  ;;  %v3409_v55 = vmul.f32 %v8117_v13, %v8117_v13 }
 0xed1   : > { %v8120_v8 = vadd.f32 %v6125_v23, %v3355_v38  ;;  %v3407_v7 = vmul.f32 %v8114_v9, %v8114_v9 }
 0xed2   : > { %v3410_v1 = vmul.f32 %v8125_v43, %v8125_v43 }
 0xed3   : > { %3431 = vadd.xlane.f32.xlu0 %v3407_v7  ;;  %v3408_v24 = vmul.f32 %v8120_v8, %v8120_v8 }
 0xed5   : > { %3433 = vadd.xlane.f32.xlu1 %v3408_v24 }
 0xed7   : > { %3435 = vadd.xlane.f32.xlu0 %v3409_v55 }
 0xed9   : > { %3437 = vadd.xlane.f32.xlu1 %v3410_v1  ;;  %v5330_v18 = vpop.f32.mrb[108].mxu0 }
 0xeda   : > { %v3368_v32 = vpop.f32.mrb[109].mxu0  ;;  %v8137_v57 = vadd.f32 %v6128_v53, %v5330_v18 }
 0xedb   : > { %v8134_v2 = vadd.f32 %v6127_v29, %v3368_v32  ;;  %v5331_v42 = vpop.f32.mrb[110].mxu0 }
 0xedc   : > { %v3371_v46 = vpop.f32.mrb[111].mxu0  ;;  %8895 = vst [vmem:[#allocation25_spill] sm:$0xff] %v8137_v57  ;;  %v8145_v56 = vadd.f32 %v6130_v12, %v5331_v42  ;;  %v3413_v54 = vmul.f32 %v8137_v57, %v8137_v57 }
 0xedd   : > { %8894 = vst [vmem:[#allocation24_spill] sm:$0xff] %v8134_v2  ;;  %v8140_v15 = vadd.f32 %v6129_v6, %v3371_v46  ;;  %v3411_v47 = vmul.f32 %v8134_v2, %v8134_v2 }
 0xede   : > { %8897 = vst [vmem:[#allocation27_spill] sm:$0xff] %v8145_v56  ;;  %v3414_v22 = vmul.f32 %v8145_v56, %v8145_v56 }
 0xedf   : > { %8896 = vst [vmem:[#allocation26_spill] sm:$0xff] %v8140_v15  ;;  %3439 = vadd.xlane.f32.xlu0 %v3411_v47  ;;  %v3412_v17 = vmul.f32 %v8140_v15, %v8140_v15 }
 0xee1   : > { %3441 = vadd.xlane.f32.xlu1 %v3412_v17 }
 0xee3   : > { %3443 = vadd.xlane.f32.xlu0 %v3413_v54 }
 0xee5   : > { %3445 = vadd.xlane.f32.xlu1 %v3414_v22 }
 0xf24   : > { %v3416_v49 = vpop.xlane.xlu0 %3415 }
 0xf25   : > { %v3447_v33 = vmul.f32 0.0078125, %v3416_v49 }
 0xf26   : > { %v3418_v0 = vpop.xlane.xlu1 %3417 }
 0xf27   : > { %5955 = vrsqrt.f32 %v3447_v33  ;;  %v3448_v62 = vmul.f32 0.0078125, %v3418_v0 }
 0xf28   : > { %v3420_v59 = vpop.xlane.xlu0 %3419 }
 0xf29   : > { %5957 = vrsqrt.f32 %v3448_v62  ;;  %v3449_v41 = vmul.f32 0.0078125, %v3420_v59 }
 0xf2b   : > { %5959 = vrsqrt.f32 %v3449_v41 }
 0xf2c   : > { %v3422_v30 = vpop.xlane.xlu0 %3421 }
 0xf2d   : > { %v3450_v11 = vmul.f32 0.0078125, %v3422_v30 }
 0xf2f   : > { %5961 = vrsqrt.f32 %v3450_v11 }
 0xf30   : > { %v3424_v25 = vpop.xlane.xlu0 %3423 }
 0xf31   : > { %v5956_v50 = vpop.eup %5955  ;;  %v3451_v58 = vmul.f32 0.0078125, %v3424_v25 }
 0xf32   : > { %v3479_v60 = vmul.f32 %v5956_v50, %v8074_v45  ;;  %v3426_v40 = vpop.xlane.xlu1 %3425 }
 0xf33   : > { %v5958_v52 = vpop.eup %5957  ;;  %v3452_v19 = vmul.f32 0.0078125, %v3426_v40  ;;  %5963 = vrsqrt.f32 %v3451_v58 }
 0xf34   : > { %v3480_v16 = vmul.f32 %v5958_v52, %v8080_v36  ;;  %v3428_v31 = vpop.xlane.xlu0 %3427  ;;  %v3502_v14 = vmul.f32 %v8157_v4, %v3479_v60 }
 0xf35   : > { %5965 = vrsqrt.f32 %v3452_v19  ;;  %v5960_v51 = vpop.eup %5959  ;;  %v3453_v28 = vmul.f32 0.0078125, %v3428_v31 }
 0xf36   : > { %v3430_v37 = vpop.xlane.xlu1 %3429  ;;  %v3503_v35 = vmul.f32 %v8157_v4, %v3480_v16  ;;  %v3481_v38 = vmul.f32 %v5960_v51, %v8077_v20 }
 0xf37   : > { %v3454_v5 = vmul.f32 0.0078125, %v3430_v37 }
 0xf38   : > { %v3518_v10 = vpack.c.bf16 %v3503_v35, %v3502_v14  ;;  %v3504_v27 = vmul.f32 %v8157_v4, %v3481_v38 }
 0xf39   : > { %v5962_v3 = vpop.eup %5961  ;;  %5967 = vrsqrt.f32 %v3454_v5 }
 0xf3a   : > { %3773 = vmatmul.mubr.bf16.vlgmr.msra.gmra.mrb[96].mxu1 %v3518_v10  ;;  %3886 = vmatmul.mubr.bf16.vlgmr.msra.gmra.mrb[112].mxu0 %v3518_v10  ;;  %v3482_v26 = vmul.f32 %v5962_v3, %v8087_v34  ;;  %5969 = vrsqrt.f32 %v3453_v28 }
 0xf3b   : > { %3782 = vmatprep.mubr.bf16.mxu1 %v8844_v21  ;;  %3895 = vmatprep.mubr.bf16.mxu0 %v8844_v21 }
 0xf3c   : > { %v3505_v23 = vmul.f32 %v8157_v4, %v3482_v26 }
 0xf3d   : > { %v5964_v7 = vpop.eup %5963 }
 0xf3e   : > { %v3519_v55 = vpack.c.bf16 %v3505_v23, %v3504_v27  ;;  %v3483_v18 = vmul.f32 %v5964_v7, %v8094_v61 }
 0xf3f   : > { %v5966_v24 = vpop.eup %5965 }
 0xf40   : > { %v3484_v1 = vmul.f32 %v5966_v24, %v8100_v48  ;;  %v3506_v42 = vmul.f32 %v8157_v4, %v3483_v18 }
 0xf42   : > { %3783 = vmatmul.mubr.bf16.gmra.mrb[100].mxu1 %v3519_v55  ;;  %3896 = vmatmul.mubr.bf16.gmra.mrb[116].mxu0 %v3519_v55  ;;  %v3507_v32 = vmul.f32 %v8157_v4, %v3484_v1 }
 0xf43   : > { %3792 = vmatprep.mubr.bf16.mxu1 %v8844_v21  ;;  %3905 = vmatprep.mubr.bf16.mxu0 %v8844_v21  ;;  %v5968_v29 = vpop.eup %5967 }
 0xf44   : > { %v5970_v46 = vpop.eup %5969  ;;  %v3520_v53 = vpack.c.bf16 %v3507_v32, %v3506_v42  ;;  %v3486_v6 = vmul.f32 %v5968_v29, %v8105_v44 }
 0xf45   : > { %v3485_v47 = vmul.f32 %v5970_v46, %v8097_v63 }
 0xf46   : > { %v3509_v12 = vmul.f32 %v8157_v4, %v3486_v6 }
 0xf47   : > { %v3508_v17 = vmul.f32 %v8157_v4, %v3485_v47 }
 0xf49   : > { %v3521_v54 = vpack.c.bf16 %v3509_v12, %v3508_v17 }
 0xf4a   : > { %3793 = vmatmul.mubr.bf16.gmra.mrb[104].mxu1 %v3520_v53  ;;  %3906 = vmatmul.mubr.bf16.gmra.mrb[120].mxu0 %v3520_v53 }
 0xf4b   : > { %3802 = vmatprep.mubr.bf16.mxu1 %v8844_v21  ;;  %3915 = vmatprep.mubr.bf16.mxu0 %v8844_v21 }
 0xf52   : > { %3803 = vmatmul.mubr.bf16.gmra.mrb[108].mxu1 %v3521_v54  ;;  %3916 = vmatmul.mubr.bf16.gmra.mrb[124].mxu0 %v3521_v54  ;;  %v5651_v54 = vld [vmem:[%s8678_s9 + $0x40] sm:$0xff]  }
 0xf53   : > { %3812 = vmatprep.mubr.bf16.mxu1 %v8844_v21  ;;  %3925 = vmatprep.mubr.bf16.mxu0 %v8844_v21 }
 0xf54   : > { %4940 = vmatprep.subr.bf16.mxu0 %v5651_v54  ;;  %5332 = vmatprep.subr.bf16.mxu1 %v5651_v54 }
 0xf60   : > { %v3432_v22 = vpop.xlane.xlu0 %3431 }
 0xf61   : > { %v3455_v49 = vmul.f32 0.0078125, %v3432_v22  ;;  %v5652_v22 = vld [vmem:[%s8678_s9] sm:$0xff]  }
 0xf62   : > { %v3434_v33 = vpop.xlane.xlu1 %3433  ;;  %4941 = vmatpush3.bf16.msra.mxu0 %v5652_v22  ;;  %5340 = vmatpush3.bf16.msra.mxu1 %v5652_v22 }
 0xf63   : > { %5971 = vrsqrt.f32 %v3455_v49  ;;  %v3456_v0 = vmul.f32 0.0078125, %v3434_v33  ;;  %v5655_v49 = vld [vmem:[%s8678_s9 + $0x50] sm:$0xff]  }
 0xf64   : > { %v3436_v62 = vpop.xlane.xlu0 %3435  ;;  %v5656_v33 = vld [vmem:[%s8678_s9 + $0x10] sm:$0xff]  }
 0xf65   : > { %5973 = vrsqrt.f32 %v3456_v0  ;;  %v3457_v59 = vmul.f32 0.0078125, %v3436_v62  ;;  %v5657_v0 = vld [vmem:[%s8678_s9 + $0x58] sm:$0xff]  }
 0xf66   : > { %v3438_v41 = vpop.xlane.xlu1 %3437  ;;  %v5658_v62 = vld [vmem:[%s8678_s9 + $0x18] sm:$0xff]  }
 0xf67   : > { %v3458_v30 = vmul.f32 0.0078125, %v3438_v41  ;;  %5975 = vrsqrt.f32 %v3457_v59  ;;  %v5659_v59 = vld [vmem:[%s8678_s9 + $0x60] sm:$0xff]  }
 0xf68   : > { %v5660_v41 = vld [vmem:[%s8678_s9 + $0x20] sm:$0xff]  }
 0xf69   : > { %5977 = vrsqrt.f32 %v3458_v30  ;;  %v5661_v30 = vld [vmem:[%s8678_s9 + $0x68] sm:$0xff]  }
 0xf6c   : > { %v3440_v11 = vpop.xlane.xlu0 %3439 }
 0xf6d   : > { %v5972_v25 = vpop.eup %5971  ;;  %v3459_v50 = vmul.f32 0.0078125, %v3440_v11  ;;  %v5662_v11 = vld [vmem:[%s8678_s9 + $0x28] sm:$0xff]  }
 0xf6e   : > { %v3442_v58 = vpop.xlane.xlu1 %3441  ;;  %v3487_v60 = vmul.f32 %v5972_v25, %v8114_v9  ;;  %v5663_v25 = vld [vmem:[%s8678_s9 + $0x70] sm:$0xff]  }
 0xf6f   : > { %v5974_v40 = vpop.eup %5973  ;;  %v3460_v52 = vmul.f32 0.0078125, %v3442_v58  ;;  %5979 = vrsqrt.f32 %v3459_v50  ;;  %v5664_v50 = vld [vmem:[%s8678_s9 + $0x30] sm:$0xff]   ;;  %v5665_v58 = vld [vmem:[%s8678_s9 + $0x78] sm:$0xff]  }
 0xf70   : > { %v3488_v19 = vmul.f32 %v5974_v40, %v8120_v8  ;;  %v3444_v31 = vpop.xlane.xlu0 %3443  ;;  %v3510_v14 = vmul.f32 %v8157_v4, %v3487_v60  ;;  %v5666_v60 = vld [vmem:[%s8678_s9 + $0x38] sm:$0xff]   ;;  %v3562_v40 = vsub.s32 0, %v6818_v39 }
 0xf71   : > { %5981 = vrsqrt.f32 %v3460_v52  ;;  %v5976_v16 = vpop.eup %5975  ;;  %v3461_v28 = vmul.f32 0.0078125, %v3444_v31  ;;  %v8256_v52 = vld [vmem:[%s8677_s8] sm:$0xf] }
 0xf72   : > { %v3446_v37 = vpop.xlane.xlu1 %3445  ;;  %v3511_v35 = vmul.f32 %v8157_v4, %v3488_v19  ;;  %v3489_v38 = vmul.f32 %v5976_v16, %v8117_v13  ;;  %v3566_v19 = vsub.s32 1, %v6818_v39  ;;  %v8260_v16 = vrot.slane %v8256_v52, %v3562_v40 }
 0xf73   : > { %v5978_v51 = vpop.eup %5977  ;;  %v3462_v5 = vmul.f32 0.0078125, %v3446_v37 }
 0xf74   : > { %v3522_v10 = vpack.c.bf16 %v3511_v35, %v3510_v14  ;;  %v3490_v3 = vmul.f32 %v5978_v51, %v8125_v43  ;;  %v3512_v7 = vmul.f32 %v8157_v4, %v3489_v38  ;;  %v8263_v31 = vrot.slane %v8256_v52, %v3566_v19 }
 0xf75   : > { %5983 = vrsqrt.f32 %v3462_v5 }
 0xf76   : > { %3813 = vmatmul.mubr.bf16.gmra.mrb[112].mxu1 %v3522_v10  ;;  %3926 = vmatmul.mubr.bf16.gmra.mrb[128].mxu0 %v3522_v10  ;;  %v3513_v26 = vmul.f32 %v8157_v4, %v3490_v3  ;;  %5985 = vrsqrt.f32 %v3461_v28 }
 0xf77   : > { %3822 = vmatprep.mubr.bf16.mxu1 %v8844_v21  ;;  %3935 = vmatprep.mubr.bf16.mxu0 %v8844_v21 }
 0xf78   : > { %v3523_v24 = vpack.c.bf16 %v3513_v26, %v3512_v7 }
 0xf79   : > { %v5980_v23 = vpop.eup %5979 }
 0xf7a   : > { %v3491_v1 = vmul.f32 %v5980_v23, %v8134_v2 }
 0xf7b   : > { %v5982_v27 = vpop.eup %5981 }
 0xf7c   : > { %v3492_v55 = vmul.f32 %v5982_v27, %v8140_v15  ;;  %v3514_v29 = vmul.f32 %v8157_v4, %v3491_v1 }
 0xf7e   : > { %3823 = vmatmul.mubr.bf16.gmra.mrb[116].mxu1 %v3523_v24  ;;  %3936 = vmatmul.mubr.bf16.gmra.mrb[132].mxu0 %v3523_v24  ;;  %v3515_v18 = vmul.f32 %v8157_v4, %v3492_v55 }
 0xf7f   : > { %3832 = vmatprep.mubr.bf16.mxu1 %v8844_v21  ;;  %3945 = vmatprep.mubr.bf16.mxu0 %v8844_v21  ;;  %v5984_v32 = vpop.eup %5983 }
 0xf80   : > { %v5986_v42 = vpop.eup %5985  ;;  %v3524_v46 = vpack.c.bf16 %v3515_v18, %v3514_v29  ;;  %v3494_v53 = vmul.f32 %v5984_v32, %v8145_v56 }
 0xf81   : > { %v3493_v6 = vmul.f32 %v5986_v42, %v8137_v57 }
 0xf82   : > { %v3517_v47 = vmul.f32 %v8157_v4, %v3494_v53 }
 0xf83   : > { %v3516_v12 = vmul.f32 %v8157_v4, %v3493_v6  ;;  %v5654_v4 = vld [vmem:[%s8678_s9 + $0x8] sm:$0xff]  }
 0xf85   : > { %v3525_v17 = vpack.c.bf16 %v3517_v47, %v3516_v12 }
 0xf86   : > { %3833 = vmatmul.mubr.bf16.gmra.mrb[120].mxu1 %v3524_v46  ;;  %3946 = vmatmul.mubr.bf16.gmra.mrb[136].mxu0 %v3524_v46 }
 0xf87   : > { %3842 = vmatprep.mubr.bf16.mxu1 %v8844_v21  ;;  %3955 = vmatprep.mubr.bf16.mxu0 %v8844_v21  ;;  %v5653_v21 = vld [vmem:[%s8678_s9 + $0x48] sm:$0xff]  }
 0xf88   : > { %4942 = vmatprep.subr.bf16.mxu0 %v5653_v21  ;;  %5333 = vmatprep.subr.bf16.mxu1 %v5653_v21 }
 0xf89   : > { %4943 = vmatpush3.bf16.msra.mxu0 %v5654_v4  ;;  %5341 = vmatpush3.bf16.msra.mxu1 %v5654_v4 }
 0xf8a   : > { %4944 = vmatprep.subr.bf16.mxu0 %v5655_v49  ;;  %5334 = vmatprep.subr.bf16.mxu1 %v5655_v49 }
 0xf8d   : > { %4945 = vmatpush3.bf16.msra.mxu0 %v5656_v33  ;;  %5342 = vmatpush3.bf16.msra.mxu1 %v5656_v33 }
 0xf8e   : > { %3843 = vmatmul.mubr.bf16.gmra.mrb[124].mxu1 %v3525_v17  ;;  %3956 = vmatmul.mubr.bf16.gmra.mrb[140].mxu0 %v3525_v17 }
 0xf8f   : > { %4946 = vmatprep.subr.bf16.mxu0 %v5657_v0  ;;  %5335 = vmatprep.subr.bf16.mxu1 %v5657_v0 }
 0xf91   : > { %4947 = vmatpush3.bf16.msra.mxu0 %v5658_v62  ;;  %5343 = vmatpush3.bf16.msra.mxu1 %v5658_v62 }
 0xf92   : > { %4948 = vmatprep.subr.bf16.mxu0 %v5659_v59  ;;  %5336 = vmatprep.subr.bf16.mxu1 %v5659_v59 }
 0xf95   : > { %4949 = vmatpush3.bf16.msra.mxu0 %v5660_v41  ;;  %5344 = vmatpush3.bf16.msra.mxu1 %v5660_v41 }
 0xf96   : > { %4950 = vmatprep.subr.bf16.mxu0 %v5661_v30  ;;  %5337 = vmatprep.subr.bf16.mxu1 %v5661_v30 }
 0xf99   : > { %4951 = vmatpush3.bf16.msra.mxu0 %v5662_v11  ;;  %5345 = vmatpush3.bf16.msra.mxu1 %v5662_v11 }
 0xf9a   : > { %4952 = vmatprep.subr.bf16.mxu0 %v5663_v25  ;;  %5338 = vmatprep.subr.bf16.mxu1 %v5663_v25 }
 0xf9d   : > { %4953 = vmatpush3.bf16.msra.mxu0 %v5664_v50  ;;  %5346 = vmatpush3.bf16.msra.mxu1 %v5664_v50 }
 0xf9e   : > { %4954 = vmatprep.subr.bf16.mxu0 %v5665_v58  ;;  %5339 = vmatprep.subr.bf16.mxu1 %v5665_v58 }
 0xfa1   : > { %4955 = vmatpush3.bf16.msra.mxu0 %v5666_v60  ;;  %5347 = vmatpush3.bf16.msra.mxu1 %v5666_v60 }
0x100d   : > { %v3774_v37 = vpop.f32.mrb[96].mxu1  ;;  %v8265_v14 = vpop.f32.mrb[112].mxu0 }
0x100e   : > { %v8268_v35 = vadd.f32 %v3774_v37, %v8260_v16  ;;  %v3776_v51 = vpop.f32.mrb[97].mxu1  ;;  %v8270_v5 = vpop.f32.mrb[113].mxu0 }
0x100f   : > { %v8273_v10 = vadd.f32 %v3776_v51, %v8263_v31  ;;  %v3778_v3 = vpop.f32.mrb[98].mxu1  ;;  %v8275_v28 = vpop.f32.mrb[114].mxu0 }
0x1010   : > { %v4720_v38 = vmul.f32 -1.442695, %v8268_v35  ;;  %v8279_v26 = vadd.f32 %v3778_v3, %v8260_v16  ;;  %v3780_v23 = vpop.f32.mrb[99].mxu1  ;;  %v8281_v7 = vpop.f32.mrb[115].mxu0 }
0x1011   : > { %v4721_v27 = vmul.f32 -1.442695, %v8273_v10  ;;  %v8285_v24 = vadd.f32 %v3780_v23, %v8263_v31 }
0x1012   : > { %5987 = vpow2.f32 %v4720_v38  ;;  %v4722_v55 = vmul.f32 -1.442695, %v8279_v26 }
0x1013   : > { %5989 = vpow2.f32 %v4721_v27  ;;  %v4723_v1 = vmul.f32 -1.442695, %v8285_v24 }
0x1014   : > { %5991 = vpow2.f32 %v4722_v55 }
0x1015   : > { %5993 = vpow2.f32 %v4723_v1  ;;  %v3784_v18 = vpop.f32.mrb[100].mxu1  ;;  %v8289_v32 = vpop.f32.mrb[116].mxu0 }
0x1016   : > { %v8292_v29 = vadd.f32 %v3784_v18, %v8260_v16  ;;  %v3786_v42 = vpop.f32.mrb[101].mxu1  ;;  %v8294_v46 = vpop.f32.mrb[117].mxu0 }
0x1017   : > { %v8297_v53 = vadd.f32 %v3786_v42, %v8263_v31  ;;  %v3788_v6 = vpop.f32.mrb[102].mxu1  ;;  %v8299_v47 = vpop.f32.mrb[118].mxu0 }
0x1018   : > { %v4724_v12 = vmul.f32 -1.442695, %v8292_v29  ;;  %v8303_v17 = vadd.f32 %v3788_v6, %v8260_v16  ;;  %v3790_v54 = vpop.f32.mrb[103].mxu1  ;;  %v8305_v22 = vpop.f32.mrb[119].mxu0  ;;  %v3570_v6 = vsub.s32 2, %v6818_v39 }
0x1019   : > { %v4725_v21 = vmul.f32 -1.442695, %v8297_v53  ;;  %v8309_v4 = vadd.f32 %v3790_v54, %v8263_v31  ;;  %v3574_v54 = vsub.s32 3, %v6818_v39 }
0x101a   : > { %5995 = vpow2.f32 %v4724_v12  ;;  %v4726_v49 = vmul.f32 -1.442695, %v8303_v17 }
0x101b   : > { %5997 = vpow2.f32 %v4725_v21  ;;  %v4727_v33 = vmul.f32 -1.442695, %v8309_v4 }
0x101c   : > { %v5988_v0 = vpop.eup %5987  ;;  %5999 = vpow2.f32 %v4726_v49 }
0x101d   : > { %v5990_v62 = vpop.eup %5989  ;;  %v4062_v59 = vadd.f32 1.0, %v5988_v0  ;;  %6001 = vpow2.f32 %v4727_v33  ;;  %v3794_v41 = vpop.f32.mrb[104].mxu1 }
0x101e   : > { %v8313_v30 = vpop.f32.mrb[120].mxu0  ;;  %v5992_v11 = vpop.eup %5991  ;;  %v4063_v25 = vadd.f32 1.0, %v5990_v62  ;;  %v8316_v50 = vadd.f32 %v3794_v41, %v8260_v16 }
0x101f   : > { %v3796_v58 = vpop.f32.mrb[105].mxu1  ;;  %v8318_v60 = vpop.f32.mrb[121].mxu0  ;;  %6003 = vrcp.f32 %v4062_v59  ;;  %v4064_v19 = vadd.f32 1.0, %v5992_v11  ;;  %v8342_v11 = vrot.slane %v8256_v52, %v3570_v6 }
0x1020   : > { %v5994_v40 = vpop.eup %5993  ;;  %v8321_v37 = vadd.f32 %v3796_v58, %v8263_v31  ;;  %v3798_v51 = vpop.f32.mrb[106].mxu1  ;;  %6005 = vrcp.f32 %v4063_v25  ;;  %v4728_v23 = vmul.f32 -1.442695, %v8316_v50 }
0x1021   : > { %v8323_v3 = vpop.f32.mrb[122].mxu0  ;;  %v4065_v38 = vadd.f32 1.0, %v5994_v40  ;;  %v8327_v27 = vadd.f32 %v3798_v51, %v8260_v16  ;;  %v3800_v55 = vpop.f32.mrb[107].mxu1  ;;  %6007 = vrcp.f32 %v4064_v19  ;;  %v8350_v51 = vrot.slane %v8256_v52, %v3574_v54 }
0x1022   : > { %v8329_v1 = vpop.f32.mrb[123].mxu0  ;;  %v4729_v18 = vmul.f32 -1.442695, %v8321_v37  ;;  %v8333_v42 = vadd.f32 %v3800_v55, %v8263_v31 }
0x1023   : > { %6009 = vrcp.f32 %v4065_v38  ;;  %v4730_v12 = vmul.f32 -1.442695, %v8327_v27 }
0x1024   : > { %6011 = vpow2.f32 %v4728_v23  ;;  %v4731_v21 = vmul.f32 -1.442695, %v8333_v42  ;;  %v5996_v49 = vpop.eup %5995 }
0x1025   : > { %6013 = vpow2.f32 %v4729_v18  ;;  %v5998_v33 = vpop.eup %5997  ;;  %v4066_v0 = vadd.f32 1.0, %v5996_v49  ;;  %v3804_v62 = vpop.f32.mrb[108].mxu1 }
0x1026   : > { %6015 = vpow2.f32 %v4730_v12  ;;  %v8339_v59 = vpop.f32.mrb[124].mxu0  ;;  %v6000_v41 = vpop.eup %5999  ;;  %v4067_v25 = vadd.f32 1.0, %v5998_v33  ;;  %v8345_v58 = vadd.f32 %v3804_v62, %v8260_v16 }
0x1027   : > { %6017 = vpow2.f32 %v4731_v21  ;;  %v3806_v39 = vpop.f32.mrb[109].mxu1  ;;  %v8347_v40 = vpop.f32.mrb[125].mxu0  ;;  %v4068_v38 = vadd.f32 1.0, %v6000_v41 }
0x1028   : > { %v6002_v19 = vpop.eup %6001  ;;  %6019 = vrcp.f32 %v4066_v0  ;;  %v8353_v23 = vadd.f32 %v3806_v39, %v8263_v31  ;;  %v3808_v55 = vpop.f32.mrb[110].mxu1  ;;  %v4732_v12 = vmul.f32 -1.442695, %v8345_v58 }
0x1029   : > { %v8355_v18 = vpop.f32.mrb[126].mxu0  ;;  %6021 = vrcp.f32 %v4067_v25  ;;  %v4069_v6 = vadd.f32 1.0, %v6002_v19  ;;  %v8359_v21 = vadd.f32 %v3808_v55, %v8260_v16  ;;  %v3810_v49 = vpop.f32.mrb[111].mxu1  ;;  %v3888_v25 = vadd.f32 %v8265_v14, %v8342_v11 }
0x102a   : > { %v8361_v33 = vpop.f32.mrb[127].mxu0  ;;  %v6004_v52 = vpop.eup %6003  ;;  %6023 = vrcp.f32 %v4068_v38  ;;  %v4733_v54 = vmul.f32 -1.442695, %v8353_v23  ;;  %v8365_v0 = vadd.f32 %v3810_v49, %v8263_v31  ;;  %v3890_v38 = vadd.f32 %v8270_v5, %v8350_v51 }
0x102b   : > { %v6006_v62 = vpop.eup %6005  ;;  %v4158_v41 = vmul.f32 %v6004_v52, %v8268_v35  ;;  %6025 = vrcp.f32 %v4069_v6  ;;  %v4734_v39 = vmul.f32 -1.442695, %v8359_v21  ;;  %v3892_v35 = vadd.f32 %v8275_v28, %v8342_v11 }
0x102c   : > { %v6008_v19 = vpop.eup %6007  ;;  %v4159_v55 = vmul.f32 %v6006_v62, %v8273_v10  ;;  %6027 = vpow2.f32 %v4732_v12  ;;  %v4735_v56 = vmul.f32 -1.442695, %v8365_v0  ;;  %v3894_v10 = vadd.f32 %v8281_v7, %v8350_v51 }
0x102d   : > { %v6010_v49 = vpop.eup %6009  ;;  %v4190_v57 = vmul.f32 %v4158_v41, %v3888_v25  ;;  %v4160_v15 = vmul.f32 %v6008_v19, %v8279_v26  ;;  %6029 = vpow2.f32 %v4733_v54  ;;  %v3898_v7 = vadd.f32 %v8289_v32, %v8342_v11 }
0x102e   : > { %v6012_v14 = vpop.eup %6011  ;;  %v4191_v6 = vmul.f32 %v4159_v55, %v3890_v38  ;;  %v4161_v52 = vmul.f32 %v6010_v49, %v8285_v24  ;;  %6031 = vpow2.f32 %v4734_v39  ;;  %v3900_v39 = vadd.f32 %v8294_v46, %v8350_v51 }
0x102f   : > { %v6014_v5 = vpop.eup %6013  ;;  %v4192_v12 = vmul.f32 %v4160_v15, %v3892_v35  ;;  %v4070_v62 = vadd.f32 1.0, %v6012_v14  ;;  %6033 = vpow2.f32 %v4735_v56  ;;  %v3902_v14 = vadd.f32 %v8299_v47, %v8342_v11 }
0x1030   : > { %v6016_v2 = vpop.eup %6015  ;;  %v4193_v41 = vmul.f32 %v4161_v52, %v3894_v10  ;;  %v4071_v25 = vadd.f32 1.0, %v6014_v5 }
0x1031   : > { %v6018_v26 = vpop.eup %6017  ;;  %v4222_v19 = vpack.c.bf16 %v4192_v12, %v4190_v57  ;;  %6035 = vrcp.f32 %v4070_v62  ;;  %v4072_v28 = vadd.f32 1.0, %v6016_v2 }
0x1032   : > { %v6020_v54 = vpop.eup %6019  ;;  %6037 = vrcp.f32 %v4071_v25  ;;  %v4073_v55 = vadd.f32 1.0, %v6018_v26  ;;  %v4223_v38 = vpack.c.bf16 %v4193_v41, %v4191_v6 }
0x1033   : > { %v6022_v24 = vpop.eup %6021  ;;  %v4162_v49 = vmul.f32 %v6020_v54, %v8292_v29  ;;  %6039 = vrcp.f32 %v4072_v28 }
0x1034   : > { %v6024_v15 = vpop.eup %6023  ;;  %v4163_v56 = vmul.f32 %v6022_v24, %v8297_v53  ;;  %6041 = vrcp.f32 %v4073_v55  ;;  %4405 = vmatprep.mubr.bf16.mxu0 %v4223_v38  ;;  %v3904_v53 = vadd.f32 %v8305_v22, %v8350_v51  ;;  %v3908_v22 = vadd.f32 %v8313_v30, %v8342_v11 }
0x1035   : > { %v6026_v2 = vpop.eup %6025  ;;  %v4194_v57 = vmul.f32 %v4162_v49, %v3898_v7  ;;  %v4164_v35 = vmul.f32 %v6024_v15, %v8303_v17  ;;  %4406 = vmatmul.mubr.bf16.vlgmr.msra.gmra.mrb[144].mxu0 %v4222_v19  ;;  %v3910_v38 = vadd.f32 %v8318_v60, %v8350_v51  ;;  %v3912_v15 = vadd.f32 %v8323_v3, %v8342_v11 }
0x1036   : > { %v6028_v29 = vpop.eup %6027  ;;  %v4195_v6 = vmul.f32 %v4163_v56, %v3900_v39  ;;  %v4165_v32 = vmul.f32 %v6026_v2, %v8309_v4  ;;  %v3914_v30 = vadd.f32 %v8329_v1, %v8350_v51 }
0x1037   : > { %v6030_v52 = vpop.eup %6029  ;;  %v4196_v10 = vmul.f32 %v4164_v35, %v3902_v14  ;;  %v4074_v46 = vadd.f32 1.0, %v6028_v29 }
0x1038   : > { %v6032_v5 = vpop.eup %6031  ;;  %v4197_v12 = vmul.f32 %v4165_v32, %v3904_v53  ;;  %v4075_v62 = vadd.f32 1.0, %v6030_v52  ;;  %v3922_v53 = vadd.f32 %v8355_v18, %v8342_v11 }
0x1039   : > { %v6034_v41 = vpop.eup %6033  ;;  %6043 = vrcp.f32 %v4074_v46  ;;  %v4076_v17 = vadd.f32 1.0, %v6032_v5  ;;  %v4224_v25 = vpack.c.bf16 %v4196_v10, %v4194_v57 }
0x103a   : > { %6045 = vrcp.f32 %v4075_v62  ;;  %v4077_v47 = vadd.f32 1.0, %v6034_v41  ;;  %v4225_v26 = vpack.c.bf16 %v4197_v12, %v4195_v6 }
0x103b   : > { %v6036_v19 = vpop.eup %6035  ;;  %6047 = vrcp.f32 %v4076_v17 }
0x103c   : > { %v6038_v28 = vpop.eup %6037  ;;  %v4166_v4 = vmul.f32 %v6036_v19, %v8316_v50  ;;  %6049 = vrcp.f32 %v4077_v47  ;;  %4413 = vmatprep.mubr.bf16.mxu0 %v4225_v26 }
0x103d   : > { %v6040_v54 = vpop.eup %6039  ;;  %v4167_v55 = vmul.f32 %v6038_v28, %v8321_v37  ;;  %4414 = vmatmul.mubr.bf16.gmra.mrb[148].mxu0 %v4224_v25 }
0x103e   : > { %v6042_v24 = vpop.eup %6041  ;;  %v4198_v49 = vmul.f32 %v4166_v4, %v3908_v22  ;;  %v4168_v7 = vmul.f32 %v6040_v54, %v8327_v27  ;;  %v3918_v27 = vadd.f32 %v8339_v59, %v8342_v11  ;;  %v3924_v59 = vadd.f32 %v8361_v33, %v8350_v51 }
0x103f   : > { %v4199_v50 = vmul.f32 %v4167_v55, %v3910_v38  ;;  %v4169_v56 = vmul.f32 %v6042_v24, %v8333_v42  ;;  %v3920_v42 = vadd.f32 %v8347_v40, %v8350_v51 }
0x1040   : > { %v4200_v39 = vmul.f32 %v4168_v7, %v3912_v15 }
0x1041   : > { %v4201_v2 = vmul.f32 %v4169_v56, %v3914_v30 }
0x1042   : > { %v4226_v37 = vpack.c.bf16 %v4200_v39, %v4198_v49 }
0x1043   : > { %v6044_v57 = vpop.eup %6043  ;;  %v4227_v35 = vpack.c.bf16 %v4201_v2, %v4199_v50 }
0x1044   : > { %v6046_v60 = vpop.eup %6045  ;;  %v4170_v14 = vmul.f32 %v6044_v57, %v8345_v58 }
0x1045   : > { %v6048_v29 = vpop.eup %6047  ;;  %v4171_v3 = vmul.f32 %v6046_v60, %v8353_v23  ;;  %4421 = vmatprep.mubr.bf16.mxu1 %v4227_v35 }
0x1046   : > { %v6050_v6 = vpop.eup %6049  ;;  %v4202_v1 = vmul.f32 %v4170_v14, %v3918_v27  ;;  %v4172_v32 = vmul.f32 %v6048_v29, %v8359_v21  ;;  %4422 = vmatmul.mubr.bf16.vlgmr.msra.gmra.mrb[128].mxu1 %v4226_v37 }
0x1047   : > { %v4203_v52 = vmul.f32 %v4171_v3, %v3920_v42  ;;  %v4173_v58 = vmul.f32 %v6050_v6, %v8365_v0 }
0x1048   : > { %v4204_v10 = vmul.f32 %v4172_v32, %v3922_v53 }
0x1049   : > { %v4205_v23 = vmul.f32 %v4173_v58, %v3924_v59  ;;  %v3814_v46 = vpop.f32.mrb[112].mxu1  ;;  %v8417_v5 = vpop.f32.mrb[128].mxu0 }
0x104a   : > { %v4228_v40 = vpack.c.bf16 %v4204_v10, %v4202_v1  ;;  %v8420_v12 = vadd.f32 %v3814_v46, %v8260_v16  ;;  %v3816_v21 = vpop.f32.mrb[113].mxu1  ;;  %v8422_v62 = vpop.f32.mrb[129].mxu0 }
0x104b   : > { %v4229_v18 = vpack.c.bf16 %v4205_v23, %v4203_v52  ;;  %v8425_v41 = vadd.f32 %v3816_v21, %v8263_v31  ;;  %v3818_v0 = vpop.f32.mrb[114].mxu1  ;;  %v8427_v17 = vpop.f32.mrb[130].mxu0 }
0x104c   : > { %v4736_v33 = vmul.f32 -1.442695, %v8420_v12  ;;  %v8431_v25 = vadd.f32 %v3818_v0, %v8260_v16  ;;  %v3820_v47 = vpop.f32.mrb[115].mxu1  ;;  %v8433_v26 = vpop.f32.mrb[131].mxu0 }
0x104d   : > { %4429 = vmatprep.mubr.bf16.mxu1 %v4229_v18  ;;  %v4737_v19 = vmul.f32 -1.442695, %v8425_v41  ;;  %v8437_v28 = vadd.f32 %v3820_v47, %v8263_v31 }
0x104e   : > { %4430 = vmatmul.mubr.bf16.gmra.mrb[132].mxu1 %v4228_v40  ;;  %6051 = vpow2.f32 %v4736_v33  ;;  %v4738_v4 = vmul.f32 -1.442695, %v8431_v25 }
0x104f   : > { %6053 = vpow2.f32 %v4737_v19  ;;  %v4739_v22 = vmul.f32 -1.442695, %v8437_v28 }
0x1050   : > { %6055 = vpow2.f32 %v4738_v4 }
0x1051   : > { %6057 = vpow2.f32 %v4739_v22  ;;  %v3824_v54 = vpop.f32.mrb[116].mxu1  ;;  %v8441_v55 = vpop.f32.mrb[132].mxu0 }
0x1052   : > { %v8444_v38 = vadd.f32 %v3824_v54, %v8260_v16  ;;  %v3826_v24 = vpop.f32.mrb[117].mxu1  ;;  %v8446_v49 = vpop.f32.mrb[133].mxu0 }
0x1053   : > { %v8449_v7 = vadd.f32 %v3826_v24, %v8263_v31  ;;  %v3828_v15 = vpop.f32.mrb[118].mxu1  ;;  %v8451_v50 = vpop.f32.mrb[134].mxu0 }
0x1054   : > { %v4740_v56 = vmul.f32 -1.442695, %v8444_v38  ;;  %v8455_v30 = vadd.f32 %v3828_v15, %v8260_v16  ;;  %v3830_v39 = vpop.f32.mrb[119].mxu1  ;;  %v8457_v2 = vpop.f32.mrb[135].mxu0 }
0x1055   : > { %v4741_v37 = vmul.f32 -1.442695, %v8449_v7  ;;  %v8461_v57 = vadd.f32 %v3830_v39, %v8263_v31 }
0x1056   : > { %6059 = vpow2.f32 %v4740_v56  ;;  %v4742_v35 = vmul.f32 -1.442695, %v8455_v30 }
0x1057   : > { %6061 = vpow2.f32 %v4741_v37  ;;  %v4743_v60 = vmul.f32 -1.442695, %v8461_v57 }
0x1058   : > { %v6052_v14 = vpop.eup %6051  ;;  %6063 = vpow2.f32 %v4742_v35 }
0x1059   : > { %v6054_v27 = vpop.eup %6053  ;;  %v4078_v29 = vadd.f32 1.0, %v6052_v14  ;;  %6065 = vpow2.f32 %v4743_v60  ;;  %v3834_v3 = vpop.f32.mrb[120].mxu1 }
0x105a   : > { %v8465_v42 = vpop.f32.mrb[136].mxu0  ;;  %v6056_v6 = vpop.eup %6055  ;;  %v4079_v1 = vadd.f32 1.0, %v6054_v27  ;;  %v8468_v32 = vadd.f32 %v3834_v3, %v8260_v16 }
0x105b   : > { %v3836_v53 = vpop.f32.mrb[121].mxu1  ;;  %v8470_v52 = vpop.f32.mrb[137].mxu0  ;;  %6067 = vrcp.f32 %v4078_v29  ;;  %v4080_v59 = vadd.f32 1.0, %v6056_v6 }
0x105c   : > { %v6058_v58 = vpop.eup %6057  ;;  %v8473_v10 = vadd.f32 %v3836_v53, %v8263_v31  ;;  %v3838_v23 = vpop.f32.mrb[122].mxu1  ;;  %6069 = vrcp.f32 %v4079_v1  ;;  %v4744_v21 = vmul.f32 -1.442695, %v8468_v32 }
0x105d   : > { %v8475_v46 = vpop.f32.mrb[138].mxu0  ;;  %v4081_v40 = vadd.f32 1.0, %v6058_v58  ;;  %v8479_v18 = vadd.f32 %v3838_v23, %v8260_v16  ;;  %v3840_v0 = vpop.f32.mrb[123].mxu1  ;;  %6071 = vrcp.f32 %v4080_v59 }
0x105e   : > { %v8481_v33 = vpop.f32.mrb[139].mxu0  ;;  %v4745_v47 = vmul.f32 -1.442695, %v8473_v10  ;;  %v8485_v19 = vadd.f32 %v3840_v0, %v8263_v31 }
0x105f   : > { %6073 = vrcp.f32 %v4081_v40  ;;  %v4746_v4 = vmul.f32 -1.442695, %v8479_v18 }
0x1060   : > { %6075 = vpow2.f32 %v4744_v21  ;;  %v4747_v22 = vmul.f32 -1.442695, %v8485_v19  ;;  %v6060_v54 = vpop.eup %6059 }
0x1061   : > { %6077 = vpow2.f32 %v4745_v47  ;;  %v6062_v24 = vpop.eup %6061  ;;  %v4082_v15 = vadd.f32 1.0, %v6060_v54  ;;  %v3844_v56 = vpop.f32.mrb[124].mxu1 }
0x1062   : > { %6079 = vpow2.f32 %v4746_v4  ;;  %v8489_v39 = vpop.f32.mrb[140].mxu0  ;;  %v6064_v37 = vpop.eup %6063  ;;  %v4083_v35 = vadd.f32 1.0, %v6062_v24  ;;  %v8492_v60 = vadd.f32 %v3844_v56, %v8260_v16  ;;  %v3928_v24 = vadd.f32 %v8417_v5, %v8342_v11 }
0x1063   : > { %6081 = vpow2.f32 %v4747_v22  ;;  %v3846_v14 = vpop.f32.mrb[125].mxu1  ;;  %v8494_v27 = vpop.f32.mrb[141].mxu0  ;;  %v4084_v3 = vadd.f32 1.0, %v6064_v37  ;;  %v3930_v37 = vadd.f32 %v8422_v62, %v8350_v51 }
0x1064   : > { %v6066_v29 = vpop.eup %6065  ;;  %6083 = vrcp.f32 %v4082_v15  ;;  %v8497_v6 = vadd.f32 %v3846_v14, %v8263_v31  ;;  %v3848_v1 = vpop.f32.mrb[126].mxu1  ;;  %v4748_v59 = vmul.f32 -1.442695, %v8492_v60 }
0x1065   : > { %v8499_v53 = vpop.f32.mrb[142].mxu0  ;;  %6085 = vrcp.f32 %v4083_v35  ;;  %v4085_v58 = vadd.f32 1.0, %v6066_v29  ;;  %v8503_v23 = vadd.f32 %v3848_v1, %v8260_v16  ;;  %v3850_v40 = vpop.f32.mrb[127].mxu1 }
0x1066   : > { %v8505_v21 = vpop.f32.mrb[143].mxu0  ;;  %v6068_v0 = vpop.eup %6067  ;;  %6087 = vrcp.f32 %v4084_v3  ;;  %v4749_v47 = vmul.f32 -1.442695, %v8497_v6  ;;  %v8509_v4 = vadd.f32 %v3850_v40, %v8263_v31 }
0x1067   : > { %v6070_v22 = vpop.eup %6069  ;;  %v4174_v54 = vmul.f32 %v6068_v0, %v8420_v12  ;;  %6089 = vrcp.f32 %v4085_v58  ;;  %v4750_v16 = vmul.f32 -1.442695, %v8503_v23  ;;  %v3932_v12 = vadd.f32 %v8427_v17, %v8342_v11 }
0x1068   : > { %v6072_v15 = vpop.eup %6071  ;;  %v4175_v56 = vmul.f32 %v6070_v22, %v8425_v41  ;;  %6091 = vpow2.f32 %v4748_v59  ;;  %v4751_v35 = vmul.f32 -1.442695, %v8509_v4  ;;  %v3934_v41 = vadd.f32 %v8433_v26, %v8350_v51 }
0x1069   : > { %v6074_v31 = vpop.eup %6073  ;;  %v4206_v14 = vmul.f32 %v4174_v54, %v3928_v24  ;;  %v4176_v29 = vmul.f32 %v6072_v15, %v8431_v25  ;;  %6093 = vpow2.f32 %v4749_v47  ;;  %v3938_v26 = vadd.f32 %v8441_v55, %v8342_v11 }
0x106a   : > { %v6076_v5 = vpop.eup %6075  ;;  %v4207_v3 = vmul.f32 %v4175_v56, %v3930_v37  ;;  %v4177_v1 = vmul.f32 %v6074_v31, %v8437_v28  ;;  %6095 = vpow2.f32 %v4750_v16 }
0x106b   : > { %v6078_v62 = vpop.eup %6077  ;;  %v4208_v58 = vmul.f32 %v4176_v29, %v3932_v12  ;;  %v4086_v59 = vadd.f32 1.0, %v6076_v5  ;;  %6097 = vpow2.f32 %v4751_v35  ;;  %v3940_v35 = vadd.f32 %v8446_v49, %v8350_v51 }
0x106c   : > { %v6080_v40 = vpop.eup %6079  ;;  %v4209_v0 = vmul.f32 %v4177_v1, %v3934_v41  ;;  %v4087_v22 = vadd.f32 1.0, %v6078_v62  ;;  %v3942_v12 = vadd.f32 %v8451_v50, %v8342_v11 }
0x106d   : > { %v6082_v25 = vpop.eup %6081  ;;  %6099 = vrcp.f32 %v4086_v59  ;;  %v4088_v54 = vadd.f32 1.0, %v6080_v40  ;;  %v4230_v17 = vpack.c.bf16 %v4208_v58, %v4206_v14 }
0x106e   : > { %v6084_v47 = vpop.eup %6083  ;;  %6101 = vrcp.f32 %v4087_v22  ;;  %v4089_v24 = vadd.f32 1.0, %v6082_v25  ;;  %v4231_v15 = vpack.c.bf16 %v4209_v0, %v4207_v3 }
0x106f   : > { %v6086_v28 = vpop.eup %6085  ;;  %v4178_v56 = vmul.f32 %v6084_v47, %v8444_v38  ;;  %6103 = vrcp.f32 %v4088_v54  ;;  %v3950_v47 = vadd.f32 %v8470_v52, %v8350_v51 }
0x1070   : > { %v6088_v16 = vpop.eup %6087  ;;  %v4179_v37 = vmul.f32 %v6086_v28, %v8449_v7  ;;  %6105 = vrcp.f32 %v4089_v24  ;;  %4437 = vmatprep.mubr.bf16.mxu1 %v4231_v15  ;;  %v3944_v7 = vadd.f32 %v8457_v2, %v8350_v51  ;;  %v3948_v2 = vadd.f32 %v8465_v42, %v8342_v11 }
0x1071   : > { %v6090_v31 = vpop.eup %6089  ;;  %v4210_v14 = vmul.f32 %v4178_v56, %v3938_v26  ;;  %v4180_v29 = vmul.f32 %v6088_v16, %v8455_v30  ;;  %4438 = vmatmul.mubr.bf16.gmra.mrb[136].mxu1 %v4230_v17  ;;  %v3952_v56 = vadd.f32 %v8475_v46, %v8342_v11  ;;  %v3954_v42 = vadd.f32 %v8481_v33, %v8350_v51 }
0x1072   : > { %v6092_v38 = vpop.eup %6091  ;;  %v4211_v5 = vmul.f32 %v4179_v37, %v3940_v35  ;;  %v4181_v55 = vmul.f32 %v6090_v31, %v8461_v57 }
0x1073   : > { %v6094_v3 = vpop.eup %6093  ;;  %v4212_v1 = vmul.f32 %v4180_v29, %v3942_v12  ;;  %v4090_v49 = vadd.f32 1.0, %v6092_v38 }
0x1074   : > { %v6096_v41 = vpop.eup %6095  ;;  %v4213_v62 = vmul.f32 %v4181_v55, %v3944_v7  ;;  %v4091_v58 = vadd.f32 1.0, %v6094_v3 }
0x1075   : > { %v6098_v59 = vpop.eup %6097  ;;  %6107 = vrcp.f32 %v4090_v49  ;;  %v4092_v30 = vadd.f32 1.0, %v6096_v41  ;;  %v4232_v40 = vpack.c.bf16 %v4212_v1, %v4210_v14 }
0x1076   : > { %6109 = vrcp.f32 %v4091_v58  ;;  %v4093_v50 = vadd.f32 1.0, %v6098_v59  ;;  %v4233_v0 = vpack.c.bf16 %v4213_v62, %v4211_v5  ;;  %v3962_v5 = vadd.f32 %v8499_v53, %v8342_v11 }
0x1077   : > { %v6100_v22 = vpop.eup %6099  ;;  %6111 = vrcp.f32 %v4092_v30 }
0x1078   : > { %v6102_v25 = vpop.eup %6101  ;;  %v4182_v57 = vmul.f32 %v6100_v22, %v8468_v32  ;;  %6113 = vrcp.f32 %v4093_v50  ;;  %4445 = vmatprep.mubr.bf16.mxu1 %v4233_v0 }
0x1079   : > { %v6104_v54 = vpop.eup %6103  ;;  %v4183_v17 = vmul.f32 %v6102_v25, %v8473_v10  ;;  %4446 = vmatmul.mubr.bf16.gmra.mrb[140].mxu1 %v4232_v40 }
0x107a   : > { %v6106_v24 = vpop.eup %6105  ;;  %v4214_v15 = vmul.f32 %v4182_v57, %v3948_v2  ;;  %v4184_v28 = vmul.f32 %v6104_v54, %v8479_v18  ;;  %v3958_v18 = vadd.f32 %v8489_v39, %v8342_v11  ;;  %v3964_v39 = vadd.f32 %v8505_v21, %v8350_v51 }
0x107b   : > { %v4215_v32 = vmul.f32 %v4183_v17, %v3950_v47  ;;  %v4185_v26 = vmul.f32 %v6106_v24, %v8485_v19  ;;  %v3960_v19 = vadd.f32 %v8494_v27, %v8350_v51 }
0x107c   : > { %v4216_v16 = vmul.f32 %v4184_v28, %v3952_v56 }
0x107d   : > { %v4217_v37 = vmul.f32 %v4185_v26, %v3954_v42 }
0x107e   : > { %v4234_v10 = vpack.c.bf16 %v4216_v16, %v4214_v15 }
0x107f   : > { %v6108_v35 = vpop.eup %6107  ;;  %v4235_v31 = vpack.c.bf16 %v4217_v37, %v4215_v32 }
0x1080   : > { %v6110_v52 = vpop.eup %6109  ;;  %v4186_v14 = vmul.f32 %v6108_v35, %v8492_v60 }
0x1081   : > { %v6112_v29 = vpop.eup %6111  ;;  %v4187_v46 = vmul.f32 %v6110_v52, %v8497_v6  ;;  %4453 = vmatprep.mubr.bf16.mxu1 %v4235_v31 }
0x1082   : > { %v6114_v12 = vpop.eup %6113  ;;  %v4218_v33 = vmul.f32 %v4186_v14, %v3958_v18  ;;  %v4188_v38 = vmul.f32 %v6112_v29, %v8503_v23  ;;  %4454 = vmatmul.mubr.bf16.gmra.mrb[144].mxu1 %v4234_v10  ;;  %v8564_v23 = vld [vmem:[%s8679_s10] ss:$0 sm:$0xff] }
0x1083   : > { %v4219_v55 = vmul.f32 %v4187_v46, %v3960_v19  ;;  %v4189_v60 = vmul.f32 %v6114_v12, %v8509_v4 }
0x1084   : > { %v4220_v7 = vmul.f32 %v4188_v38, %v3962_v5 }
0x1085   : > { %v4221_v6 = vmul.f32 %v4189_v60, %v3964_v39 }
0x1086   : > { %v4236_v3 = vpack.c.bf16 %v4220_v7, %v4218_v33 }
0x1087   : > { %v4237_v27 = vpack.c.bf16 %v4221_v6, %v4219_v55 }
0x1089   : > { %4461 = vmatprep.mubr.bf16.mxu1 %v4237_v27 }
0x108a   : > { %4462 = vmatmul.mubr.bf16.gmra.mrb[148].mxu1 %v4236_v3 }
0x1108   : > { %v4956_v1 = vpop.f32.mrb[144].mxu0 }
0x1109   : > { %v4957_v11 = vpop.f32.mrb[145].mxu0 }
0x110a   : > { %v4958_v53 = vadd.f32 %v4957_v11, %v4956_v1  ;;  %v4959_v49 = vpop.f32.mrb[146].mxu0 }
0x110b   : > { %v4960_v4 = vpop.f32.mrb[147].mxu0 }
0x110c   : > { %v4408_v41 = vadd.f32 %v4958_v53, %v8564_v23  ;;  %v4961_v51 = vadd.f32 %v4960_v4, %v4959_v49 }
0x110e   : > { %v4470_v21 = vadd.f32 %v4408_v41, %v8074_v45  ;;  %v4411_v62 = vadd.f32 %v4961_v51, %v8564_v23  ;;  %v8898_v51 = vld [vmem:[#allocation24_spill] sm:$0xff] }
0x1110   : > { %4486 = vst [vmem:[%s8571_s22] sm:$0xff] %v4470_v21  ;;  %v4471_v58 = vadd.f32 %v4411_v62, %v8080_v36  ;;  %v4962_v59 = vpop.f32.mrb[148].mxu0  ;;  %v8899_v62 = vld [vmem:[#allocation26_spill] sm:$0xff] }
0x1111   : > { %v4963_v30 = vpop.f32.mrb[149].mxu0 }
0x1112   : > { %4487 = vst [vmem:[%s8571_s22 + $0x8] sm:$0xff] %v4471_v58  ;;  %v4964_v40 = vadd.f32 %v4963_v30, %v4962_v59  ;;  %v4965_v50 = vpop.f32.mrb[150].mxu0 }
0x1113   : > { %v4966_v0 = vpop.f32.mrb[151].mxu0 }
0x1114   : > { %v4416_v45 = vadd.f32 %v4964_v40, %v8564_v23  ;;  %v4967_v22 = vadd.f32 %v4966_v0, %v4965_v50 }
0x1116   : > { %v4472_v25 = vadd.f32 %v4416_v45, %v8077_v20  ;;  %v4419_v57 = vadd.f32 %v4967_v22, %v8564_v23  ;;  %v8900_v22 = vld [vmem:[#allocation25_spill] sm:$0xff] }
0x1118   : > { %4488 = vst [vmem:[%s8571_s22 + $0x10] sm:$0xff] %v4472_v25  ;;  %v4473_v2 = vadd.f32 %v4419_v57, %v8087_v34 }
0x1119   : > { %v4968_v54 = vpop.f32.mrb[128].mxu1 }
0x111a   : > { %4489 = vst [vmem:[%s8571_s22 + $0x18] sm:$0xff] %v4473_v2  ;;  %v4969_v36 = vpop.f32.mrb[129].mxu1  ;;  %v8902_v2 = vld [vmem:[#allocation27_spill] sm:$0xff] }
0x111b   : > { %v4970_v17 = vadd.f32 %v4969_v36, %v4968_v54  ;;  %v4971_v47 = vpop.f32.mrb[130].mxu1 }
0x111c   : > { %v4972_v24 = vpop.f32.mrb[131].mxu1 }
0x111d   : > { %v4424_v15 = vadd.f32 %v4970_v17, %v8564_v23  ;;  %v4973_v28 = vadd.f32 %v4972_v24, %v4971_v47 }
0x111f   : > { %v4474_v56 = vadd.f32 %v4424_v15, %v8094_v61  ;;  %v4427_v20 = vadd.f32 %v4973_v28, %v8564_v23 }
0x1121   : > { %4490 = vst [vmem:[%s8571_s22 + $0x20] sm:$0xff] %v4474_v56  ;;  %v4475_v32 = vadd.f32 %v4427_v20, %v8100_v48  ;;  %v4974_v26 = vpop.f32.mrb[132].mxu1 }
0x1122   : > { %v4975_v34 = vpop.f32.mrb[133].mxu1 }
0x1123   : > { %4491 = vst [vmem:[%s8571_s22 + $0x28] sm:$0xff] %v4475_v32  ;;  %v4976_v42 = vadd.f32 %v4975_v34, %v4974_v26  ;;  %v4977_v16 = vpop.f32.mrb[134].mxu1 }
0x1124   : > { %v4978_v37 = vpop.f32.mrb[135].mxu1 }
0x1125   : > { %v4432_v10 = vadd.f32 %v4976_v42, %v8564_v23  ;;  %v4979_v35 = vadd.f32 %v4978_v37, %v4977_v16 }
0x1127   : > { %v4476_v31 = vadd.f32 %v4432_v10, %v8097_v63  ;;  %v4435_v61 = vadd.f32 %v4979_v35, %v8564_v23 }
0x1129   : > { %4492 = vst [vmem:[%s8571_s22 + $0x30] sm:$0xff] %v4476_v31  ;;  %v4477_v52 = vadd.f32 %v4435_v61, %v8105_v44 }
0x112b   : > { %4493 = vst [vmem:[%s8571_s22 + $0x38] sm:$0xff] %v4477_v52 }
0x1144   : > { %v4980_v48 = vpop.f32.mrb[136].mxu1 }
0x1145   : > { %v4981_v14 = vpop.f32.mrb[137].mxu1 }
0x1146   : > { %v4982_v18 = vadd.f32 %v4981_v14, %v4980_v48  ;;  %v4983_v29 = vpop.f32.mrb[138].mxu1 }
0x1147   : > { %v4984_v46 = vpop.f32.mrb[139].mxu1 }
0x1148   : > { %v4440_v19 = vadd.f32 %v4982_v18, %v8564_v23  ;;  %v4985_v12 = vadd.f32 %v4984_v46, %v4983_v29 }
0x114a   : > { %v4478_v33 = vadd.f32 %v4440_v19, %v8114_v9  ;;  %v4443_v63 = vadd.f32 %v4985_v12, %v8564_v23 }
0x114c   : > { %4494 = vst [vmem:[%s8571_s22 + $0x40] sm:$0xff] %v4478_v33  ;;  %v4479_v38 = vadd.f32 %v4443_v63, %v8120_v8  ;;  %v4986_v5 = vpop.f32.mrb[140].mxu1 }
0x114d   : > { %v4987_v44 = vpop.f32.mrb[141].mxu1 }
0x114e   : > { %4495 = vst [vmem:[%s8571_s22 + $0x48] sm:$0xff] %v4479_v38  ;;  %v4988_v55 = vadd.f32 %v4987_v44, %v4986_v5  ;;  %v4989_v60 = vpop.f32.mrb[142].mxu1 }
0x114f   : > { %v4990_v39 = vpop.f32.mrb[143].mxu1 }
0x1150   : > { %v4448_v7 = vadd.f32 %v4988_v55, %v8564_v23  ;;  %v4991_v6 = vadd.f32 %v4990_v39, %v4989_v60 }
0x1152   : > { %v4480_v3 = vadd.f32 %v4448_v7, %v8117_v13  ;;  %v4451_v9 = vadd.f32 %v4991_v6, %v8564_v23 }
0x1154   : > { %4496 = vst [vmem:[%s8571_s22 + $0x50] sm:$0xff] %v4480_v3  ;;  %v4481_v27 = vadd.f32 %v4451_v9, %v8125_v43 }
0x1155   : > { %v4992_v1 = vpop.f32.mrb[144].mxu1 }
0x1156   : > { %4497 = vst [vmem:[%s8571_s22 + $0x58] sm:$0xff] %v4481_v27  ;;  %v4993_v8 = vpop.f32.mrb[145].mxu1 }
0x1157   : > { %v4994_v11 = vadd.f32 %v4993_v8, %v4992_v1  ;;  %v4995_v53 = vpop.f32.mrb[146].mxu1 }
0x1158   : > { %v4996_v49 = vpop.f32.mrb[147].mxu1 }
0x1159   : > { %v4456_v4 = vadd.f32 %v4994_v11, %v8564_v23  ;;  %v4997_v41 = vadd.f32 %v4996_v49, %v4995_v53 }
0x115b   : > { %v4482_v21 = vadd.f32 %v4456_v4, %v8898_v51  ;;  %v4459_v13 = vadd.f32 %v4997_v41, %v8564_v23 }
0x115d   : > { %4498 = vst [vmem:[%s8571_s22 + $0x60] sm:$0xff] %v4482_v21  ;;  %v4483_v58 = vadd.f32 %v4459_v13, %v8899_v62  ;;  %v4998_v43 = vpop.f32.mrb[148].mxu1 }
0x115e   : > { %v4999_v59 = vpop.f32.mrb[149].mxu1 }
0x115f   : > { %4499 = vst [vmem:[%s8571_s22 + $0x68] sm:$0xff] %v4483_v58  ;;  %v5000_v30 = vadd.f32 %v4999_v59, %v4998_v43  ;;  %v5001_v40 = vpop.f32.mrb[150].mxu1 }
0x1160   : > { %v5002_v50 = vpop.f32.mrb[151].mxu1 }
0x1161   : > { %v4464_v0 = vadd.f32 %v5000_v30, %v8564_v23  ;;  %v5003_v45 = vadd.f32 %v5002_v50, %v5001_v40 }
0x1163   : > { %v4484_v25 = vadd.f32 %v4464_v0, %v8900_v22  ;;  %v4467_v57 = vadd.f32 %v5003_v45, %v8564_v23 }
0x1165   : > { %4500 = vst [vmem:[%s8571_s22 + $0x70] sm:$0xff] %v4484_v25  ;;  %v4485_v54 = vadd.f32 %v4467_v57, %v8902_v2 }
0x1167   : > { %4501 = vst [vmem:[%s8571_s22 + $0x78] sm:$0xff] %v4485_v54 }
0x1168   : > { %6202 = shalt.err (!%p6199_p7)
}
0x1169   : > { %s6203_s27 = scalar_lea.hbm %s8620_s12, 2048  ;;  %s6207_s28 = scalar_lea.hbm %s8901_s30, 4096 }
0x116a   : > { %p6204_p9 = scmp.ne.s32.totalorder %s8620_s12, %s6203_s27  ;;  %p6208_p5 = scmp.lt.u32.totalorder %s8620_s12, %s8901_s30 }
0x116b   : > { %p6209_p11 = scmp.lt.u32.totalorder %s6207_s28, %s6203_s27  ;;  %p6211_p4 = scmp.lt.u32.totalorder %s6203_s27, %s8620_s12 }
0x116c   : > { %p6205_p2 = pnand %p6204_p9, %p6425_p12 }
0x116d   : > { %p6210_p1 = por %p6209_p11, %p6208_p5 }
0x116e   : > { %p6206_p0 = pneg %p6205_p2 }
0x116f   : > { %p6212_p6 = por %p6211_p4, %p6210_p1 }
0x1171   : > { %p6213_p8 = pnand %p6212_p6, %p6206_p0 }
0x1173   : > { %6216 = shalt.err (!%p6213_p8)
}
0x1174   : > { %s6272_s13 = smov 128   ;;  %s6273_s11 = smov 8  }
0x1175   : > { %5386 = dma.vmem_to_hbm [thread:$0]  (%p6425_p12), %s8622_s23, 2048, %s8620_s12, %s4503_s21, %s6272_s13, %s6272_s13, %s6273_s11  }
0x1176 PF: > { %s8903_s24 = sld [smem:[#allocation11_spill]]  ;;  %s8904_s15 = sld [smem:[#allocation12_spill]] }
0x1177   : > { %p8906_p13 = scmp.ge.s32.totalorder %s6259_s20, 2 }
0x117c   : > { %s4531_s17 = sand.u32 1, %s8903_s24   ;;  %p8905_p10 = scmp.ne.s32.totalorder %s8904_s15, 0 }
0x117d   : > { %s4532_s27 = scalar_lea.sflag [#allocation4], %s4531_s17 }
0x117e   : > { %p5397_p3 = pnand %p8906_p13, %p8905_p10 }
0x1180   : > { %6242 = dma.done.wait (!%p5397_p3), %s4532_s27, 2048  }
0x1181   : > { %6244 = vsyncadd (!%p5397_p3), %s4532_s27, 4294965248  ;;  %s8907_s20 = sld [smem:[#allocation13_spill]]  ;;  %s8908_s17 = smov %s6251_s18 }
0x1182   : > { %s8909_s18 = smov %s6255_s19  ;;  %s8910_s19 = smov %s6421_s29 }
0x1187   : > { %p25_p7 = scmp.ge.s32.totalorder %s8907_s20, 4  }
0x1189   :  { %27 = sbr.rel (!%p25_p7) target bundleno = 8 (0x8), region = 113 }
0x1190   :  { %4537 = vsyncpa [#allocation3], 1 }
0x1191   :  { %4539 = vsyncpa [#allocation3 + $0x1], 1 }
0x1192   :  { %4540 = vsyncpa [#allocation6], 1 }
0x1193   :  { %4541 = vsyncpa [#allocation4], 1 }
0x1194   :  { %4543 = vsyncpa [#allocation4 + $0x1], 1 }

</bundles_post_ra>
